<compile_context>
chip_gen: v7x
topology: tpu7x:2x2x1
jax: 0.10.0
libtpu: 0.0.40
codegen_flags: <defaults>
</compile_context>

<pallas_src>
import math

import jax
import jax.numpy as jnp
from jax.experimental import pallas as pl
from jax.experimental.pallas import tpu as pltpu

# ---------------- small synthetic config ----------------
B = 2           # batch
S = 8           # sequence length == num_features
H = 24          # hidden size (divisible by num_heads=3)
NH = 3          # attention heads
HD = H // NH    # head dim
FF = 4 * H      # FFN intermediate size
NLAYERS = 2     # encoder depth (kept small for the synthetic run)
H1 = 128        # fc hidden1
H2 = 64         # fc hidden2
LN_EPS = 1e-12
BN_EPS = 1e-5

PAD = 128            # one lane-tile per (head x q/k/v) slot
CTXW = NH * PAD      # width of the per-head-padded context slab
QKVW = 3 * CTXW      # width of the fused, padded QKV projection


def _layernorm(x, gamma, beta):
    # one-pass variance: E[x] and E[x^2] are independent cross-lane reductions
    mu = jnp.mean(x, axis=-1, keepdims=True)
    ms = jnp.mean(x * x, axis=-1, keepdims=True)
    var = ms - mu * mu
    return (x - mu) * jax.lax.rsqrt(var + LN_EPS) * gamma + beta


# ---------------- fused forward kernel (parametrized by rows-per-step) ----------------
def make_kernel(BB):
    """BB = number of batch elements processed in one grid step."""

    def kernel(x_ref, pos_ref, embln_ref,
               wqkv_ref, bqkv_ref, wo_ref, bo_ref,
               w1_ref, b1_ref, w2_ref, b2_ref, ln_ref,
               fw1_ref, fb1_ref, fw2_ref, fb2_ref, fw3_ref, fb3_ref,
               o_ref):
        bf16 = jnp.bfloat16
        embln = embln_ref[...]                                  # [2, H]
        # embeddings: inputs_embeds + position embeddings -> LayerNorm
        h = _layernorm(x_ref[...] + pos_ref[...],
                       embln[0:1, :], embln[1:2, :])            # [BB*S, H] f32

        scale = 1.0 / math.sqrt(HD)

        # ----- NLAYERS BERT encoder layers, statically unrolled -----
        for l in range(NLAYERS):
            # fused, lane-padded QKV projection: one (BB*S, H) @ (H, QKVW) dot
            qkv = (jnp.dot(h.astype(bf16), wqkv_ref[l],
                           preferred_element_type=jnp.float32)
                   + bqkv_ref[l])                               # [BB*S, QKVW] f32

            # attention is strictly per (batch element, head)
            ctx_rows = []
            for b in range(BB):
                r0 = b * S
                head_ctx = []
                for hh in range(NH):
                    q = qkv[r0:r0 + S, hh * PAD:(hh + 1) * PAD]               # [S,128]
                    k = qkv[r0:r0 + S, CTXW + hh * PAD:CTXW + (hh + 1) * PAD]
                    v = qkv[r0:r0 + S, 2 * CTXW + hh * PAD:2 * CTXW + (hh + 1) * PAD]
                    s = jax.lax.dot_general(                    # q @ k^T (pad lanes are 0)
                        q.astype(bf16), k.astype(bf16),
                        (((1,), (1,)), ((), ())),
                        preferred_element_type=jnp.float32) * scale           # [S,S]
                    s = s - jnp.max(s, axis=-1, keepdims=True)
                    p = jnp.exp(s)
                    p = p * pl.reciprocal(jnp.sum(p, axis=-1, keepdims=True),
                                          approx=True)
                    head_ctx.append(jnp.dot(p.astype(bf16), v.astype(bf16),
                                            preferred_element_type=jnp.float32))
                # lane-aligned (128-multiple) concat: plain vreg placement
                ctx_rows.append(jnp.concatenate(head_ctx, axis=1))            # [S, CTXW]
            ctx = ctx_rows[0] if BB == 1 else jnp.concatenate(ctx_rows, axis=0)

            # single zero-padded output projection: (BB*S, CTXW) @ (CTXW, H)
            attn = (jnp.dot(ctx.astype(bf16), wo_ref[l],
                            preferred_element_type=jnp.float32) + bo_ref[l])

            lnl = ln_ref[l]                                     # [4, H]
            h = _layernorm(h + attn, lnl[0:1, :], lnl[1:2, :])

            # ReLU FFN (hidden_act='relu')
            ff = jnp.maximum(
                jnp.dot(h.astype(bf16), w1_ref[l],
                        preferred_element_type=jnp.float32) + b1_ref[l], 0.0)
            ff = (jnp.dot(ff.astype(bf16), w2_ref[l],
                          preferred_element_type=jnp.float32) + b2_ref[l])
            h = _layernorm(h + ff, lnl[2:3, :], lnl[3:4, :])

        # ----- head: torch.max(embedding, dim=-1) then folded Linear/BN/ReLU MLP -----
        fw1 = fw1_ref[...]                                      # [S, H1] f32
        fb1 = fb1_ref[...]
        for b in range(BB):
            h_b = h[b * S:(b + 1) * S, :]                       # [S, H]
            pooled = jnp.max(h_b, axis=-1, keepdims=True)       # [S, 1]  (max over hidden)
            # (1,S) @ (S,H1) via broadcast-multiply + sublane reduce (no transpose)
            y = jnp.sum(pooled * fw1, axis=0, keepdims=True) + fb1
            y = jnp.maximum(y, 0.0)                             # [1, H1]
            y = jnp.maximum(
                jnp.dot(y.astype(bf16), fw2_ref[...],
                        preferred_element_type=jnp.float32) + fb2_ref[...], 0.0)
            o_ref[b] = (jnp.dot(y, fw3_ref[...],
                                preferred_element_type=jnp.float32)
                        + fb3_ref[...])                         # [1, 1]

    return kernel


# ---------------- pallas_call builder (generation switch) ----------------
def _use_batch_grid():
    """True on dual-TensorCore chips (v7x): one batch element per grid step/core."""
    try:
        kind = jax.devices()[0].device_kind.lower()
    except Exception:
        return False
    return ("v7" in kind) or ("7x" in kind)


def _build_fused_call():
    batch_grid = _use_batch_grid() and B > 1
    BB = 1 if batch_grid else B
    grid = (B // BB,)

    def cspec(shape):
        zeros = (0,) * len(shape)
        return pl.BlockSpec(shape, lambda b: zeros)             # resident across grid

    if batch_grid:
        x_spec = pl.BlockSpec((S, H), lambda b: (b, 0))
        pos_spec = pl.BlockSpec((S, H), lambda b: (b, 0))
        out_spec = pl.BlockSpec((1, 1, 1), lambda b: (b, 0, 0))
        semantics = ("parallel",)
    else:
        x_spec = pl.BlockSpec((B * S, H), lambda b: (0, 0))
        pos_spec = pl.BlockSpec((B * S, H), lambda b: (0, 0))
        out_spec = pl.BlockSpec((B, 1, 1), lambda b: (0, 0, 0))
        semantics = ("arbitrary",)

    in_specs = [
        x_spec,                                  # inputs_embeds [B*S, H]
        pos_spec,                                # position embeddings, tiled [B*S, H]
        cspec((2, H)),                           # embedding LN gamma/beta
        cspec((NLAYERS, H, QKVW)),               # fused lane-padded QKV weight (bf16)
        cspec((NLAYERS, 1, QKVW)),               # fused lane-padded QKV bias
        cspec((NLAYERS, CTXW, H)),               # padded attn output weight (bf16)
        cspec((NLAYERS, 1, H)),                  # attn output bias
        cspec((NLAYERS, H, FF)),                 # FFN in weight (bf16)
        cspec((NLAYERS, 1, FF)),                 # FFN in bias
        cspec((NLAYERS, FF, H)),                 # FFN out weight (bf16)
        cspec((NLAYERS, 1, H)),                  # FFN out bias
        cspec((NLAYERS, 4, H)),                  # LN1/LN2 gamma/beta
        cspec((S, H1)), cspec((1, H1)),          # head fc1 (BN folded, f32)
        cspec((H1, H2)), cspec((1, H2)),         # head fc2 (BN folded, weight bf16)
        cspec((H2, 1)), cspec((1, 1)),           # head fc3
    ]
    return pl.pallas_call(
        make_kernel(BB),
        out_shape=jax.ShapeDtypeStruct((B, 1, 1), jnp.float32),
        grid_spec=pltpu.PrefetchScalarGridSpec(
            num_scalar_prefetch=0,
            grid=grid,
            in_specs=in_specs,
            out_specs=out_spec),
        compiler_params=pltpu.CompilerParams(
            dimension_semantics=semantics,
            vmem_limit_bytes=32 * 1024 * 1024),
    )


_FUSED_CALL = None


def _get_fused_call():
    global _FUSED_CALL
    if _FUSED_CALL is None:
        _FUSED_CALL = _build_fused_call()
    return _FUSED_CALL


# ---------------- deterministic parameter init (natural layout) ----------------
def _xavier_uniform(key, shape):
    fan_in, fan_out = shape
    limit = math.sqrt(6.0 / (fan_in + fan_out))
    return jax.random.uniform(key, shape, jnp.float32, -limit, limit)


def init_params(key):
    keys = iter(jax.random.split(key, 64))
    nrm = lambda shape: 0.02 * jax.random.normal(next(keys), shape, jnp.float32)

    params = {
        'pos_emb': nrm((S, H)),
        'emb_ln_g': jnp.ones((1, H), jnp.float32),
        'emb_ln_b': jnp.zeros((1, H), jnp.float32),
        'layers': [],
    }
    for _ in range(NLAYERS):
        params['layers'].append({
            'wq': nrm((H, H)), 'bq': jnp.zeros((1, H), jnp.float32),
            'wk': nrm((H, H)), 'bk': jnp.zeros((1, H), jnp.float32),
            'wv': nrm((H, H)), 'bv': jnp.zeros((1, H), jnp.float32),
            'wo': nrm((H, H)), 'bo': jnp.zeros((1, H), jnp.float32),
            'ln1g': jnp.ones((1, H), jnp.float32), 'ln1b': jnp.zeros((1, H), jnp.float32),
            'w1': nrm((H, FF)), 'b1': jnp.zeros((1, FF), jnp.float32),
            'w2': nrm((FF, H)), 'b2': jnp.zeros((1, H), jnp.float32),
            'ln2g': jnp.ones((1, H), jnp.float32), 'ln2b': jnp.zeros((1, H), jnp.float32),
        })
    params['fc'] = {
        'w1': _xavier_uniform(next(keys), (S, H1)), 'b1': jnp.zeros((1, H1), jnp.float32),
        'bn1_g': jnp.ones((1, H1), jnp.float32), 'bn1_b': jnp.zeros((1, H1), jnp.float32),
        'bn1_m': jnp.zeros((1, H1), jnp.float32), 'bn1_v': jnp.ones((1, H1), jnp.float32),
        'w2': _xavier_uniform(next(keys), (H1, H2)), 'b2': jnp.zeros((1, H2), jnp.float32),
        'bn2_g': jnp.ones((1, H2), jnp.float32), 'bn2_b': jnp.zeros((1, H2), jnp.float32),
        'bn2_m': jnp.zeros((1, H2), jnp.float32), 'bn2_v': jnp.ones((1, H2), jnp.float32),
        'w3': _xavier_uniform(next(keys), (H2, 1)), 'b3': jnp.zeros((1, 1), jnp.float32),
    }
    return params


# ---------------- host-side packing: lane-pad heads, fuse QKV, fold BN, bf16 ----------------
def pack_params(params):
    L = params['layers']

    def stack(name, dtype=jnp.float32):
        return jnp.stack([lp[name] for lp in L]).astype(dtype)

    def pad_cols(w):                      # [rows, H] -> [rows, CTXW], head hh -> lane slot hh
        out = jnp.zeros((w.shape[0], CTXW), jnp.float32)
        for hh in range(NH):
            out = out.at[:, hh * PAD:hh * PAD + HD].set(w[:, hh * HD:(hh + 1) * HD])
        return out

    def pad_rows(w):                      # [H, cols] -> [CTXW, cols]
        out = jnp.zeros((CTXW, w.shape[1]), jnp.float32)
        for hh in range(NH):
            out = out.at[hh * PAD:hh * PAD + HD, :].set(w[hh * HD:(hh + 1) * HD, :])
        return out

    wqkv = jnp.stack([jnp.concatenate(
        [pad_cols(lp['wq']), pad_cols(lp['wk']), pad_cols(lp['wv'])], axis=1)
        for lp in L]).astype(jnp.bfloat16)                      # [L, H, QKVW]
    bqkv = jnp.stack([jnp.concatenate(
        [pad_cols(lp['bq']), pad_cols(lp['bk']), pad_cols(lp['bv'])], axis=1)
        for lp in L])                                           # [L, 1, QKVW] f32
    wo = jnp.stack([pad_rows(lp['wo']) for lp in L]).astype(jnp.bfloat16)   # [L, CTXW, H]
    ln = jnp.stack([jnp.concatenate(
        [lp['ln1g'], lp['ln1b'], lp['ln2g'], lp['ln2b']], axis=0) for lp in L])
    embln = jnp.concatenate([params['emb_ln_g'], params['emb_ln_b']], axis=0)

    # Fold eval-mode BatchNorm1d into the preceding Linear layers.
    fc = params['fc']
    s1 = fc['bn1_g'] * jax.lax.rsqrt(fc['bn1_v'] + BN_EPS)      # [1, H1]
    fw1 = fc['w1'] * s1
    fb1 = (fc['b1'] - fc['bn1_m']) * s1 + fc['bn1_b']
    s2 = fc['bn2_g'] * jax.lax.rsqrt(fc['bn2_v'] + BN_EPS)      # [1, H2]
    fw2 = (fc['w2'] * s2).astype(jnp.bfloat16)
    fb2 = (fc['b2'] - fc['bn2_m']) * s2 + fc['bn2_b']

    return {
        'pos_tiled': jnp.tile(params['pos_emb'], (B, 1)),       # [B*S, H]
        'embln': embln,
        'wqkv': wqkv, 'bqkv': bqkv, 'wo': wo, 'bo': stack('bo'),
        'w1': stack('w1', jnp.bfloat16), 'b1': stack('b1'),
        'w2': stack('w2', jnp.bfloat16), 'b2': stack('b2'),
        'ln': ln,
        'fw1': fw1, 'fb1': fb1, 'fw2': fw2, 'fb2': fb2,
        'fw3': fc['w3'], 'fb3': fc['b3'],
    }


# ---------------- full forward (single pallas_call) ----------------
def forward(packed, inputs_embeds):
    x2d = inputs_embeds.reshape(B * S, H)                       # batch-major rows
    out = _get_fused_call()(
        x2d, packed['pos_tiled'], packed['embln'],
        packed['wqkv'], packed['bqkv'], packed['wo'], packed['bo'],
        packed['w1'], packed['b1'], packed['w2'], packed['b2'], packed['ln'],
        packed['fw1'], packed['fb1'], packed['fw2'], packed['fb2'],
        packed['fw3'], packed['fb3'])
    return out[:, 0, 0]                                         # .squeeze() -> [B]


if __name__ == "__main__":
    key = jax.random.PRNGKey(0)
    k_in, k_par = jax.random.split(key)
    inputs_embeds = jax.random.normal(k_in, (B, S, H), jnp.float32)
    params = init_params(k_par)
    packed = pack_params(params)

    logits = forward(packed, inputs_embeds)
    logits = jax.block_until_ready(logits)

    assert logits.shape == (B,), logits.shape
    assert bool(jnp.all(jnp.isfinite(logits)))
    print("KERNEL_OK")
</pallas_src>

<mosaic_0001>
module attributes {stable_mosaic.version = 11 : i64} {
  func.func @kernel(%arg0: i32, %arg1: memref<16x24xf32, #tpu.memory_space<vmem>>, %arg2: memref<16x24xf32, #tpu.memory_space<vmem>>, %arg3: memref<2x24xf32, #tpu.memory_space<vmem>>, %arg4: memref<2x24x1152xbf16, #tpu.memory_space<vmem>>, %arg5: memref<2x1x1152xf32, #tpu.memory_space<vmem>>, %arg6: memref<2x384x24xbf16, #tpu.memory_space<vmem>>, %arg7: memref<2x1x24xf32, #tpu.memory_space<vmem>>, %arg8: memref<2x24x96xbf16, #tpu.memory_space<vmem>>, %arg9: memref<2x1x96xf32, #tpu.memory_space<vmem>>, %arg10: memref<2x96x24xbf16, #tpu.memory_space<vmem>>, %arg11: memref<2x1x24xf32, #tpu.memory_space<vmem>>, %arg12: memref<2x4x24xf32, #tpu.memory_space<vmem>>, %arg13: memref<8x128xf32, #tpu.memory_space<vmem>>, %arg14: memref<1x128xf32, #tpu.memory_space<vmem>>, %arg15: memref<128x64xbf16, #tpu.memory_space<vmem>>, %arg16: memref<1x64xf32, #tpu.memory_space<vmem>>, %arg17: memref<64x1xf32, #tpu.memory_space<vmem>>, %arg18: memref<1x1xf32, #tpu.memory_space<vmem>>, %arg19: memref<2x1x1xf32, #tpu.memory_space<vmem>>) attributes {dimension_semantics = [#tpu.dimension_semantics<arbitrary>], iteration_bounds = array<i64: 1>, scalar_prefetch = 0 : i64, scratch_operands = 0 : i64, tpu.core_type = #tpu.core_type<tc>, window_params = [{pipeline_mode = #tpu.pipeline_mode<synchronous>, transform_indices = @transform_0, window_bounds = array<i64: 16, 24>}, {pipeline_mode = #tpu.pipeline_mode<synchronous>, transform_indices = @transform_1, window_bounds = array<i64: 16, 24>}, {pipeline_mode = #tpu.pipeline_mode<synchronous>, transform_indices = @transform_2, window_bounds = array<i64: 2, 24>}, {pipeline_mode = #tpu.pipeline_mode<synchronous>, transform_indices = @transform_3, window_bounds = array<i64: 2, 24, 1152>}, {pipeline_mode = #tpu.pipeline_mode<synchronous>, transform_indices = @transform_4, window_bounds = array<i64: 2, 1, 1152>}, {pipeline_mode = #tpu.pipeline_mode<synchronous>, transform_indices = @transform_5, window_bounds = array<i64: 2, 384, 24>}, {pipeline_mode = #tpu.pipeline_mode<synchronous>, transform_indices = @transform_6, window_bounds = array<i64: 2, 1, 24>}, {pipeline_mode = #tpu.pipeline_mode<synchronous>, transform_indices = @transform_7, window_bounds = array<i64: 2, 24, 96>}, {pipeline_mode = #tpu.pipeline_mode<synchronous>, transform_indices = @transform_8, window_bounds = array<i64: 2, 1, 96>}, {pipeline_mode = #tpu.pipeline_mode<synchronous>, transform_indices = @transform_9, window_bounds = array<i64: 2, 96, 24>}, {pipeline_mode = #tpu.pipeline_mode<synchronous>, transform_indices = @transform_10, window_bounds = array<i64: 2, 1, 24>}, {pipeline_mode = #tpu.pipeline_mode<synchronous>, transform_indices = @transform_11, window_bounds = array<i64: 2, 4, 24>}, {pipeline_mode = #tpu.pipeline_mode<synchronous>, transform_indices = @transform_12, window_bounds = array<i64: 8, 128>}, {pipeline_mode = #tpu.pipeline_mode<synchronous>, transform_indices = @transform_13, window_bounds = array<i64: 1, 128>}, {pipeline_mode = #tpu.pipeline_mode<synchronous>, transform_indices = @transform_14, window_bounds = array<i64: 128, 64>}, {pipeline_mode = #tpu.pipeline_mode<synchronous>, transform_indices = @transform_15, window_bounds = array<i64: 1, 64>}, {pipeline_mode = #tpu.pipeline_mode<synchronous>, transform_indices = @transform_16, window_bounds = array<i64: 64, 1>}, {pipeline_mode = #tpu.pipeline_mode<synchronous>, transform_indices = @transform_17, window_bounds = array<i64: 1, 1>}, {pipeline_mode = #tpu.pipeline_mode<synchronous>, transform_indices = @transform_18, window_bounds = array<i64: 2, 1, 1>}]} {
    %c0 = arith.constant 0 : index
    %c0_0 = arith.constant 0 : index
    %0 = vector.load %arg3[%c0, %c0_0] : memref<2x24xf32, #tpu.memory_space<vmem>>, vector<2x24xf32>
    %c0_1 = arith.constant 0 : index
    %c0_2 = arith.constant 0 : index
    %1 = vector.load %arg1[%c0_1, %c0_2] : memref<16x24xf32, #tpu.memory_space<vmem>>, vector<16x24xf32>
    %c0_3 = arith.constant 0 : index
    %c0_4 = arith.constant 0 : index
    %2 = vector.load %arg2[%c0_3, %c0_4] : memref<16x24xf32, #tpu.memory_space<vmem>>, vector<16x24xf32>
    %3 = arith.addf %1, %2 : vector<16x24xf32>
    %4 = vector.extract_strided_slice %0 {offsets = [0, 0], sizes = [1, 24], strides = [1, 1]} : vector<2x24xf32> to vector<1x24xf32>
    %5 = vector.extract_strided_slice %0 {offsets = [1, 0], sizes = [1, 24], strides = [1, 1]} : vector<2x24xf32> to vector<1x24xf32>
    %cst = arith.constant dense<0.000000e+00> : vector<16xf32>
    %6 = vector.multi_reduction <add>, %3, %cst [1] : vector<16x24xf32> to vector<16xf32>
    %7 = vector.shape_cast %6 : vector<16xf32> to vector<16x1xf32>
    %cst_5 = arith.constant 2.400000e+01 : f32
    %8 = vector.broadcast %cst_5 : f32 to vector<16x1xf32>
    %9 = arith.divf %7, %8 : vector<16x1xf32>
    %10 = arith.mulf %3, %3 : vector<16x24xf32>
    %cst_6 = arith.constant dense<0.000000e+00> : vector<16xf32>
    %11 = vector.multi_reduction <add>, %10, %cst_6 [1] : vector<16x24xf32> to vector<16xf32>
    %12 = vector.shape_cast %11 : vector<16xf32> to vector<16x1xf32>
    %cst_7 = arith.constant 2.400000e+01 : f32
    %13 = vector.broadcast %cst_7 : f32 to vector<16x1xf32>
    %14 = arith.divf %12, %13 : vector<16x1xf32>
    %15 = arith.mulf %9, %9 : vector<16x1xf32>
    %16 = arith.subf %14, %15 : vector<16x1xf32>
    %17 = vector.broadcast %9 : vector<16x1xf32> to vector<16x24xf32>
    %18 = arith.subf %3, %17 : vector<16x24xf32>
    %cst_8 = arith.constant 9.99999996E-13 : f32
    %19 = vector.broadcast %cst_8 : f32 to vector<16x1xf32>
    %20 = arith.addf %16, %19 : vector<16x1xf32>
    %21 = math.rsqrt %20 : vector<16x1xf32>
    %22 = vector.broadcast %21 : vector<16x1xf32> to vector<16x24xf32>
    %23 = arith.mulf %18, %22 : vector<16x24xf32>
    %24 = vector.broadcast %4 : vector<1x24xf32> to vector<16x24xf32>
    %25 = arith.mulf %23, %24 : vector<16x24xf32>
    %26 = vector.broadcast %5 : vector<1x24xf32> to vector<16x24xf32>
    %27 = arith.addf %25, %26 : vector<16x24xf32>
    %28 = arith.truncf %27 : vector<16x24xf32> to vector<16x24xbf16>
    %c0_9 = arith.constant 0 : index
    %c0_10 = arith.constant 0 : index
    %c0_11 = arith.constant 0 : index
    %29 = vector.load %arg4[%c0_9, %c0_10, %c0_11] : memref<2x24x1152xbf16, #tpu.memory_space<vmem>>, vector<1x24x1152xbf16>
    %30 = vector.shape_cast %29 : vector<1x24x1152xbf16> to vector<24x1152xbf16>
    %cst_12 = arith.constant dense<0.000000e+00> : vector<16x1152xf32>
    %31 = tpu.matmul %28, %30, %cst_12 {dimension_numbers = #tpu.dot_dimension_numbers<[1], [0], [0], [1], [0, 0, 1, 1], [], []>} : vector<16x24xbf16>, vector<24x1152xbf16>, vector<16x1152xf32> -> vector<16x1152xf32>
    %c0_13 = arith.constant 0 : index
    %c0_14 = arith.constant 0 : index
    %c0_15 = arith.constant 0 : index
    %32 = vector.load %arg5[%c0_13, %c0_14, %c0_15] : memref<2x1x1152xf32, #tpu.memory_space<vmem>>, vector<1x1x1152xf32>
    %33 = vector.shape_cast %32 : vector<1x1x1152xf32> to vector<1x1152xf32>
    %34 = vector.broadcast %33 : vector<1x1152xf32> to vector<16x1152xf32>
    %35 = arith.addf %31, %34 : vector<16x1152xf32>
    %36 = vector.extract_strided_slice %35 {offsets = [0, 0], sizes = [8, 128], strides = [1, 1]} : vector<16x1152xf32> to vector<8x128xf32>
    %37 = vector.extract_strided_slice %35 {offsets = [0, 384], sizes = [8, 128], strides = [1, 1]} : vector<16x1152xf32> to vector<8x128xf32>
    %38 = vector.extract_strided_slice %35 {offsets = [0, 768], sizes = [8, 128], strides = [1, 1]} : vector<16x1152xf32> to vector<8x128xf32>
    %39 = arith.truncf %36 : vector<8x128xf32> to vector<8x128xbf16>
    %40 = arith.truncf %37 : vector<8x128xf32> to vector<8x128xbf16>
    %cst_16 = arith.constant dense<0.000000e+00> : vector<8x8xf32>
    %41 = tpu.matmul %39, %40, %cst_16 {dimension_numbers = #tpu.dot_dimension_numbers<[1], [1], [0], [0], [0, 0, 1, 0], [], []>} : vector<8x128xbf16>, vector<8x128xbf16>, vector<8x8xf32> -> vector<8x8xf32>
    %cst_17 = arith.constant 0.353553385 : f32
    %42 = vector.broadcast %cst_17 : f32 to vector<8x8xf32>
    %43 = arith.mulf %41, %42 : vector<8x8xf32>
    %cst_18 = arith.constant dense<0xFF800000> : vector<8xf32>
    %44 = vector.multi_reduction <maximumf>, %43, %cst_18 [1] : vector<8x8xf32> to vector<8xf32>
    %45 = vector.shape_cast %44 : vector<8xf32> to vector<8x1xf32>
    %46 = vector.broadcast %45 : vector<8x1xf32> to vector<8x8xf32>
    %47 = arith.subf %43, %46 : vector<8x8xf32>
    %48 = math.exp %47 : vector<8x8xf32>
    %cst_19 = arith.constant dense<0.000000e+00> : vector<8xf32>
    %49 = vector.multi_reduction <add>, %48, %cst_19 [1] : vector<8x8xf32> to vector<8xf32>
    %50 = vector.shape_cast %49 : vector<8xf32> to vector<8x1xf32>
    %51 = tpu.reciprocal %50 {approx = true} : vector<8x1xf32> -> vector<8x1xf32>
    %52 = vector.broadcast %51 : vector<8x1xf32> to vector<8x8xf32>
    %53 = arith.mulf %48, %52 : vector<8x8xf32>
    %54 = arith.truncf %53 : vector<8x8xf32> to vector<8x8xbf16>
    %55 = arith.truncf %38 : vector<8x128xf32> to vector<8x128xbf16>
    %cst_20 = arith.constant dense<0.000000e+00> : vector<8x128xf32>
    %56 = tpu.matmul %54, %55, %cst_20 {dimension_numbers = #tpu.dot_dimension_numbers<[1], [0], [0], [1], [0, 0, 1, 1], [], []>} : vector<8x8xbf16>, vector<8x128xbf16>, vector<8x128xf32> -> vector<8x128xf32>
    %57 = vector.extract_strided_slice %35 {offsets = [0, 128], sizes = [8, 128], strides = [1, 1]} : vector<16x1152xf32> to vector<8x128xf32>
    %58 = vector.extract_strided_slice %35 {offsets = [0, 512], sizes = [8, 128], strides = [1, 1]} : vector<16x1152xf32> to vector<8x128xf32>
    %59 = vector.extract_strided_slice %35 {offsets = [0, 896], sizes = [8, 128], strides = [1, 1]} : vector<16x1152xf32> to vector<8x128xf32>
    %60 = arith.truncf %57 : vector<8x128xf32> to vector<8x128xbf16>
    %61 = arith.truncf %58 : vector<8x128xf32> to vector<8x128xbf16>
    %cst_21 = arith.constant dense<0.000000e+00> : vector<8x8xf32>
    %62 = tpu.matmul %60, %61, %cst_21 {dimension_numbers = #tpu.dot_dimension_numbers<[1], [1], [0], [0], [0, 0, 1, 0], [], []>} : vector<8x128xbf16>, vector<8x128xbf16>, vector<8x8xf32> -> vector<8x8xf32>
    %cst_22 = arith.constant 0.353553385 : f32
    %63 = vector.broadcast %cst_22 : f32 to vector<8x8xf32>
    %64 = arith.mulf %62, %63 : vector<8x8xf32>
    %cst_23 = arith.constant dense<0xFF800000> : vector<8xf32>
    %65 = vector.multi_reduction <maximumf>, %64, %cst_23 [1] : vector<8x8xf32> to vector<8xf32>
    %66 = vector.shape_cast %65 : vector<8xf32> to vector<8x1xf32>
    %67 = vector.broadcast %66 : vector<8x1xf32> to vector<8x8xf32>
    %68 = arith.subf %64, %67 : vector<8x8xf32>
    %69 = math.exp %68 : vector<8x8xf32>
    %cst_24 = arith.constant dense<0.000000e+00> : vector<8xf32>
    %70 = vector.multi_reduction <add>, %69, %cst_24 [1] : vector<8x8xf32> to vector<8xf32>
    %71 = vector.shape_cast %70 : vector<8xf32> to vector<8x1xf32>
    %72 = tpu.reciprocal %71 {approx = true} : vector<8x1xf32> -> vector<8x1xf32>
    %73 = vector.broadcast %72 : vector<8x1xf32> to vector<8x8xf32>
    %74 = arith.mulf %69, %73 : vector<8x8xf32>
    %75 = arith.truncf %74 : vector<8x8xf32> to vector<8x8xbf16>
    %76 = arith.truncf %59 : vector<8x128xf32> to vector<8x128xbf16>
    %cst_25 = arith.constant dense<0.000000e+00> : vector<8x128xf32>
    %77 = tpu.matmul %75, %76, %cst_25 {dimension_numbers = #tpu.dot_dimension_numbers<[1], [0], [0], [1], [0, 0, 1, 1], [], []>} : vector<8x8xbf16>, vector<8x128xbf16>, vector<8x128xf32> -> vector<8x128xf32>
    %78 = vector.extract_strided_slice %35 {offsets = [0, 256], sizes = [8, 128], strides = [1, 1]} : vector<16x1152xf32> to vector<8x128xf32>
    %79 = vector.extract_strided_slice %35 {offsets = [0, 640], sizes = [8, 128], strides = [1, 1]} : vector<16x1152xf32> to vector<8x128xf32>
    %80 = vector.extract_strided_slice %35 {offsets = [0, 1024], sizes = [8, 128], strides = [1, 1]} : vector<16x1152xf32> to vector<8x128xf32>
    %81 = arith.truncf %78 : vector<8x128xf32> to vector<8x128xbf16>
    %82 = arith.truncf %79 : vector<8x128xf32> to vector<8x128xbf16>
    %cst_26 = arith.constant dense<0.000000e+00> : vector<8x8xf32>
    %83 = tpu.matmul %81, %82, %cst_26 {dimension_numbers = #tpu.dot_dimension_numbers<[1], [1], [0], [0], [0, 0, 1, 0], [], []>} : vector<8x128xbf16>, vector<8x128xbf16>, vector<8x8xf32> -> vector<8x8xf32>
    %cst_27 = arith.constant 0.353553385 : f32
    %84 = vector.broadcast %cst_27 : f32 to vector<8x8xf32>
    %85 = arith.mulf %83, %84 : vector<8x8xf32>
    %cst_28 = arith.constant dense<0xFF800000> : vector<8xf32>
    %86 = vector.multi_reduction <maximumf>, %85, %cst_28 [1] : vector<8x8xf32> to vector<8xf32>
    %87 = vector.shape_cast %86 : vector<8xf32> to vector<8x1xf32>
    %88 = vector.broadcast %87 : vector<8x1xf32> to vector<8x8xf32>
    %89 = arith.subf %85, %88 : vector<8x8xf32>
    %90 = math.exp %89 : vector<8x8xf32>
    %cst_29 = arith.constant dense<0.000000e+00> : vector<8xf32>
    %91 = vector.multi_reduction <add>, %90, %cst_29 [1] : vector<8x8xf32> to vector<8xf32>
    %92 = vector.shape_cast %91 : vector<8xf32> to vector<8x1xf32>
    %93 = tpu.reciprocal %92 {approx = true} : vector<8x1xf32> -> vector<8x1xf32>
    %94 = vector.broadcast %93 : vector<8x1xf32> to vector<8x8xf32>
    %95 = arith.mulf %90, %94 : vector<8x8xf32>
    %96 = arith.truncf %95 : vector<8x8xf32> to vector<8x8xbf16>
    %97 = arith.truncf %80 : vector<8x128xf32> to vector<8x128xbf16>
    %cst_30 = arith.constant dense<0.000000e+00> : vector<8x128xf32>
    %98 = tpu.matmul %96, %97, %cst_30 {dimension_numbers = #tpu.dot_dimension_numbers<[1], [0], [0], [1], [0, 0, 1, 1], [], []>} : vector<8x8xbf16>, vector<8x128xbf16>, vector<8x128xf32> -> vector<8x128xf32>
    %99 = tpu.concatenate %56, %77, %98 in 1 : vector<8x128xf32>, vector<8x128xf32>, vector<8x128xf32> -> vector<8x384xf32>
    %100 = vector.extract_strided_slice %35 {offsets = [8, 0], sizes = [8, 128], strides = [1, 1]} : vector<16x1152xf32> to vector<8x128xf32>
    %101 = vector.extract_strided_slice %35 {offsets = [8, 384], sizes = [8, 128], strides = [1, 1]} : vector<16x1152xf32> to vector<8x128xf32>
    %102 = vector.extract_strided_slice %35 {offsets = [8, 768], sizes = [8, 128], strides = [1, 1]} : vector<16x1152xf32> to vector<8x128xf32>
    %103 = arith.truncf %100 : vector<8x128xf32> to vector<8x128xbf16>
    %104 = arith.truncf %101 : vector<8x128xf32> to vector<8x128xbf16>
    %cst_31 = arith.constant dense<0.000000e+00> : vector<8x8xf32>
    %105 = tpu.matmul %103, %104, %cst_31 {dimension_numbers = #tpu.dot_dimension_numbers<[1], [1], [0], [0], [0, 0, 1, 0], [], []>} : vector<8x128xbf16>, vector<8x128xbf16>, vector<8x8xf32> -> vector<8x8xf32>
    %cst_32 = arith.constant 0.353553385 : f32
    %106 = vector.broadcast %cst_32 : f32 to vector<8x8xf32>
    %107 = arith.mulf %105, %106 : vector<8x8xf32>
    %cst_33 = arith.constant dense<0xFF800000> : vector<8xf32>
    %108 = vector.multi_reduction <maximumf>, %107, %cst_33 [1] : vector<8x8xf32> to vector<8xf32>
    %109 = vector.shape_cast %108 : vector<8xf32> to vector<8x1xf32>
    %110 = vector.broadcast %109 : vector<8x1xf32> to vector<8x8xf32>
    %111 = arith.subf %107, %110 : vector<8x8xf32>
    %112 = math.exp %111 : vector<8x8xf32>
    %cst_34 = arith.constant dense<0.000000e+00> : vector<8xf32>
    %113 = vector.multi_reduction <add>, %112, %cst_34 [1] : vector<8x8xf32> to vector<8xf32>
    %114 = vector.shape_cast %113 : vector<8xf32> to vector<8x1xf32>
    %115 = tpu.reciprocal %114 {approx = true} : vector<8x1xf32> -> vector<8x1xf32>
    %116 = vector.broadcast %115 : vector<8x1xf32> to vector<8x8xf32>
    %117 = arith.mulf %112, %116 : vector<8x8xf32>
    %118 = arith.truncf %117 : vector<8x8xf32> to vector<8x8xbf16>
    %119 = arith.truncf %102 : vector<8x128xf32> to vector<8x128xbf16>
    %cst_35 = arith.constant dense<0.000000e+00> : vector<8x128xf32>
    %120 = tpu.matmul %118, %119, %cst_35 {dimension_numbers = #tpu.dot_dimension_numbers<[1], [0], [0], [1], [0, 0, 1, 1], [], []>} : vector<8x8xbf16>, vector<8x128xbf16>, vector<8x128xf32> -> vector<8x128xf32>
    %121 = vector.extract_strided_slice %35 {offsets = [8, 128], sizes = [8, 128], strides = [1, 1]} : vector<16x1152xf32> to vector<8x128xf32>
    %122 = vector.extract_strided_slice %35 {offsets = [8, 512], sizes = [8, 128], strides = [1, 1]} : vector<16x1152xf32> to vector<8x128xf32>
    %123 = vector.extract_strided_slice %35 {offsets = [8, 896], sizes = [8, 128], strides = [1, 1]} : vector<16x1152xf32> to vector<8x128xf32>
    %124 = arith.truncf %121 : vector<8x128xf32> to vector<8x128xbf16>
    %125 = arith.truncf %122 : vector<8x128xf32> to vector<8x128xbf16>
    %cst_36 = arith.constant dense<0.000000e+00> : vector<8x8xf32>
    %126 = tpu.matmul %124, %125, %cst_36 {dimension_numbers = #tpu.dot_dimension_numbers<[1], [1], [0], [0], [0, 0, 1, 0], [], []>} : vector<8x128xbf16>, vector<8x128xbf16>, vector<8x8xf32> -> vector<8x8xf32>
    %cst_37 = arith.constant 0.353553385 : f32
    %127 = vector.broadcast %cst_37 : f32 to vector<8x8xf32>
    %128 = arith.mulf %126, %127 : vector<8x8xf32>
    %cst_38 = arith.constant dense<0xFF800000> : vector<8xf32>
    %129 = vector.multi_reduction <maximumf>, %128, %cst_38 [1] : vector<8x8xf32> to vector<8xf32>
    %130 = vector.shape_cast %129 : vector<8xf32> to vector<8x1xf32>
    %131 = vector.broadcast %130 : vector<8x1xf32> to vector<8x8xf32>
    %132 = arith.subf %128, %131 : vector<8x8xf32>
    %133 = math.exp %132 : vector<8x8xf32>
    %cst_39 = arith.constant dense<0.000000e+00> : vector<8xf32>
    %134 = vector.multi_reduction <add>, %133, %cst_39 [1] : vector<8x8xf32> to vector<8xf32>
    %135 = vector.shape_cast %134 : vector<8xf32> to vector<8x1xf32>
    %136 = tpu.reciprocal %135 {approx = true} : vector<8x1xf32> -> vector<8x1xf32>
    %137 = vector.broadcast %136 : vector<8x1xf32> to vector<8x8xf32>
    %138 = arith.mulf %133, %137 : vector<8x8xf32>
    %139 = arith.truncf %138 : vector<8x8xf32> to vector<8x8xbf16>
    %140 = arith.truncf %123 : vector<8x128xf32> to vector<8x128xbf16>
    %cst_40 = arith.constant dense<0.000000e+00> : vector<8x128xf32>
    %141 = tpu.matmul %139, %140, %cst_40 {dimension_numbers = #tpu.dot_dimension_numbers<[1], [0], [0], [1], [0, 0, 1, 1], [], []>} : vector<8x8xbf16>, vector<8x128xbf16>, vector<8x128xf32> -> vector<8x128xf32>
    %142 = vector.extract_strided_slice %35 {offsets = [8, 256], sizes = [8, 128], strides = [1, 1]} : vector<16x1152xf32> to vector<8x128xf32>
    %143 = vector.extract_strided_slice %35 {offsets = [8, 640], sizes = [8, 128], strides = [1, 1]} : vector<16x1152xf32> to vector<8x128xf32>
    %144 = vector.extract_strided_slice %35 {offsets = [8, 1024], sizes = [8, 128], strides = [1, 1]} : vector<16x1152xf32> to vector<8x128xf32>
    %145 = arith.truncf %142 : vector<8x128xf32> to vector<8x128xbf16>
    %146 = arith.truncf %143 : vector<8x128xf32> to vector<8x128xbf16>
    %cst_41 = arith.constant dense<0.000000e+00> : vector<8x8xf32>
    %147 = tpu.matmul %145, %146, %cst_41 {dimension_numbers = #tpu.dot_dimension_numbers<[1], [1], [0], [0], [0, 0, 1, 0], [], []>} : vector<8x128xbf16>, vector<8x128xbf16>, vector<8x8xf32> -> vector<8x8xf32>
    %cst_42 = arith.constant 0.353553385 : f32
    %148 = vector.broadcast %cst_42 : f32 to vector<8x8xf32>
    %149 = arith.mulf %147, %148 : vector<8x8xf32>
    %cst_43 = arith.constant dense<0xFF800000> : vector<8xf32>
    %150 = vector.multi_reduction <maximumf>, %149, %cst_43 [1] : vector<8x8xf32> to vector<8xf32>
    %151 = vector.shape_cast %150 : vector<8xf32> to vector<8x1xf32>
    %152 = vector.broadcast %151 : vector<8x1xf32> to vector<8x8xf32>
    %153 = arith.subf %149, %152 : vector<8x8xf32>
    %154 = math.exp %153 : vector<8x8xf32>
    %cst_44 = arith.constant dense<0.000000e+00> : vector<8xf32>
    %155 = vector.multi_reduction <add>, %154, %cst_44 [1] : vector<8x8xf32> to vector<8xf32>
    %156 = vector.shape_cast %155 : vector<8xf32> to vector<8x1xf32>
    %157 = tpu.reciprocal %156 {approx = true} : vector<8x1xf32> -> vector<8x1xf32>
    %158 = vector.broadcast %157 : vector<8x1xf32> to vector<8x8xf32>
    %159 = arith.mulf %154, %158 : vector<8x8xf32>
    %160 = arith.truncf %159 : vector<8x8xf32> to vector<8x8xbf16>
    %161 = arith.truncf %144 : vector<8x128xf32> to vector<8x128xbf16>
    %cst_45 = arith.constant dense<0.000000e+00> : vector<8x128xf32>
    %162 = tpu.matmul %160, %161, %cst_45 {dimension_numbers = #tpu.dot_dimension_numbers<[1], [0], [0], [1], [0, 0, 1, 1], [], []>} : vector<8x8xbf16>, vector<8x128xbf16>, vector<8x128xf32> -> vector<8x128xf32>
    %163 = tpu.concatenate %120, %141, %162 in 1 : vector<8x128xf32>, vector<8x128xf32>, vector<8x128xf32> -> vector<8x384xf32>
    %164 = tpu.concatenate %99, %163 in 0 : vector<8x384xf32>, vector<8x384xf32> -> vector<16x384xf32>
    %165 = arith.truncf %164 : vector<16x384xf32> to vector<16x384xbf16>
    %c0_46 = arith.constant 0 : index
    %c0_47 = arith.constant 0 : index
    %c0_48 = arith.constant 0 : index
    %166 = vector.load %arg6[%c0_46, %c0_47, %c0_48] : memref<2x384x24xbf16, #tpu.memory_space<vmem>>, vector<1x384x24xbf16>
    %167 = vector.shape_cast %166 : vector<1x384x24xbf16> to vector<384x24xbf16>
    %cst_49 = arith.constant dense<0.000000e+00> : vector<16x24xf32>
    %168 = tpu.matmul %165, %167, %cst_49 {dimension_numbers = #tpu.dot_dimension_numbers<[1], [0], [0], [1], [0, 0, 1, 1], [], []>} : vector<16x384xbf16>, vector<384x24xbf16>, vector<16x24xf32> -> vector<16x24xf32>
    %c0_50 = arith.constant 0 : index
    %c0_51 = arith.constant 0 : index
    %c0_52 = arith.constant 0 : index
    %169 = vector.load %arg7[%c0_50, %c0_51, %c0_52] : memref<2x1x24xf32, #tpu.memory_space<vmem>>, vector<1x1x24xf32>
    %170 = vector.shape_cast %169 : vector<1x1x24xf32> to vector<1x24xf32>
    %171 = vector.broadcast %170 : vector<1x24xf32> to vector<16x24xf32>
    %172 = arith.addf %168, %171 : vector<16x24xf32>
    %c0_53 = arith.constant 0 : index
    %c0_54 = arith.constant 0 : index
    %c0_55 = arith.constant 0 : index
    %173 = vector.load %arg12[%c0_53, %c0_54, %c0_55] : memref<2x4x24xf32, #tpu.memory_space<vmem>>, vector<1x4x24xf32>
    %174 = vector.shape_cast %173 : vector<1x4x24xf32> to vector<4x24xf32>
    %175 = arith.addf %27, %172 : vector<16x24xf32>
    %176 = vector.extract_strided_slice %174 {offsets = [0, 0], sizes = [1, 24], strides = [1, 1]} : vector<4x24xf32> to vector<1x24xf32>
    %177 = vector.extract_strided_slice %174 {offsets = [1, 0], sizes = [1, 24], strides = [1, 1]} : vector<4x24xf32> to vector<1x24xf32>
    %cst_56 = arith.constant dense<0.000000e+00> : vector<16xf32>
    %178 = vector.multi_reduction <add>, %175, %cst_56 [1] : vector<16x24xf32> to vector<16xf32>
    %179 = vector.shape_cast %178 : vector<16xf32> to vector<16x1xf32>
    %cst_57 = arith.constant 2.400000e+01 : f32
    %180 = vector.broadcast %cst_57 : f32 to vector<16x1xf32>
    %181 = arith.divf %179, %180 : vector<16x1xf32>
    %182 = arith.mulf %175, %175 : vector<16x24xf32>
    %cst_58 = arith.constant dense<0.000000e+00> : vector<16xf32>
    %183 = vector.multi_reduction <add>, %182, %cst_58 [1] : vector<16x24xf32> to vector<16xf32>
    %184 = vector.shape_cast %183 : vector<16xf32> to vector<16x1xf32>
    %cst_59 = arith.constant 2.400000e+01 : f32
    %185 = vector.broadcast %cst_59 : f32 to vector<16x1xf32>
    %186 = arith.divf %184, %185 : vector<16x1xf32>
    %187 = arith.mulf %181, %181 : vector<16x1xf32>
    %188 = arith.subf %186, %187 : vector<16x1xf32>
    %189 = vector.broadcast %181 : vector<16x1xf32> to vector<16x24xf32>
    %190 = arith.subf %175, %189 : vector<16x24xf32>
    %cst_60 = arith.constant 9.99999996E-13 : f32
    %191 = vector.broadcast %cst_60 : f32 to vector<16x1xf32>
    %192 = arith.addf %188, %191 : vector<16x1xf32>
    %193 = math.rsqrt %192 : vector<16x1xf32>
    %194 = vector.broadcast %193 : vector<16x1xf32> to vector<16x24xf32>
    %195 = arith.mulf %190, %194 : vector<16x24xf32>
    %196 = vector.broadcast %176 : vector<1x24xf32> to vector<16x24xf32>
    %197 = arith.mulf %195, %196 : vector<16x24xf32>
    %198 = vector.broadcast %177 : vector<1x24xf32> to vector<16x24xf32>
    %199 = arith.addf %197, %198 : vector<16x24xf32>
    %200 = arith.truncf %199 : vector<16x24xf32> to vector<16x24xbf16>
    %c0_61 = arith.constant 0 : index
    %c0_62 = arith.constant 0 : index
    %c0_63 = arith.constant 0 : index
    %201 = vector.load %arg8[%c0_61, %c0_62, %c0_63] : memref<2x24x96xbf16, #tpu.memory_space<vmem>>, vector<1x24x96xbf16>
    %202 = vector.shape_cast %201 : vector<1x24x96xbf16> to vector<24x96xbf16>
    %cst_64 = arith.constant dense<0.000000e+00> : vector<16x96xf32>
    %203 = tpu.matmul %200, %202, %cst_64 {dimension_numbers = #tpu.dot_dimension_numbers<[1], [0], [0], [1], [0, 0, 1, 1], [], []>} : vector<16x24xbf16>, vector<24x96xbf16>, vector<16x96xf32> -> vector<16x96xf32>
    %c0_65 = arith.constant 0 : index
    %c0_66 = arith.constant 0 : index
    %c0_67 = arith.constant 0 : index
    %204 = vector.load %arg9[%c0_65, %c0_66, %c0_67] : memref<2x1x96xf32, #tpu.memory_space<vmem>>, vector<1x1x96xf32>
    %205 = vector.shape_cast %204 : vector<1x1x96xf32> to vector<1x96xf32>
    %206 = vector.broadcast %205 : vector<1x96xf32> to vector<16x96xf32>
    %207 = arith.addf %203, %206 : vector<16x96xf32>
    %cst_68 = arith.constant 0.000000e+00 : f32
    %208 = vector.broadcast %cst_68 : f32 to vector<16x96xf32>
    %209 = arith.maximumf %207, %208 : vector<16x96xf32>
    %210 = arith.truncf %209 : vector<16x96xf32> to vector<16x96xbf16>
    %c0_69 = arith.constant 0 : index
    %c0_70 = arith.constant 0 : index
    %c0_71 = arith.constant 0 : index
    %211 = vector.load %arg10[%c0_69, %c0_70, %c0_71] : memref<2x96x24xbf16, #tpu.memory_space<vmem>>, vector<1x96x24xbf16>
    %212 = vector.shape_cast %211 : vector<1x96x24xbf16> to vector<96x24xbf16>
    %cst_72 = arith.constant dense<0.000000e+00> : vector<16x24xf32>
    %213 = tpu.matmul %210, %212, %cst_72 {dimension_numbers = #tpu.dot_dimension_numbers<[1], [0], [0], [1], [0, 0, 1, 1], [], []>} : vector<16x96xbf16>, vector<96x24xbf16>, vector<16x24xf32> -> vector<16x24xf32>
    %c0_73 = arith.constant 0 : index
    %c0_74 = arith.constant 0 : index
    %c0_75 = arith.constant 0 : index
    %214 = vector.load %arg11[%c0_73, %c0_74, %c0_75] : memref<2x1x24xf32, #tpu.memory_space<vmem>>, vector<1x1x24xf32>
    %215 = vector.shape_cast %214 : vector<1x1x24xf32> to vector<1x24xf32>
    %216 = vector.broadcast %215 : vector<1x24xf32> to vector<16x24xf32>
    %217 = arith.addf %213, %216 : vector<16x24xf32>
    %218 = arith.addf %199, %217 : vector<16x24xf32>
    %219 = vector.extract_strided_slice %174 {offsets = [2, 0], sizes = [1, 24], strides = [1, 1]} : vector<4x24xf32> to vector<1x24xf32>
    %220 = vector.extract_strided_slice %174 {offsets = [3, 0], sizes = [1, 24], strides = [1, 1]} : vector<4x24xf32> to vector<1x24xf32>
    %cst_76 = arith.constant dense<0.000000e+00> : vector<16xf32>
    %221 = vector.multi_reduction <add>, %218, %cst_76 [1] : vector<16x24xf32> to vector<16xf32>
    %222 = vector.shape_cast %221 : vector<16xf32> to vector<16x1xf32>
    %cst_77 = arith.constant 2.400000e+01 : f32
    %223 = vector.broadcast %cst_77 : f32 to vector<16x1xf32>
    %224 = arith.divf %222, %223 : vector<16x1xf32>
    %225 = arith.mulf %218, %218 : vector<16x24xf32>
    %cst_78 = arith.constant dense<0.000000e+00> : vector<16xf32>
    %226 = vector.multi_reduction <add>, %225, %cst_78 [1] : vector<16x24xf32> to vector<16xf32>
    %227 = vector.shape_cast %226 : vector<16xf32> to vector<16x1xf32>
    %cst_79 = arith.constant 2.400000e+01 : f32
    %228 = vector.broadcast %cst_79 : f32 to vector<16x1xf32>
    %229 = arith.divf %227, %228 : vector<16x1xf32>
    %230 = arith.mulf %224, %224 : vector<16x1xf32>
    %231 = arith.subf %229, %230 : vector<16x1xf32>
    %232 = vector.broadcast %224 : vector<16x1xf32> to vector<16x24xf32>
    %233 = arith.subf %218, %232 : vector<16x24xf32>
    %cst_80 = arith.constant 9.99999996E-13 : f32
    %234 = vector.broadcast %cst_80 : f32 to vector<16x1xf32>
    %235 = arith.addf %231, %234 : vector<16x1xf32>
    %236 = math.rsqrt %235 : vector<16x1xf32>
    %237 = vector.broadcast %236 : vector<16x1xf32> to vector<16x24xf32>
    %238 = arith.mulf %233, %237 : vector<16x24xf32>
    %239 = vector.broadcast %219 : vector<1x24xf32> to vector<16x24xf32>
    %240 = arith.mulf %238, %239 : vector<16x24xf32>
    %241 = vector.broadcast %220 : vector<1x24xf32> to vector<16x24xf32>
    %242 = arith.addf %240, %241 : vector<16x24xf32>
    %243 = arith.truncf %242 : vector<16x24xf32> to vector<16x24xbf16>
    %c1 = arith.constant 1 : index
    %c0_81 = arith.constant 0 : index
    %c0_82 = arith.constant 0 : index
    %244 = vector.load %arg4[%c1, %c0_81, %c0_82] : memref<2x24x1152xbf16, #tpu.memory_space<vmem>>, vector<1x24x1152xbf16>
    %245 = vector.shape_cast %244 : vector<1x24x1152xbf16> to vector<24x1152xbf16>
    %cst_83 = arith.constant dense<0.000000e+00> : vector<16x1152xf32>
    %246 = tpu.matmul %243, %245, %cst_83 {dimension_numbers = #tpu.dot_dimension_numbers<[1], [0], [0], [1], [0, 0, 1, 1], [], []>} : vector<16x24xbf16>, vector<24x1152xbf16>, vector<16x1152xf32> -> vector<16x1152xf32>
    %c1_84 = arith.constant 1 : index
    %c0_85 = arith.constant 0 : index
    %c0_86 = arith.constant 0 : index
    %247 = vector.load %arg5[%c1_84, %c0_85, %c0_86] : memref<2x1x1152xf32, #tpu.memory_space<vmem>>, vector<1x1x1152xf32>
    %248 = vector.shape_cast %247 : vector<1x1x1152xf32> to vector<1x1152xf32>
    %249 = vector.broadcast %248 : vector<1x1152xf32> to vector<16x1152xf32>
    %250 = arith.addf %246, %249 : vector<16x1152xf32>
    %251 = vector.extract_strided_slice %250 {offsets = [0, 0], sizes = [8, 128], strides = [1, 1]} : vector<16x1152xf32> to vector<8x128xf32>
    %252 = vector.extract_strided_slice %250 {offsets = [0, 384], sizes = [8, 128], strides = [1, 1]} : vector<16x1152xf32> to vector<8x128xf32>
    %253 = vector.extract_strided_slice %250 {offsets = [0, 768], sizes = [8, 128], strides = [1, 1]} : vector<16x1152xf32> to vector<8x128xf32>
    %254 = arith.truncf %251 : vector<8x128xf32> to vector<8x128xbf16>
    %255 = arith.truncf %252 : vector<8x128xf32> to vector<8x128xbf16>
    %cst_87 = arith.constant dense<0.000000e+00> : vector<8x8xf32>
    %256 = tpu.matmul %254, %255, %cst_87 {dimension_numbers = #tpu.dot_dimension_numbers<[1], [1], [0], [0], [0, 0, 1, 0], [], []>} : vector<8x128xbf16>, vector<8x128xbf16>, vector<8x8xf32> -> vector<8x8xf32>
    %cst_88 = arith.constant 0.353553385 : f32
    %257 = vector.broadcast %cst_88 : f32 to vector<8x8xf32>
    %258 = arith.mulf %256, %257 : vector<8x8xf32>
    %cst_89 = arith.constant dense<0xFF800000> : vector<8xf32>
    %259 = vector.multi_reduction <maximumf>, %258, %cst_89 [1] : vector<8x8xf32> to vector<8xf32>
    %260 = vector.shape_cast %259 : vector<8xf32> to vector<8x1xf32>
    %261 = vector.broadcast %260 : vector<8x1xf32> to vector<8x8xf32>
    %262 = arith.subf %258, %261 : vector<8x8xf32>
    %263 = math.exp %262 : vector<8x8xf32>
    %cst_90 = arith.constant dense<0.000000e+00> : vector<8xf32>
    %264 = vector.multi_reduction <add>, %263, %cst_90 [1] : vector<8x8xf32> to vector<8xf32>
    %265 = vector.shape_cast %264 : vector<8xf32> to vector<8x1xf32>
    %266 = tpu.reciprocal %265 {approx = true} : vector<8x1xf32> -> vector<8x1xf32>
    %267 = vector.broadcast %266 : vector<8x1xf32> to vector<8x8xf32>
    %268 = arith.mulf %263, %267 : vector<8x8xf32>
    %269 = arith.truncf %268 : vector<8x8xf32> to vector<8x8xbf16>
    %270 = arith.truncf %253 : vector<8x128xf32> to vector<8x128xbf16>
    %cst_91 = arith.constant dense<0.000000e+00> : vector<8x128xf32>
    %271 = tpu.matmul %269, %270, %cst_91 {dimension_numbers = #tpu.dot_dimension_numbers<[1], [0], [0], [1], [0, 0, 1, 1], [], []>} : vector<8x8xbf16>, vector<8x128xbf16>, vector<8x128xf32> -> vector<8x128xf32>
    %272 = vector.extract_strided_slice %250 {offsets = [0, 128], sizes = [8, 128], strides = [1, 1]} : vector<16x1152xf32> to vector<8x128xf32>
    %273 = vector.extract_strided_slice %250 {offsets = [0, 512], sizes = [8, 128], strides = [1, 1]} : vector<16x1152xf32> to vector<8x128xf32>
    %274 = vector.extract_strided_slice %250 {offsets = [0, 896], sizes = [8, 128], strides = [1, 1]} : vector<16x1152xf32> to vector<8x128xf32>
    %275 = arith.truncf %272 : vector<8x128xf32> to vector<8x128xbf16>
    %276 = arith.truncf %273 : vector<8x128xf32> to vector<8x128xbf16>
    %cst_92 = arith.constant dense<0.000000e+00> : vector<8x8xf32>
    %277 = tpu.matmul %275, %276, %cst_92 {dimension_numbers = #tpu.dot_dimension_numbers<[1], [1], [0], [0], [0, 0, 1, 0], [], []>} : vector<8x128xbf16>, vector<8x128xbf16>, vector<8x8xf32> -> vector<8x8xf32>
    %cst_93 = arith.constant 0.353553385 : f32
    %278 = vector.broadcast %cst_93 : f32 to vector<8x8xf32>
    %279 = arith.mulf %277, %278 : vector<8x8xf32>
    %cst_94 = arith.constant dense<0xFF800000> : vector<8xf32>
    %280 = vector.multi_reduction <maximumf>, %279, %cst_94 [1] : vector<8x8xf32> to vector<8xf32>
    %281 = vector.shape_cast %280 : vector<8xf32> to vector<8x1xf32>
    %282 = vector.broadcast %281 : vector<8x1xf32> to vector<8x8xf32>
    %283 = arith.subf %279, %282 : vector<8x8xf32>
    %284 = math.exp %283 : vector<8x8xf32>
    %cst_95 = arith.constant dense<0.000000e+00> : vector<8xf32>
    %285 = vector.multi_reduction <add>, %284, %cst_95 [1] : vector<8x8xf32> to vector<8xf32>
    %286 = vector.shape_cast %285 : vector<8xf32> to vector<8x1xf32>
    %287 = tpu.reciprocal %286 {approx = true} : vector<8x1xf32> -> vector<8x1xf32>
    %288 = vector.broadcast %287 : vector<8x1xf32> to vector<8x8xf32>
    %289 = arith.mulf %284, %288 : vector<8x8xf32>
    %290 = arith.truncf %289 : vector<8x8xf32> to vector<8x8xbf16>
    %291 = arith.truncf %274 : vector<8x128xf32> to vector<8x128xbf16>
    %cst_96 = arith.constant dense<0.000000e+00> : vector<8x128xf32>
    %292 = tpu.matmul %290, %291, %cst_96 {dimension_numbers = #tpu.dot_dimension_numbers<[1], [0], [0], [1], [0, 0, 1, 1], [], []>} : vector<8x8xbf16>, vector<8x128xbf16>, vector<8x128xf32> -> vector<8x128xf32>
    %293 = vector.extract_strided_slice %250 {offsets = [0, 256], sizes = [8, 128], strides = [1, 1]} : vector<16x1152xf32> to vector<8x128xf32>
    %294 = vector.extract_strided_slice %250 {offsets = [0, 640], sizes = [8, 128], strides = [1, 1]} : vector<16x1152xf32> to vector<8x128xf32>
    %295 = vector.extract_strided_slice %250 {offsets = [0, 1024], sizes = [8, 128], strides = [1, 1]} : vector<16x1152xf32> to vector<8x128xf32>
    %296 = arith.truncf %293 : vector<8x128xf32> to vector<8x128xbf16>
    %297 = arith.truncf %294 : vector<8x128xf32> to vector<8x128xbf16>
    %cst_97 = arith.constant dense<0.000000e+00> : vector<8x8xf32>
    %298 = tpu.matmul %296, %297, %cst_97 {dimension_numbers = #tpu.dot_dimension_numbers<[1], [1], [0], [0], [0, 0, 1, 0], [], []>} : vector<8x128xbf16>, vector<8x128xbf16>, vector<8x8xf32> -> vector<8x8xf32>
    %cst_98 = arith.constant 0.353553385 : f32
    %299 = vector.broadcast %cst_98 : f32 to vector<8x8xf32>
    %300 = arith.mulf %298, %299 : vector<8x8xf32>
    %cst_99 = arith.constant dense<0xFF800000> : vector<8xf32>
    %301 = vector.multi_reduction <maximumf>, %300, %cst_99 [1] : vector<8x8xf32> to vector<8xf32>
    %302 = vector.shape_cast %301 : vector<8xf32> to vector<8x1xf32>
    %303 = vector.broadcast %302 : vector<8x1xf32> to vector<8x8xf32>
    %304 = arith.subf %300, %303 : vector<8x8xf32>
    %305 = math.exp %304 : vector<8x8xf32>
    %cst_100 = arith.constant dense<0.000000e+00> : vector<8xf32>
    %306 = vector.multi_reduction <add>, %305, %cst_100 [1] : vector<8x8xf32> to vector<8xf32>
    %307 = vector.shape_cast %306 : vector<8xf32> to vector<8x1xf32>
    %308 = tpu.reciprocal %307 {approx = true} : vector<8x1xf32> -> vector<8x1xf32>
    %309 = vector.broadcast %308 : vector<8x1xf32> to vector<8x8xf32>
    %310 = arith.mulf %305, %309 : vector<8x8xf32>
    %311 = arith.truncf %310 : vector<8x8xf32> to vector<8x8xbf16>
    %312 = arith.truncf %295 : vector<8x128xf32> to vector<8x128xbf16>
    %cst_101 = arith.constant dense<0.000000e+00> : vector<8x128xf32>
    %313 = tpu.matmul %311, %312, %cst_101 {dimension_numbers = #tpu.dot_dimension_numbers<[1], [0], [0], [1], [0, 0, 1, 1], [], []>} : vector<8x8xbf16>, vector<8x128xbf16>, vector<8x128xf32> -> vector<8x128xf32>
    %314 = tpu.concatenate %271, %292, %313 in 1 : vector<8x128xf32>, vector<8x128xf32>, vector<8x128xf32> -> vector<8x384xf32>
    %315 = vector.extract_strided_slice %250 {offsets = [8, 0], sizes = [8, 128], strides = [1, 1]} : vector<16x1152xf32> to vector<8x128xf32>
    %316 = vector.extract_strided_slice %250 {offsets = [8, 384], sizes = [8, 128], strides = [1, 1]} : vector<16x1152xf32> to vector<8x128xf32>
    %317 = vector.extract_strided_slice %250 {offsets = [8, 768], sizes = [8, 128], strides = [1, 1]} : vector<16x1152xf32> to vector<8x128xf32>
    %318 = arith.truncf %315 : vector<8x128xf32> to vector<8x128xbf16>
    %319 = arith.truncf %316 : vector<8x128xf32> to vector<8x128xbf16>
    %cst_102 = arith.constant dense<0.000000e+00> : vector<8x8xf32>
    %320 = tpu.matmul %318, %319, %cst_102 {dimension_numbers = #tpu.dot_dimension_numbers<[1], [1], [0], [0], [0, 0, 1, 0], [], []>} : vector<8x128xbf16>, vector<8x128xbf16>, vector<8x8xf32> -> vector<8x8xf32>
    %cst_103 = arith.constant 0.353553385 : f32
    %321 = vector.broadcast %cst_103 : f32 to vector<8x8xf32>
    %322 = arith.mulf %320, %321 : vector<8x8xf32>
    %cst_104 = arith.constant dense<0xFF800000> : vector<8xf32>
    %323 = vector.multi_reduction <maximumf>, %322, %cst_104 [1] : vector<8x8xf32> to vector<8xf32>
    %324 = vector.shape_cast %323 : vector<8xf32> to vector<8x1xf32>
    %325 = vector.broadcast %324 : vector<8x1xf32> to vector<8x8xf32>
    %326 = arith.subf %322, %325 : vector<8x8xf32>
    %327 = math.exp %326 : vector<8x8xf32>
    %cst_105 = arith.constant dense<0.000000e+00> : vector<8xf32>
    %328 = vector.multi_reduction <add>, %327, %cst_105 [1] : vector<8x8xf32> to vector<8xf32>
    %329 = vector.shape_cast %328 : vector<8xf32> to vector<8x1xf32>
    %330 = tpu.reciprocal %329 {approx = true} : vector<8x1xf32> -> vector<8x1xf32>
    %331 = vector.broadcast %330 : vector<8x1xf32> to vector<8x8xf32>
    %332 = arith.mulf %327, %331 : vector<8x8xf32>
    %333 = arith.truncf %332 : vector<8x8xf32> to vector<8x8xbf16>
    %334 = arith.truncf %317 : vector<8x128xf32> to vector<8x128xbf16>
    %cst_106 = arith.constant dense<0.000000e+00> : vector<8x128xf32>
    %335 = tpu.matmul %333, %334, %cst_106 {dimension_numbers = #tpu.dot_dimension_numbers<[1], [0], [0], [1], [0, 0, 1, 1], [], []>} : vector<8x8xbf16>, vector<8x128xbf16>, vector<8x128xf32> -> vector<8x128xf32>
    %336 = vector.extract_strided_slice %250 {offsets = [8, 128], sizes = [8, 128], strides = [1, 1]} : vector<16x1152xf32> to vector<8x128xf32>
    %337 = vector.extract_strided_slice %250 {offsets = [8, 512], sizes = [8, 128], strides = [1, 1]} : vector<16x1152xf32> to vector<8x128xf32>
    %338 = vector.extract_strided_slice %250 {offsets = [8, 896], sizes = [8, 128], strides = [1, 1]} : vector<16x1152xf32> to vector<8x128xf32>
    %339 = arith.truncf %336 : vector<8x128xf32> to vector<8x128xbf16>
    %340 = arith.truncf %337 : vector<8x128xf32> to vector<8x128xbf16>
    %cst_107 = arith.constant dense<0.000000e+00> : vector<8x8xf32>
    %341 = tpu.matmul %339, %340, %cst_107 {dimension_numbers = #tpu.dot_dimension_numbers<[1], [1], [0], [0], [0, 0, 1, 0], [], []>} : vector<8x128xbf16>, vector<8x128xbf16>, vector<8x8xf32> -> vector<8x8xf32>
    %cst_108 = arith.constant 0.353553385 : f32
    %342 = vector.broadcast %cst_108 : f32 to vector<8x8xf32>
    %343 = arith.mulf %341, %342 : vector<8x8xf32>
    %cst_109 = arith.constant dense<0xFF800000> : vector<8xf32>
    %344 = vector.multi_reduction <maximumf>, %343, %cst_109 [1] : vector<8x8xf32> to vector<8xf32>
    %345 = vector.shape_cast %344 : vector<8xf32> to vector<8x1xf32>
    %346 = vector.broadcast %345 : vector<8x1xf32> to vector<8x8xf32>
    %347 = arith.subf %343, %346 : vector<8x8xf32>
    %348 = math.exp %347 : vector<8x8xf32>
    %cst_110 = arith.constant dense<0.000000e+00> : vector<8xf32>
    %349 = vector.multi_reduction <add>, %348, %cst_110 [1] : vector<8x8xf32> to vector<8xf32>
    %350 = vector.shape_cast %349 : vector<8xf32> to vector<8x1xf32>
    %351 = tpu.reciprocal %350 {approx = true} : vector<8x1xf32> -> vector<8x1xf32>
    %352 = vector.broadcast %351 : vector<8x1xf32> to vector<8x8xf32>
    %353 = arith.mulf %348, %352 : vector<8x8xf32>
    %354 = arith.truncf %353 : vector<8x8xf32> to vector<8x8xbf16>
    %355 = arith.truncf %338 : vector<8x128xf32> to vector<8x128xbf16>
    %cst_111 = arith.constant dense<0.000000e+00> : vector<8x128xf32>
    %356 = tpu.matmul %354, %355, %cst_111 {dimension_numbers = #tpu.dot_dimension_numbers<[1], [0], [0], [1], [0, 0, 1, 1], [], []>} : vector<8x8xbf16>, vector<8x128xbf16>, vector<8x128xf32> -> vector<8x128xf32>
    %357 = vector.extract_strided_slice %250 {offsets = [8, 256], sizes = [8, 128], strides = [1, 1]} : vector<16x1152xf32> to vector<8x128xf32>
    %358 = vector.extract_strided_slice %250 {offsets = [8, 640], sizes = [8, 128], strides = [1, 1]} : vector<16x1152xf32> to vector<8x128xf32>
    %359 = vector.extract_strided_slice %250 {offsets = [8, 1024], sizes = [8, 128], strides = [1, 1]} : vector<16x1152xf32> to vector<8x128xf32>
    %360 = arith.truncf %357 : vector<8x128xf32> to vector<8x128xbf16>
    %361 = arith.truncf %358 : vector<8x128xf32> to vector<8x128xbf16>
    %cst_112 = arith.constant dense<0.000000e+00> : vector<8x8xf32>
    %362 = tpu.matmul %360, %361, %cst_112 {dimension_numbers = #tpu.dot_dimension_numbers<[1], [1], [0], [0], [0, 0, 1, 0], [], []>} : vector<8x128xbf16>, vector<8x128xbf16>, vector<8x8xf32> -> vector<8x8xf32>
    %cst_113 = arith.constant 0.353553385 : f32
    %363 = vector.broadcast %cst_113 : f32 to vector<8x8xf32>
    %364 = arith.mulf %362, %363 : vector<8x8xf32>
    %cst_114 = arith.constant dense<0xFF800000> : vector<8xf32>
    %365 = vector.multi_reduction <maximumf>, %364, %cst_114 [1] : vector<8x8xf32> to vector<8xf32>
    %366 = vector.shape_cast %365 : vector<8xf32> to vector<8x1xf32>
    %367 = vector.broadcast %366 : vector<8x1xf32> to vector<8x8xf32>
    %368 = arith.subf %364, %367 : vector<8x8xf32>
    %369 = math.exp %368 : vector<8x8xf32>
    %cst_115 = arith.constant dense<0.000000e+00> : vector<8xf32>
    %370 = vector.multi_reduction <add>, %369, %cst_115 [1] : vector<8x8xf32> to vector<8xf32>
    %371 = vector.shape_cast %370 : vector<8xf32> to vector<8x1xf32>
    %372 = tpu.reciprocal %371 {approx = true} : vector<8x1xf32> -> vector<8x1xf32>
    %373 = vector.broadcast %372 : vector<8x1xf32> to vector<8x8xf32>
    %374 = arith.mulf %369, %373 : vector<8x8xf32>
    %375 = arith.truncf %374 : vector<8x8xf32> to vector<8x8xbf16>
    %376 = arith.truncf %359 : vector<8x128xf32> to vector<8x128xbf16>
    %cst_116 = arith.constant dense<0.000000e+00> : vector<8x128xf32>
    %377 = tpu.matmul %375, %376, %cst_116 {dimension_numbers = #tpu.dot_dimension_numbers<[1], [0], [0], [1], [0, 0, 1, 1], [], []>} : vector<8x8xbf16>, vector<8x128xbf16>, vector<8x128xf32> -> vector<8x128xf32>
    %378 = tpu.concatenate %335, %356, %377 in 1 : vector<8x128xf32>, vector<8x128xf32>, vector<8x128xf32> -> vector<8x384xf32>
    %379 = tpu.concatenate %314, %378 in 0 : vector<8x384xf32>, vector<8x384xf32> -> vector<16x384xf32>
    %380 = arith.truncf %379 : vector<16x384xf32> to vector<16x384xbf16>
    %c1_117 = arith.constant 1 : index
    %c0_118 = arith.constant 0 : index
    %c0_119 = arith.constant 0 : index
    %381 = vector.load %arg6[%c1_117, %c0_118, %c0_119] : memref<2x384x24xbf16, #tpu.memory_space<vmem>>, vector<1x384x24xbf16>
    %382 = vector.shape_cast %381 : vector<1x384x24xbf16> to vector<384x24xbf16>
    %cst_120 = arith.constant dense<0.000000e+00> : vector<16x24xf32>
    %383 = tpu.matmul %380, %382, %cst_120 {dimension_numbers = #tpu.dot_dimension_numbers<[1], [0], [0], [1], [0, 0, 1, 1], [], []>} : vector<16x384xbf16>, vector<384x24xbf16>, vector<16x24xf32> -> vector<16x24xf32>
    %c1_121 = arith.constant 1 : index
    %c0_122 = arith.constant 0 : index
    %c0_123 = arith.constant 0 : index
    %384 = vector.load %arg7[%c1_121, %c0_122, %c0_123] : memref<2x1x24xf32, #tpu.memory_space<vmem>>, vector<1x1x24xf32>
    %385 = vector.shape_cast %384 : vector<1x1x24xf32> to vector<1x24xf32>
    %386 = vector.broadcast %385 : vector<1x24xf32> to vector<16x24xf32>
    %387 = arith.addf %383, %386 : vector<16x24xf32>
    %c1_124 = arith.constant 1 : index
    %c0_125 = arith.constant 0 : index
    %c0_126 = arith.constant 0 : index
    %388 = vector.load %arg12[%c1_124, %c0_125, %c0_126] : memref<2x4x24xf32, #tpu.memory_space<vmem>>, vector<1x4x24xf32>
    %389 = vector.shape_cast %388 : vector<1x4x24xf32> to vector<4x24xf32>
    %390 = arith.addf %242, %387 : vector<16x24xf32>
    %391 = vector.extract_strided_slice %389 {offsets = [0, 0], sizes = [1, 24], strides = [1, 1]} : vector<4x24xf32> to vector<1x24xf32>
    %392 = vector.extract_strided_slice %389 {offsets = [1, 0], sizes = [1, 24], strides = [1, 1]} : vector<4x24xf32> to vector<1x24xf32>
    %cst_127 = arith.constant dense<0.000000e+00> : vector<16xf32>
    %393 = vector.multi_reduction <add>, %390, %cst_127 [1] : vector<16x24xf32> to vector<16xf32>
    %394 = vector.shape_cast %393 : vector<16xf32> to vector<16x1xf32>
    %cst_128 = arith.constant 2.400000e+01 : f32
    %395 = vector.broadcast %cst_128 : f32 to vector<16x1xf32>
    %396 = arith.divf %394, %395 : vector<16x1xf32>
    %397 = arith.mulf %390, %390 : vector<16x24xf32>
    %cst_129 = arith.constant dense<0.000000e+00> : vector<16xf32>
    %398 = vector.multi_reduction <add>, %397, %cst_129 [1] : vector<16x24xf32> to vector<16xf32>
    %399 = vector.shape_cast %398 : vector<16xf32> to vector<16x1xf32>
    %cst_130 = arith.constant 2.400000e+01 : f32
    %400 = vector.broadcast %cst_130 : f32 to vector<16x1xf32>
    %401 = arith.divf %399, %400 : vector<16x1xf32>
    %402 = arith.mulf %396, %396 : vector<16x1xf32>
    %403 = arith.subf %401, %402 : vector<16x1xf32>
    %404 = vector.broadcast %396 : vector<16x1xf32> to vector<16x24xf32>
    %405 = arith.subf %390, %404 : vector<16x24xf32>
    %cst_131 = arith.constant 9.99999996E-13 : f32
    %406 = vector.broadcast %cst_131 : f32 to vector<16x1xf32>
    %407 = arith.addf %403, %406 : vector<16x1xf32>
    %408 = math.rsqrt %407 : vector<16x1xf32>
    %409 = vector.broadcast %408 : vector<16x1xf32> to vector<16x24xf32>
    %410 = arith.mulf %405, %409 : vector<16x24xf32>
    %411 = vector.broadcast %391 : vector<1x24xf32> to vector<16x24xf32>
    %412 = arith.mulf %410, %411 : vector<16x24xf32>
    %413 = vector.broadcast %392 : vector<1x24xf32> to vector<16x24xf32>
    %414 = arith.addf %412, %413 : vector<16x24xf32>
    %415 = arith.truncf %414 : vector<16x24xf32> to vector<16x24xbf16>
    %c1_132 = arith.constant 1 : index
    %c0_133 = arith.constant 0 : index
    %c0_134 = arith.constant 0 : index
    %416 = vector.load %arg8[%c1_132, %c0_133, %c0_134] : memref<2x24x96xbf16, #tpu.memory_space<vmem>>, vector<1x24x96xbf16>
    %417 = vector.shape_cast %416 : vector<1x24x96xbf16> to vector<24x96xbf16>
    %cst_135 = arith.constant dense<0.000000e+00> : vector<16x96xf32>
    %418 = tpu.matmul %415, %417, %cst_135 {dimension_numbers = #tpu.dot_dimension_numbers<[1], [0], [0], [1], [0, 0, 1, 1], [], []>} : vector<16x24xbf16>, vector<24x96xbf16>, vector<16x96xf32> -> vector<16x96xf32>
    %c1_136 = arith.constant 1 : index
    %c0_137 = arith.constant 0 : index
    %c0_138 = arith.constant 0 : index
    %419 = vector.load %arg9[%c1_136, %c0_137, %c0_138] : memref<2x1x96xf32, #tpu.memory_space<vmem>>, vector<1x1x96xf32>
    %420 = vector.shape_cast %419 : vector<1x1x96xf32> to vector<1x96xf32>
    %421 = vector.broadcast %420 : vector<1x96xf32> to vector<16x96xf32>
    %422 = arith.addf %418, %421 : vector<16x96xf32>
    %cst_139 = arith.constant 0.000000e+00 : f32
    %423 = vector.broadcast %cst_139 : f32 to vector<16x96xf32>
    %424 = arith.maximumf %422, %423 : vector<16x96xf32>
    %425 = arith.truncf %424 : vector<16x96xf32> to vector<16x96xbf16>
    %c1_140 = arith.constant 1 : index
    %c0_141 = arith.constant 0 : index
    %c0_142 = arith.constant 0 : index
    %426 = vector.load %arg10[%c1_140, %c0_141, %c0_142] : memref<2x96x24xbf16, #tpu.memory_space<vmem>>, vector<1x96x24xbf16>
    %427 = vector.shape_cast %426 : vector<1x96x24xbf16> to vector<96x24xbf16>
    %cst_143 = arith.constant dense<0.000000e+00> : vector<16x24xf32>
    %428 = tpu.matmul %425, %427, %cst_143 {dimension_numbers = #tpu.dot_dimension_numbers<[1], [0], [0], [1], [0, 0, 1, 1], [], []>} : vector<16x96xbf16>, vector<96x24xbf16>, vector<16x24xf32> -> vector<16x24xf32>
    %c1_144 = arith.constant 1 : index
    %c0_145 = arith.constant 0 : index
    %c0_146 = arith.constant 0 : index
    %429 = vector.load %arg11[%c1_144, %c0_145, %c0_146] : memref<2x1x24xf32, #tpu.memory_space<vmem>>, vector<1x1x24xf32>
    %430 = vector.shape_cast %429 : vector<1x1x24xf32> to vector<1x24xf32>
    %431 = vector.broadcast %430 : vector<1x24xf32> to vector<16x24xf32>
    %432 = arith.addf %428, %431 : vector<16x24xf32>
    %433 = arith.addf %414, %432 : vector<16x24xf32>
    %434 = vector.extract_strided_slice %389 {offsets = [2, 0], sizes = [1, 24], strides = [1, 1]} : vector<4x24xf32> to vector<1x24xf32>
    %435 = vector.extract_strided_slice %389 {offsets = [3, 0], sizes = [1, 24], strides = [1, 1]} : vector<4x24xf32> to vector<1x24xf32>
    %cst_147 = arith.constant dense<0.000000e+00> : vector<16xf32>
    %436 = vector.multi_reduction <add>, %433, %cst_147 [1] : vector<16x24xf32> to vector<16xf32>
    %437 = vector.shape_cast %436 : vector<16xf32> to vector<16x1xf32>
    %cst_148 = arith.constant 2.400000e+01 : f32
    %438 = vector.broadcast %cst_148 : f32 to vector<16x1xf32>
    %439 = arith.divf %437, %438 : vector<16x1xf32>
    %440 = arith.mulf %433, %433 : vector<16x24xf32>
    %cst_149 = arith.constant dense<0.000000e+00> : vector<16xf32>
    %441 = vector.multi_reduction <add>, %440, %cst_149 [1] : vector<16x24xf32> to vector<16xf32>
    %442 = vector.shape_cast %441 : vector<16xf32> to vector<16x1xf32>
    %cst_150 = arith.constant 2.400000e+01 : f32
    %443 = vector.broadcast %cst_150 : f32 to vector<16x1xf32>
    %444 = arith.divf %442, %443 : vector<16x1xf32>
    %445 = arith.mulf %439, %439 : vector<16x1xf32>
    %446 = arith.subf %444, %445 : vector<16x1xf32>
    %447 = vector.broadcast %439 : vector<16x1xf32> to vector<16x24xf32>
    %448 = arith.subf %433, %447 : vector<16x24xf32>
    %cst_151 = arith.constant 9.99999996E-13 : f32
    %449 = vector.broadcast %cst_151 : f32 to vector<16x1xf32>
    %450 = arith.addf %446, %449 : vector<16x1xf32>
    %451 = math.rsqrt %450 : vector<16x1xf32>
    %452 = vector.broadcast %451 : vector<16x1xf32> to vector<16x24xf32>
    %453 = arith.mulf %448, %452 : vector<16x24xf32>
    %454 = vector.broadcast %434 : vector<1x24xf32> to vector<16x24xf32>
    %455 = arith.mulf %453, %454 : vector<16x24xf32>
    %456 = vector.broadcast %435 : vector<1x24xf32> to vector<16x24xf32>
    %457 = arith.addf %455, %456 : vector<16x24xf32>
    %c0_152 = arith.constant 0 : index
    %c0_153 = arith.constant 0 : index
    %458 = vector.load %arg13[%c0_152, %c0_153] : memref<8x128xf32, #tpu.memory_space<vmem>>, vector<8x128xf32>
    %c0_154 = arith.constant 0 : index
    %c0_155 = arith.constant 0 : index
    %459 = vector.load %arg14[%c0_154, %c0_155] : memref<1x128xf32, #tpu.memory_space<vmem>>, vector<1x128xf32>
    %460 = vector.extract_strided_slice %457 {offsets = [0, 0], sizes = [8, 24], strides = [1, 1]} : vector<16x24xf32> to vector<8x24xf32>
    %cst_156 = arith.constant dense<0xFF800000> : vector<8xf32>
    %461 = vector.multi_reduction <maximumf>, %460, %cst_156 [1] : vector<8x24xf32> to vector<8xf32>
    %462 = vector.shape_cast %461 : vector<8xf32> to vector<8x1xf32>
    %463 = vector.broadcast %462 : vector<8x1xf32> to vector<8x128xf32>
    %464 = arith.mulf %463, %458 : vector<8x128xf32>
    %cst_157 = arith.constant dense<0.000000e+00> : vector<128xf32>
    %465 = vector.multi_reduction <add>, %464, %cst_157 [0] : vector<8x128xf32> to vector<128xf32>
    %466 = vector.shape_cast %465 : vector<128xf32> to vector<1x128xf32>
    %467 = arith.addf %466, %459 : vector<1x128xf32>
    %cst_158 = arith.constant 0.000000e+00 : f32
    %468 = vector.broadcast %cst_158 : f32 to vector<1x128xf32>
    %469 = arith.maximumf %467, %468 : vector<1x128xf32>
    %470 = arith.truncf %469 : vector<1x128xf32> to vector<1x128xbf16>
    %c0_159 = arith.constant 0 : index
    %c0_160 = arith.constant 0 : index
    %471 = vector.load %arg15[%c0_159, %c0_160] : memref<128x64xbf16, #tpu.memory_space<vmem>>, vector<128x64xbf16>
    %cst_161 = arith.constant dense<0.000000e+00> : vector<1x64xf32>
    %472 = tpu.matmul %470, %471, %cst_161 {dimension_numbers = #tpu.dot_dimension_numbers<[1], [0], [0], [1], [0, 0, 1, 1], [], []>} : vector<1x128xbf16>, vector<128x64xbf16>, vector<1x64xf32> -> vector<1x64xf32>
    %c0_162 = arith.constant 0 : index
    %c0_163 = arith.constant 0 : index
    %473 = vector.load %arg16[%c0_162, %c0_163] : memref<1x64xf32, #tpu.memory_space<vmem>>, vector<1x64xf32>
    %474 = arith.addf %472, %473 : vector<1x64xf32>
    %cst_164 = arith.constant 0.000000e+00 : f32
    %475 = vector.broadcast %cst_164 : f32 to vector<1x64xf32>
    %476 = arith.maximumf %474, %475 : vector<1x64xf32>
    %c0_165 = arith.constant 0 : index
    %c0_166 = arith.constant 0 : index
    %477 = vector.load %arg17[%c0_165, %c0_166] : memref<64x1xf32, #tpu.memory_space<vmem>>, vector<64x1xf32>
    %cst_167 = arith.constant dense<0.000000e+00> : vector<1x1xf32>
    %478 = tpu.matmul %476, %477, %cst_167 {dimension_numbers = #tpu.dot_dimension_numbers<[1], [0], [0], [1], [0, 0, 1, 1], [], []>} : vector<1x64xf32>, vector<64x1xf32>, vector<1x1xf32> -> vector<1x1xf32>
    %c0_168 = arith.constant 0 : index
    %c0_169 = arith.constant 0 : index
    %479 = vector.load %arg18[%c0_168, %c0_169] : memref<1x1xf32, #tpu.memory_space<vmem>>, vector<1x1xf32>
    %480 = arith.addf %478, %479 : vector<1x1xf32>
    %c0_170 = arith.constant 0 : index
    %c0_171 = arith.constant 0 : index
    %c0_172 = arith.constant 0 : index
    %481 = vector.load %arg19[%c0_170, %c0_171, %c0_172] : memref<2x1x1xf32, #tpu.memory_space<vmem>>, vector<1x1x1xf32>
    %482 = vector.shape_cast %481 : vector<1x1x1xf32> to vector<1x1xf32>
    %483 = vector.shape_cast %480 : vector<1x1xf32> to vector<1x1x1xf32>
    tpu.vector_store %arg19[%c0_170, %c0_171, %c0_172], %483 {strides = array<i32>} : memref<2x1x1xf32, #tpu.memory_space<vmem>>, vector<1x1x1xf32>,
    %484 = vector.extract_strided_slice %457 {offsets = [8, 0], sizes = [8, 24], strides = [1, 1]} : vector<16x24xf32> to vector<8x24xf32>
    %cst_173 = arith.constant dense<0xFF800000> : vector<8xf32>
    %485 = vector.multi_reduction <maximumf>, %484, %cst_173 [1] : vector<8x24xf32> to vector<8xf32>
    %486 = vector.shape_cast %485 : vector<8xf32> to vector<8x1xf32>
    %487 = vector.broadcast %486 : vector<8x1xf32> to vector<8x128xf32>
    %488 = arith.mulf %487, %458 : vector<8x128xf32>
    %cst_174 = arith.constant dense<0.000000e+00> : vector<128xf32>
    %489 = vector.multi_reduction <add>, %488, %cst_174 [0] : vector<8x128xf32> to vector<128xf32>
    %490 = vector.shape_cast %489 : vector<128xf32> to vector<1x128xf32>
    %491 = arith.addf %490, %459 : vector<1x128xf32>
    %cst_175 = arith.constant 0.000000e+00 : f32
    %492 = vector.broadcast %cst_175 : f32 to vector<1x128xf32>
    %493 = arith.maximumf %491, %492 : vector<1x128xf32>
    %494 = arith.truncf %493 : vector<1x128xf32> to vector<1x128xbf16>
    %c0_176 = arith.constant 0 : index
    %c0_177 = arith.constant 0 : index
    %495 = vector.load %arg15[%c0_176, %c0_177] : memref<128x64xbf16, #tpu.memory_space<vmem>>, vector<128x64xbf16>
    %cst_178 = arith.constant dense<0.000000e+00> : vector<1x64xf32>
    %496 = tpu.matmul %494, %495, %cst_178 {dimension_numbers = #tpu.dot_dimension_numbers<[1], [0], [0], [1], [0, 0, 1, 1], [], []>} : vector<1x128xbf16>, vector<128x64xbf16>, vector<1x64xf32> -> vector<1x64xf32>
    %c0_179 = arith.constant 0 : index
    %c0_180 = arith.constant 0 : index
    %497 = vector.load %arg16[%c0_179, %c0_180] : memref<1x64xf32, #tpu.memory_space<vmem>>, vector<1x64xf32>
    %498 = arith.addf %496, %497 : vector<1x64xf32>
    %cst_181 = arith.constant 0.000000e+00 : f32
    %499 = vector.broadcast %cst_181 : f32 to vector<1x64xf32>
    %500 = arith.maximumf %498, %499 : vector<1x64xf32>
    %c0_182 = arith.constant 0 : index
    %c0_183 = arith.constant 0 : index
    %501 = vector.load %arg17[%c0_182, %c0_183] : memref<64x1xf32, #tpu.memory_space<vmem>>, vector<64x1xf32>
    %cst_184 = arith.constant dense<0.000000e+00> : vector<1x1xf32>
    %502 = tpu.matmul %500, %501, %cst_184 {dimension_numbers = #tpu.dot_dimension_numbers<[1], [0], [0], [1], [0, 0, 1, 1], [], []>} : vector<1x64xf32>, vector<64x1xf32>, vector<1x1xf32> -> vector<1x1xf32>
    %c0_185 = arith.constant 0 : index
    %c0_186 = arith.constant 0 : index
    %503 = vector.load %arg18[%c0_185, %c0_186] : memref<1x1xf32, #tpu.memory_space<vmem>>, vector<1x1xf32>
    %504 = arith.addf %502, %503 : vector<1x1xf32>
    %c1_187 = arith.constant 1 : index
    %c0_188 = arith.constant 0 : index
    %c0_189 = arith.constant 0 : index
    %505 = vector.load %arg19[%c1_187, %c0_188, %c0_189] : memref<2x1x1xf32, #tpu.memory_space<vmem>>, vector<1x1x1xf32>
    %506 = vector.shape_cast %505 : vector<1x1x1xf32> to vector<1x1xf32>
    %507 = vector.shape_cast %504 : vector<1x1xf32> to vector<1x1x1xf32>
    tpu.vector_store %arg19[%c1_187, %c0_188, %c0_189], %507 {strides = array<i32>} : memref<2x1x1xf32, #tpu.memory_space<vmem>>, vector<1x1x1xf32>,
    return
  }
  func.func @transform_0(%arg0: i32) -> (i32, i32) {
    %c0_i32 = arith.constant 0 : i32
    %c0_i32_0 = arith.constant 0 : i32
    %c0_i32_1 = arith.constant 0 : i32
    return %c0_i32, %c0_i32_0 : i32, i32
  }
  func.func @transform_1(%arg0: i32) -> (i32, i32) {
    %c0_i32 = arith.constant 0 : i32
    %c0_i32_0 = arith.constant 0 : i32
    %c0_i32_1 = arith.constant 0 : i32
    return %c0_i32, %c0_i32_0 : i32, i32
  }
  func.func @transform_2(%arg0: i32) -> (i32, i32) {
    %c0_i32 = arith.constant 0 : i32
    %c0_i32_0 = arith.constant 0 : i32
    %c0_i32_1 = arith.constant 0 : i32
    return %c0_i32, %c0_i32_0 : i32, i32
  }
  func.func @transform_3(%arg0: i32) -> (i32, i32, i32) {
    %c0_i32 = arith.constant 0 : i32
    %c0_i32_0 = arith.constant 0 : i32
    %c0_i32_1 = arith.constant 0 : i32
    %c0_i32_2 = arith.constant 0 : i32
    return %c0_i32, %c0_i32_0, %c0_i32_1 : i32, i32, i32
  }
  func.func @transform_4(%arg0: i32) -> (i32, i32, i32) {
    %c0_i32 = arith.constant 0 : i32
    %c0_i32_0 = arith.constant 0 : i32
    %c0_i32_1 = arith.constant 0 : i32
    %c0_i32_2 = arith.constant 0 : i32
    return %c0_i32, %c0_i32_0, %c0_i32_1 : i32, i32, i32
  }
  func.func @transform_5(%arg0: i32) -> (i32, i32, i32) {
    %c0_i32 = arith.constant 0 : i32
    %c0_i32_0 = arith.constant 0 : i32
    %c0_i32_1 = arith.constant 0 : i32
    %c0_i32_2 = arith.constant 0 : i32
    return %c0_i32, %c0_i32_0, %c0_i32_1 : i32, i32, i32
  }
  func.func @transform_6(%arg0: i32) -> (i32, i32, i32) {
    %c0_i32 = arith.constant 0 : i32
    %c0_i32_0 = arith.constant 0 : i32
    %c0_i32_1 = arith.constant 0 : i32
    %c0_i32_2 = arith.constant 0 : i32
    return %c0_i32, %c0_i32_0, %c0_i32_1 : i32, i32, i32
  }
  func.func @transform_7(%arg0: i32) -> (i32, i32, i32) {
    %c0_i32 = arith.constant 0 : i32
    %c0_i32_0 = arith.constant 0 : i32
    %c0_i32_1 = arith.constant 0 : i32
    %c0_i32_2 = arith.constant 0 : i32
    return %c0_i32, %c0_i32_0, %c0_i32_1 : i32, i32, i32
  }
  func.func @transform_8(%arg0: i32) -> (i32, i32, i32) {
    %c0_i32 = arith.constant 0 : i32
    %c0_i32_0 = arith.constant 0 : i32
    %c0_i32_1 = arith.constant 0 : i32
    %c0_i32_2 = arith.constant 0 : i32
    return %c0_i32, %c0_i32_0, %c0_i32_1 : i32, i32, i32
  }
  func.func @transform_9(%arg0: i32) -> (i32, i32, i32) {
    %c0_i32 = arith.constant 0 : i32
    %c0_i32_0 = arith.constant 0 : i32
    %c0_i32_1 = arith.constant 0 : i32
    %c0_i32_2 = arith.constant 0 : i32
    return %c0_i32, %c0_i32_0, %c0_i32_1 : i32, i32, i32
  }
  func.func @transform_10(%arg0: i32) -> (i32, i32, i32) {
    %c0_i32 = arith.constant 0 : i32
    %c0_i32_0 = arith.constant 0 : i32
    %c0_i32_1 = arith.constant 0 : i32
    %c0_i32_2 = arith.constant 0 : i32
    return %c0_i32, %c0_i32_0, %c0_i32_1 : i32, i32, i32
  }
  func.func @transform_11(%arg0: i32) -> (i32, i32, i32) {
    %c0_i32 = arith.constant 0 : i32
    %c0_i32_0 = arith.constant 0 : i32
    %c0_i32_1 = arith.constant 0 : i32
    %c0_i32_2 = arith.constant 0 : i32
    return %c0_i32, %c0_i32_0, %c0_i32_1 : i32, i32, i32
  }
  func.func @transform_12(%arg0: i32) -> (i32, i32) {
    %c0_i32 = arith.constant 0 : i32
    %c0_i32_0 = arith.constant 0 : i32
    %c0_i32_1 = arith.constant 0 : i32
    return %c0_i32, %c0_i32_0 : i32, i32
  }
  func.func @transform_13(%arg0: i32) -> (i32, i32) {
    %c0_i32 = arith.constant 0 : i32
    %c0_i32_0 = arith.constant 0 : i32
    %c0_i32_1 = arith.constant 0 : i32
    return %c0_i32, %c0_i32_0 : i32, i32
  }
  func.func @transform_14(%arg0: i32) -> (i32, i32) {
    %c0_i32 = arith.constant 0 : i32
    %c0_i32_0 = arith.constant 0 : i32
    %c0_i32_1 = arith.constant 0 : i32
    return %c0_i32, %c0_i32_0 : i32, i32
  }
  func.func @transform_15(%arg0: i32) -> (i32, i32) {
    %c0_i32 = arith.constant 0 : i32
    %c0_i32_0 = arith.constant 0 : i32
    %c0_i32_1 = arith.constant 0 : i32
    return %c0_i32, %c0_i32_0 : i32, i32
  }
  func.func @transform_16(%arg0: i32) -> (i32, i32) {
    %c0_i32 = arith.constant 0 : i32
    %c0_i32_0 = arith.constant 0 : i32
    %c0_i32_1 = arith.constant 0 : i32
    return %c0_i32, %c0_i32_0 : i32, i32
  }
  func.func @transform_17(%arg0: i32) -> (i32, i32) {
    %c0_i32 = arith.constant 0 : i32
    %c0_i32_0 = arith.constant 0 : i32
    %c0_i32_1 = arith.constant 0 : i32
    return %c0_i32, %c0_i32_0 : i32, i32
  }
  func.func @transform_18(%arg0: i32) -> (i32, i32, i32) {
    %c0_i32 = arith.constant 0 : i32
    %c0_i32_0 = arith.constant 0 : i32
    %c0_i32_1 = arith.constant 0 : i32
    %c0_i32_2 = arith.constant 0 : i32
    return %c0_i32, %c0_i32_0, %c0_i32_1 : i32, i32, i32
  }
}

</mosaic_0001>

<bundles_post_ra>
// kernel: tpu_custom_call.1
= control target key start
LH: loop header
LB: loop body
LE: loop exit
PB: predicated region body
PF: predicated region fallthrough
CT: control target
= control target key end

     0   :  { %vm69_vm0 = vcmask 195584   ;;  %vm250_vm1 = vcmask 1043456   ;;  %v4563_v23 = vmov 0   ;;  %v4564_v26 = vmov 0.0   ;;  %s5532_s0 = inlined_call_operand.vmem [shape: f32[16,24], index: 0, kind: input, shape index: {}]   ;;  %s5533_s1 = inlined_call_operand.vmem [shape: f32[16,24], index: 1, kind: input, shape index: {}]   ;;  %s5534_s3 = inlined_call_operand.vmem [shape: bf16[2,24,1152], index: 3, kind: input, shape index: {}]   ;;  %s5535_s2 = inlined_call_operand.vmem [shape: f32[2,24], index: 2, kind: input, shape index: {}]   ;;  %s5536_s4 = inlined_call_operand.vmem [shape: f32[2,1,1152], index: 4, kind: input, shape index: {}]   ;;  %s5537_s5 = inlined_call_operand.vmem [shape: bf16[2,384,24], index: 5, kind: input, shape index: {}]   ;;  %s5538_s6 = inlined_call_operand.vmem [shape: f32[2,1,24], index: 6, kind: input, shape index: {}]   ;;  %s5539_s7 = inlined_call_operand.vmem [shape: bf16[2,24,96], index: 7, kind: input, shape index: {}]   ;;  %s5540_s9 = inlined_call_operand.vmem [shape: bf16[2,96,24], index: 9, kind: input, shape index: {}]   ;;  %s5541_s11 = inlined_call_operand.vmem [shape: f32[2,4,24], index: 11, kind: input, shape index: {}]   ;;  %s5542_s8 = inlined_call_operand.vmem [shape: f32[2,1,96], index: 8, kind: input, shape index: {}]   ;;  %s5543_s10 = inlined_call_operand.vmem [shape: f32[2,1,24], index: 10, kind: input, shape index: {}]   ;;  %s5544_s14 = inlined_call_operand.vmem [shape: bf16[128,64], index: 14, kind: input, shape index: {}]   ;;  %s5545_s16 = inlined_call_operand.vmem [shape: f32[64,1], index: 16, kind: input, shape index: {}]   ;;  %s5546_s12 = inlined_call_operand.vmem [shape: f32[8,128], index: 12, kind: input, shape index: {}]   ;;  %s5547_s13 = inlined_call_operand.vmem [shape: f32[1,128], index: 13, kind: input, shape index: {}]   ;;  %s5548_s17 = inlined_call_operand.<no memory space> [shape: f32[1,1], index: 17, kind: input, shape index: {}]   ;;  %s5549_s15 = inlined_call_operand.vmem [shape: f32[1,64], index: 15, kind: input, shape index: {}]   ;;  %s5550_s18 = inlined_call_operand.vmem [shape: f32[2,1,1], index: 18, kind: output, shape index: {}]  }
   0x1   :  { %5555 = sst [smem:[#allocation3_spill]] %s5532_s0  ;;  %310 = vmatprep.mubr.bf16.mxu1 %v4563_v23  ;;  %396 = vmatprep.mubr.bf16.mxu0 %v4563_v23  ;;  %v101_v39 = vlaneseq  ;;  %v62_v44 = vld [vmem:[%s5535_s2] sm:$0x3]  ;;  %vm4565_vm2 = vmmov 0   ;;  %vm534_vm3 = vcmask 64512   ;;  %vm1558_vm4 = vcmask 785408  }
   0x2   :  { %5556 = sst [smem:[#allocation4_spill]] %s5533_s1  ;;  %s5559_s29 = sld [smem:[#allocation3_spill]]  ;;  %vm3317_vm5 = vcmask 523264   ;;  %vm3391_vm6 = vcmask 0  }
   0x3   :  { %5557 = sst [smem:[#allocation5_spill]] %s5534_s3  ;;  %v4716_v42 = vshrl.u32 %v101_v39, 7 }
   0x4   :  { %5558 = sst [smem:[#allocation6_spill]] %s5545_s16  ;;  %s5560_s16 = sld [smem:[#allocation4_spill]] }
   0x5   :  { %s5561_s3 = sld [smem:[#allocation5_spill]]  ;;  %v4719_v43 = vsub.s32 0, %v4716_v42  ;;  %v4727_v49 = vsub.s32 1, %v4716_v42  ;;  %v155_v39 = vsub.s32 5, %v4716_v42 }
   0x7   :  { %v104_v48 = vrot.slane %v62_v44, %v4719_v43  ;;  %v110_v54 = vrot.slane %v62_v44, %v4727_v49 }
   0x8   :  { %v63_v0 = vld [vmem:[%s5559_s29] sm:$0xff]  ;;  %v64_v2 = vld [vmem:[%s5559_s29 + $0x8] sm:$0xff] }
   0xa   :  { %v65_v1 = vld [vmem:[%s5560_s16] sm:$0xff]  ;;  %v66_v4 = vld [vmem:[%s5560_s16 + $0x8] sm:$0xff]  ;;  %s5562_s16 = sld [smem:[#allocation6_spill]] }
   0xb   :  { %v4671_v3 = vadd.f32 %v65_v1, %v63_v0  ;;  %v4676_v5 = vadd.f32 %v66_v4, %v64_v2  ;;  %v4371_v12 = vld [vmem:[%s5561_s3 + $0x4] ss:$36 sps:$4 sm:$0xff]   ;;  %v4373_v13 = vld [vmem:[%s5561_s3 + $0x14] ss:$36 sps:$4 sm:$0xff]   ;;  %v4383_v25 = vld [vmem:[%s5561_s3 + $0xc] ss:$36 sps:$4 sm:$0xff]  }
   0xc   :  { %278 = vmatprep.subr.bf16.mxu1 %v4371_v12  ;;  %v4375_v14 = vld [vmem:[%s5561_s3] ss:$36 sps:$4 sm:$0xff]   ;;  %v4376_v15 = vld [vmem:[%s5561_s3 + $0x10] ss:$36 sps:$4 sm:$0xff]   ;;  %v124_v16 = vld [vmem:[%s5561_s3 + $0x48] sm:$0xff]  ;;  %364 = vmatprep.subr.bf16.mxu0 %v4373_v13 }
   0xd   :  { %v70_v6 = vsel %vm69_vm0, %v4671_v3, 0.0  ;;  %v79_v7 = vmul.f32 %v4671_v3, %v4671_v3  ;;  %v80_v8 = vmul.f32 %v4676_v5, %v4676_v5  ;;  %v73_v10 = vsel %vm69_vm0, %v4676_v5, 0.0  ;;  %v126_v18 = vld [vmem:[%s5561_s3 + $0x58] sm:$0xff]  ;;  %279 = vmatpush1.bf16.msra.mxu1 %v4375_v14  ;;  %365 = vmatpush1.bf16.msra.mxu0 %v4376_v15  ;;  %v125_v56 = vld [vmem:[%s5561_s3 + $0x50] sm:$0xff]  ;;  %v4381_v59 = vld [vmem:[%s5561_s3 + $0x8] ss:$36 sps:$4 sm:$0xff]  }
   0xe   :  { %71 = vadd.xlane.f32.xlu0 %v70_v6  ;;  %v3611_v17 = vcombine.high %v124_v16, %v124_v16  ;;  %v3610_v19 = vcombine.low %v124_v16, %v124_v16  ;;  %v3615_v20 = vcombine.high %v126_v18, %v126_v18  ;;  %v3614_v21 = vcombine.low %v126_v18, %v126_v18  ;;  %v4384_v60 = vld [vmem:[%s5561_s3 + $0x20] ss:$36 sps:$4 sm:$0xff]   ;;  %v4387_v0 = vld [vmem:[%s5561_s3 + $0x68] ss:$0 sps:$4 sm:$0xff]  }
   0xf   :  { %v81_v9 = vsel %vm69_vm0, %v79_v7, 0.0  ;;  %v84_v11 = vsel %vm69_vm0, %v80_v8, 0.0  ;;  %v3613_v62 = vcombine.high %v125_v56, %v125_v56  ;;  %v3612_v63 = vcombine.low %v125_v56, %v125_v56  ;;  %v127_v4 = vld [vmem:[%s5561_s3 + $0x60] sm:$0xff] }
  0x10   :  { %82 = vadd.xlane.f32.xlu1 %v81_v9  ;;  %3619 = vmatprep.subr.msk.bf16.mxu1 %vm250_vm1, %v3611_v17  ;;  %v252_v22 = vsel %vm250_vm1, %v3610_v19, 0  ;;  %v264_v24 = vsel %vm250_vm1, %v3614_v21, 0  ;;  %v276_v2 = vsel %vm250_vm1, %v4387_v0, 0  ;;  %v3617_v6 = vcombine.high %v127_v4, %v127_v4  ;;  %v4791_v18 = vld [vmem:[%s5536_s4] sm:$0xff] }
  0x11   :  { %3623 = vmatprep.subr.msk.bf16.mxu0 %vm250_vm1, %v3615_v20  ;;  %281 = vmatpush1.bf16.msra.mxu1 %v252_v22  ;;  %v258_v1 = vsel %vm250_vm1, %v3612_v63, 0  ;;  %v3616_v7 = vcombine.low %v127_v4, %v127_v4  ;;  %v4782_v15 = vsub.s32 3, %v4716_v42  ;;  %v151_v20 = vsub.s32 4, %v4716_v42 }
  0x12   :  { %74 = vadd.xlane.f32.xlu0 %v73_v10  ;;  %367 = vmatpush1.bf16.msra.mxu0 %v264_v24  ;;  %v4826_v56 = vsub.s32 2, %v4716_v42 }
  0x13   :  { %321 = vmatprep.subr.bf16.mxu1 %v4383_v25  ;;  %4017 = vmatprep.subr.bf16.mxu0 %v4564_v26  ;;  %v270_v8 = vsel %vm250_vm1, %v3616_v7, 0  ;;  %v148_v19 = vrot.slane %v4791_v18, %v4782_v15 }
  0x14   :  { %85 = vadd.xlane.f32.xlu1 %v84_v11 }
  0x9b   :  { %v72_v27 = vpop.xlane.xlu0 %71 }
  0x9c   :  { %v77_v28 = vmul.f32 0.041666668, %v72_v27  ;;  %v159_v27 = vsub.s32 6, %v4716_v42 }
  0x9d   :  { %v83_v29 = vpop.xlane.xlu1 %82 }
  0x9e   :  { %v89_v30 = vmul.f32 %v77_v28, %v77_v28  ;;  %v87_v31 = vmul.f32 0.041666668, %v83_v29  ;;  %v93_v45 = vsub.f32 %v4671_v3, %v77_v28  ;;  %v4390_v3 = vld [vmem:[%s5561_s3 + $0x1c] ss:$36 sps:$4 sm:$0xff]  }
  0x9f   :  { %v75_v32 = vpop.xlane.xlu0 %74 }
  0xa0   :  { %v91_v33 = vsub.f32 %v87_v31, %v89_v30  ;;  %v78_v34 = vmul.f32 0.041666668, %v75_v32  ;;  %v136_v31 = vrot.slane %v4791_v18, %v4719_v43 }
  0xa1   :  { %v86_v35 = vpop.xlane.xlu1 %85 }
  0xa2   :  { %v95_v36 = vadd.f32 1e-12, %v91_v33  ;;  %v90_v37 = vmul.f32 %v78_v34, %v78_v34  ;;  %v88_v38 = vmul.f32 0.041666668, %v86_v35  ;;  %v94_v50 = vsub.f32 %v4676_v5, %v78_v34  ;;  %v4388_v5 = vld [vmem:[%s5561_s3 + $0x18] ss:$36 sps:$4 sm:$0xff]  }
  0xa3   :  { %v152_v34 = vrot.slane %v4791_v18, %v151_v20 }
  0xa4   :  { %4495 = vrsqrt.f32 %v95_v36  ;;  %v92_v40 = vsub.f32 %v88_v38, %v90_v37  ;;  %v160_v36 = vrot.slane %v4791_v18, %v159_v27 }
  0xa6   :  { %v96_v41 = vadd.f32 1e-12, %v92_v40 }
  0xa8   :  { %4497 = vrsqrt.f32 %v96_v41 }
  0xae   :  { %v4496_v46 = vpop.eup %4495 }
  0xaf   :  { %v99_v47 = vmul.f32 %v4496_v46, %v93_v45 }
  0xb1   :  { %v105_v53 = vmul.f32 %v104_v48, %v99_v47  ;;  %v140_v47 = vrot.slane %v4791_v18, %v4727_v49 }
  0xb2   :  { %v4498_v51 = vpop.eup %4497 }
  0xb3   :  { %v100_v52 = vmul.f32 %v4498_v51, %v94_v50  ;;  %v4734_v57 = vadd.f32 %v110_v54, %v105_v53  ;;  %v156_v53 = vrot.slane %v4791_v18, %v155_v39 }
  0xb5   :  { %v106_v55 = vmul.f32 %v104_v48, %v100_v52 }
  0xb7   :  { %v4736_v58 = vadd.f32 %v110_v54, %v106_v55 }
  0xb9   :  { %v113_v61 = vpack.c.bf16 %v4736_v58, %v4734_v57 }
  0xbb   :  { %3620 = vmatmul.mubr.msk.bf16.vlgmr.msra.gmra.mrb[0].mxu1 %vm69_vm0, %v113_v61  ;;  %3624 = vmatmul.mubr.msk.bf16.vlgmr.msra.gmra.mrb[0].mxu0 %vm69_vm0, %v113_v61 }
  0xbc   :  { %322 = vmatpush1.bf16.msra.mxu1 %v4381_v59  ;;  %4018 = vmatpush3.bf16.msra.mxu0 %v4384_v60 }
  0xbd   :  { %3621 = vmatprep.subr.msk.bf16.mxu1 %vm250_vm1, %v3613_v62  ;;  %4019 = vmatprep.subr.bf16.mxu0 %v4564_v26 }
  0xbe   :  { %353 = vmatprep.mubr.bf16.mxu1 %v4563_v23  ;;  %4021 = vmatprep.mubr.msk.bf16.mxu0 %vm4565_vm2, %v4564_v26 }
  0xc0   :  { %324 = vmatpush1.bf16.msra.mxu1 %v258_v1  ;;  %4020 = vmatpush3.bf16.msra.mxu0 %v276_v2 }
  0xc1   :  { %407 = vmatprep.subr.bf16.mxu1 %v4390_v3  ;;  %4031 = vmatprep.subr.bf16.mxu0 %v4564_v26 }
  0xc3   :  { %3622 = vmatmul.mubr.msk.bf16.vlgmr.msra.gmra.mrb[4].mxu1 %vm69_vm0, %v113_v61  ;;  %4022 = vmatmul.mubr.msk.bf16.vlgmr.msra.gmra.mrb[4].mxu0 %vm69_vm0, %v113_v61 }
  0xc4   :  { %408 = vmatpush1.bf16.msra.mxu1 %v4388_v5  ;;  %439 = vmatprep.mubr.bf16.mxu1 %v4563_v23 }
  0xc5   :  { %3625 = vmatprep.subr.msk.bf16.mxu1 %vm250_vm1, %v3617_v6  ;;  %4033 = vmatprep.mubr.msk.bf16.mxu0 %vm4565_vm2, %v4564_v26 }
  0xc8   :  { %410 = vmatpush1.bf16.msra.mxu1 %v270_v8 }
  0xc9   :  { %4025 = vmatprep.subr.bf16.mxu1 %v4564_v26 }
  0xcb   :  { %3626 = vmatmul.mubr.msk.bf16.vlgmr.msra.gmra.mrb[8].mxu1 %vm69_vm0, %v113_v61  ;;  %v144_v61 = vrot.slane %v4791_v18, %v4826_v56 }
  0xcc   :  { %4027 = vmatprep.mubr.msk.bf16.mxu1 %vm4565_vm2, %v4564_v26 }
 0x18e   :  { %v312_v9 = vpop.f32.mrb[0].mxu1  ;;  %v398_v10 = vpop.f32.mrb[0].mxu0 }
 0x18f   :  { %v314_v11 = vpop.f32.mrb[1].mxu1  ;;  %v400_v12 = vpop.f32.mrb[1].mxu0  ;;  %v313_v37 = vadd.f32 %v312_v9, %v136_v31  ;;  %v399_v38 = vadd.f32 %v398_v10, %v152_v34 }
 0x190   :  { %v316_v13 = vpop.f32.mrb[2].mxu1  ;;  %v4779_v14 = vpop.f32.mrb[2].mxu0  ;;  %v315_v55 = vadd.f32 %v314_v11, %v140_v47  ;;  %v401_v59 = vadd.f32 %v400_v12, %v156_v53 }
 0x191   :  { %v4784_v16 = vpop.f32.mrb[3].mxu1  ;;  %v4786_v17 = vpop.f32.mrb[3].mxu0  ;;  %v491_v46 = vpack.c.bf16 %v313_v37, %v313_v37  ;;  %v595_v52 = vpack.c.bf16 %v399_v38, %v399_v38  ;;  %v317_v3 = vadd.f32 %v316_v13, %v136_v31  ;;  %v403_v4 = vadd.f32 %v4779_v14, %v152_v34 }
 0x192   :  { %v594_v60 = vpack.c.bf16 %v315_v55, %v315_v55  ;;  %v697_v62 = vpack.c.bf16 %v401_v59, %v401_v59  ;;  %v319_v7 = vadd.f32 %v4784_v16, %v140_v47  ;;  %v405_v8 = vadd.f32 %v4786_v17, %v156_v53 }
 0x193   :  { %v798_v5 = vpack.c.bf16 %v317_v3, %v317_v3  ;;  %v901_v6 = vpack.c.bf16 %v403_v4, %v403_v4 }
 0x194   :  { %v900_v9 = vpack.c.bf16 %v319_v7, %v319_v7  ;;  %v1003_v10 = vpack.c.bf16 %v405_v8, %v405_v8 }
 0x196   :  { %v355_v21 = vpop.f32.mrb[4].mxu1  ;;  %v4796_v22 = vpop.f32.mrb[4].mxu0 }
 0x197   :  { %v357_v24 = vpop.f32.mrb[5].mxu1  ;;  %v4023_v25 = vpop.f32.mrb[5].mxu0  ;;  %v356_v63 = vadd.f32 %v355_v21, %v144_v61 }
 0x198   :  { %v358_v28 = vadd.f32 %v357_v24, %v148_v19  ;;  %v4799_v29 = vpop.f32.mrb[6].mxu1  ;;  %v4801_v30 = vpop.f32.mrb[6].mxu0 }
 0x199   :  { %v361_v32 = vpop.f32.mrb[7].mxu1  ;;  %v4024_v33 = vpop.f32.mrb[7].mxu0  ;;  %v696_v1 = vpack.c.bf16 %v356_v63, %v356_v63  ;;  %v360_v11 = vadd.f32 %v4799_v29, %v144_v61 }
 0x19a   :  { %v492_v35 = vpack.c.bf16 %v358_v28, %v358_v28  ;;  %v362_v0 = vadd.f32 %v361_v32, %v148_v19 }
 0x19b   :  { %v1002_v12 = vpack.c.bf16 %v360_v11, %v360_v11 }
 0x19c   :  { %4026 = vmatpush3.bf16.xpose.msra.mxu1 %v492_v35  ;;  %v799_v2 = vpack.c.bf16 %v362_v0, %v362_v0 }
 0x19d   :  { %4037 = vmatprep.subr.bf16.mxu1 %v4564_v26 }
 0x19e   :  { %v441_v40 = vpop.f32.mrb[8].mxu1 }
 0x19f   :  { %v442_v41 = vadd.f32 %v441_v40, %v160_v36  ;;  %v4813_v44 = vpop.f32.mrb[9].mxu1 }
 0x1a0   :  { %v445_v45 = vpop.f32.mrb[10].mxu1 }
 0x1a1   :  { %v547_v48 = vpack.c.bf16 %v442_v41, %v442_v41  ;;  %v4817_v50 = vadd.f32 %v445_v45, %v160_v36  ;;  %v4819_v51 = vpop.f32.mrb[11].mxu1 }
 0x1a3   :  { %v552_v54 = vsel %vm250_vm1, %v547_v48, 0  ;;  %4028 = vmatmul.mubr.bf16.vlgmr.msra.gmra.mrb[12].mxu1 %v491_v46 }
 0x1a4   :  { %4032 = vmatpush3.bf16.msra.mxu0 %v552_v54  ;;  %4038 = vmatpush3.bf16.xpose.msra.mxu1 %v595_v52 }
 0x1a5   :  { %4039 = vmatprep.mubr.msk.bf16.mxu1 %vm4565_vm2, %v4564_v26  ;;  %4049 = vmatprep.subr.bf16.mxu1 %v4564_v26 }
 0x1a6   :  { %4043 = vmatprep.subr.bf16.mxu0 %v4564_v26 }
 0x1ab   :  { %4040 = vmatmul.mubr.bf16.vlgmr.msra.gmra.mrb[16].mxu1 %v594_v60 }
 0x1ac   :  { %4050 = vmatpush3.bf16.xpose.msra.mxu1 %v697_v62  ;;  %4051 = vmatprep.mubr.msk.bf16.mxu1 %vm4565_vm2, %v4564_v26 }
 0x1ad   :  { %4061 = vmatprep.subr.bf16.mxu1 %v4564_v26 }
 0x1b3   :  { %4052 = vmatmul.mubr.bf16.vlgmr.msra.gmra.mrb[20].mxu1 %v696_v1 }
 0x1b4   :  { %4062 = vmatpush3.bf16.xpose.msra.mxu1 %v799_v2  ;;  %4063 = vmatprep.mubr.msk.bf16.mxu1 %vm4565_vm2, %v4564_v26 }
 0x1b5   :  { %4073 = vmatprep.subr.bf16.mxu1 %v4564_v26 }
 0x1bb   :  { %4064 = vmatmul.mubr.bf16.vlgmr.msra.gmra.mrb[24].mxu1 %v798_v5 }
 0x1bc   :  { %4074 = vmatpush3.bf16.xpose.msra.mxu1 %v901_v6  ;;  %4075 = vmatprep.mubr.msk.bf16.mxu1 %vm4565_vm2, %v4564_v26 }
 0x1bd   :  { %4085 = vmatprep.subr.bf16.mxu1 %v4564_v26 }
 0x1c3   :  { %4076 = vmatmul.mubr.bf16.vlgmr.msra.gmra.mrb[28].mxu1 %v900_v9 }
 0x1c4   :  { %4086 = vmatpush3.bf16.xpose.msra.mxu1 %v1003_v10  ;;  %4087 = vmatprep.mubr.msk.bf16.mxu1 %vm4565_vm2, %v4564_v26 }
 0x1cb   :  { %4088 = vmatmul.mubr.bf16.vlgmr.msra.gmra.mrb[32].mxu1 %v1002_v12 }
 0x276   :  { %v527_v13 = vpop.f32.mrb[12].mxu1 }
 0x277   :  { %v533_v14 = vmul.f32 0.35355338, %v527_v13  ;;  %v4029_v19 = vpop.f32.mrb[13].mxu1 }
 0x278   :  { %v530_v16 = vpop.f32.mrb[14].mxu1 }
 0x279   :  { %v4030_v21 = vpop.f32.mrb[15].mxu1  ;;  %v535_v24 = vsel %vm534_vm3, %v533_v14, -inf }
 0x27a   :  { %536 = vmax.xlane.f32.xlu0 %v535_v24 }
 0x27e   :  { %v630_v17 = vpop.f32.mrb[16].mxu1 }
 0x27f   :  { %v636_v25 = vmul.f32 0.35355338, %v630_v17  ;;  %v4041_v28 = vpop.f32.mrb[17].mxu1 }
 0x280   :  { %v633_v31 = vpop.f32.mrb[18].mxu1 }
 0x281   :  { %v4042_v32 = vpop.f32.mrb[19].mxu1  ;;  %v637_v33 = vsel %vm534_vm3, %v636_v25, -inf }
 0x282   :  { %638 = vmax.xlane.f32.xlu1 %v637_v33 }
 0x286   :  { %v732_v29 = vpop.f32.mrb[20].mxu1 }
 0x287   :  { %v738_v34 = vmul.f32 0.35355338, %v732_v29  ;;  %v4053_v35 = vpop.f32.mrb[21].mxu1 }
 0x288   :  { %v735_v36 = vpop.f32.mrb[22].mxu1 }
 0x289   :  { %v4054_v37 = vpop.f32.mrb[23].mxu1  ;;  %v739_v38 = vsel %vm534_vm3, %v738_v34, -inf }
 0x28a   :  { %740 = vmax.xlane.f32.xlu0 %v739_v38 }
 0x28e   :  { %v834_v40 = vpop.f32.mrb[24].mxu1 }
 0x28f   :  { %v840_v41 = vmul.f32 0.35355338, %v834_v40  ;;  %v4065_v45 = vpop.f32.mrb[25].mxu1 }
 0x290   :  { %v837_v46 = vpop.f32.mrb[26].mxu1  ;;  %v163_v45 = vsub.s32 7, %v4716_v42 }
 0x291   :  { %v4066_v47 = vpop.f32.mrb[27].mxu1  ;;  %v841_v48 = vsel %vm534_vm3, %v840_v41, -inf }
 0x292   :  { %842 = vmax.xlane.f32.xlu1 %v841_v48  ;;  %v164_v47 = vrot.slane %v4791_v18, %v163_v45 }
 0x294   :  { %v444_v48 = vadd.f32 %v4813_v44, %v164_v47 }
 0x296   :  { %v936_v52 = vpop.f32.mrb[28].mxu1 }
 0x297   :  { %v942_v53 = vmul.f32 0.35355338, %v936_v52  ;;  %v4077_v54 = vpop.f32.mrb[29].mxu1 }
 0x298   :  { %v939_v55 = vpop.f32.mrb[30].mxu1  ;;  %v649_v54 = vpack.c.bf16 %v444_v48, %v444_v48  ;;  %v4406_v48 = vld [vmem:[%s5537_s5 + $0x68] sm:$0xff]  }
 0x299   :  { %v4078_v59 = vpop.f32.mrb[31].mxu1  ;;  %v943_v60 = vsel %vm534_vm3, %v942_v53, -inf }
 0x29a   :  { %944 = vmax.xlane.f32.xlu0 %v943_v60  ;;  %v3600_v59 = vld [vmem:[%s5536_s4 + $0x8] ss:$0 sm:$0xff] }
 0x29e   :  { %v1038_v61 = vpop.f32.mrb[32].mxu1 }
 0x29f   :  { %v1044_v62 = vmul.f32 0.35355338, %v1038_v61  ;;  %v4089_v63 = vpop.f32.mrb[33].mxu1  ;;  %v485_v61 = vadd.f32 %v3600_v59, %v4796_v22 }
 0x2a0   :  { %v1041_v0 = vpop.f32.mrb[34].mxu1 }
 0x2a1   :  { %v4090_v1 = vpop.f32.mrb[35].mxu1  ;;  %v1045_v2 = vsel %vm534_vm3, %v1044_v62, -inf  ;;  %v751_v44 = vpack.c.bf16 %v485_v61, %v485_v61  ;;  %v4413_v61 = vld [vmem:[%s5537_s5 + $0xa8] sm:$0xff]  }
 0x2a2   :  { %1046 = vmax.xlane.f32.xlu1 %v1045_v2 }
 0x2a3   :  { %v756_v2 = vsel %vm250_vm1, %v751_v44, 0 }
 0x307   :  { %v537_v3 = vpop.xlane.xlu0 %536 }
 0x308   :  { %v538_v4 = vsub.f32 %v533_v14, %v537_v3 }
 0x30a   :  { %v539_v5 = vmul.f32 1.442695, %v538_v4  ;;  %v853_v4 = vpack.c.bf16 %v4817_v50, %v4817_v50 }
 0x30c   :  { %4499 = vpow2.f32 %v539_v5 }
 0x30f   :  { %v639_v6 = vpop.xlane.xlu1 %638 }
 0x310   :  { %v640_v7 = vsub.f32 %v636_v25, %v639_v6 }
 0x312   :  { %v641_v8 = vmul.f32 1.442695, %v640_v7  ;;  %v858_v7 = vsel %vm250_vm1, %v853_v4, 0 }
 0x314   :  { %4501 = vpow2.f32 %v641_v8  ;;  %v448_v8 = vadd.f32 %v4819_v51, %v164_v47  ;;  %v4405_v47 = vld [vmem:[%s5537_s5 + $0x20] sm:$0xff]  }
 0x316   :  { %v4500_v9 = vpop.eup %4499 }
 0x317   :  { %v741_v10 = vpop.xlane.xlu0 %740  ;;  %v541_v11 = vsel %vm534_vm3, %v4500_v9, 0.0 }
 0x318   :  { %v742_v12 = vsub.f32 %v738_v34, %v741_v10  ;;  %542 = vadd.xlane.f32.xlu0 %v541_v11  ;;  %v955_v11 = vpack.c.bf16 %v448_v8, %v448_v8 }
 0x31a   :  { %v743_v13 = vmul.f32 1.442695, %v742_v12 }
 0x31c   :  { %4503 = vpow2.f32 %v743_v13  ;;  %v488_v13 = vadd.f32 %v3600_v59, %v4801_v30  ;;  %v4411_v59 = vld [vmem:[%s5537_s5 + $0x30] sm:$0xff]  }
 0x31e   :  { %v4502_v19 = vpop.eup %4501 }
 0x31f   :  { %v843_v16 = vpop.xlane.xlu1 %842  ;;  %v643_v21 = vsel %vm534_vm3, %v4502_v19, 0.0 }
 0x320   :  { %v844_v24 = vsub.f32 %v840_v41, %v843_v16  ;;  %644 = vadd.xlane.f32.xlu1 %v643_v21  ;;  %v1057_v21 = vpack.c.bf16 %v488_v13, %v488_v13 }
 0x322   :  { %v845_v14 = vmul.f32 1.442695, %v844_v24 }
 0x324   :  { %4505 = vpow2.f32 %v845_v14 }
 0x326   :  { %v4504_v17 = vpop.eup %4503 }
 0x327   :  { %v945_v25 = vpop.xlane.xlu0 %944  ;;  %v745_v28 = vsel %vm534_vm3, %v4504_v17, 0.0 }
 0x328   :  { %v946_v31 = vsub.f32 %v942_v53, %v945_v25  ;;  %746 = vadd.xlane.f32.xlu0 %v745_v28 }
 0x32a   :  { %v947_v32 = vmul.f32 1.442695, %v946_v31  ;;  %v4393_v31 = vld [vmem:[%s5537_s5 + $0x40] sm:$0xff]  }
 0x32b   :  { %3872 = vmatprep.subr.bf16.mxu1 %v4393_v31 }
 0x32c   :  { %4507 = vpow2.f32 %v947_v32  ;;  %v4394_v32 = vld [vmem:[%s5537_s5] sm:$0xff]  }
 0x32d   :  { %3873 = vmatpush3.bf16.msra.mxu1 %v4394_v32 }
 0x32e   :  { %v4506_v33 = vpop.eup %4505 }
 0x32f   :  { %v1047_v29 = vpop.xlane.xlu1 %1046  ;;  %v847_v34 = vsel %vm534_vm3, %v4506_v33, 0.0 }
 0x330   :  { %v1048_v35 = vsub.f32 %v1044_v62, %v1047_v29  ;;  %848 = vadd.xlane.f32.xlu1 %v847_v34  ;;  %v654_v62 = vsel %vm250_vm1, %v649_v54, 0  ;;  %v4396_v29 = vld [vmem:[%s5537_s5 + $0x8] sm:$0xff]   ;;  %v4397_v34 = vld [vmem:[%s5537_s5 + $0x50] sm:$0xff]  }
 0x331   :  { %v4409_v54 = vld [vmem:[%s5537_s5 + $0x70] sm:$0xff]  }
 0x332   :  { %v1049_v36 = vmul.f32 1.442695, %v1048_v35  ;;  %v4398_v35 = vld [vmem:[%s5537_s5 + $0x80] sm:$0xff]  }
 0x334   :  { %4509 = vpow2.f32 %v1049_v36  ;;  %v4399_v36 = vld [vmem:[%s5537_s5 + $0x10] sm:$0xff]  }
 0x336   :  { %v4859_v37 = vpop.eup %4507 }
 0x337   :  { %v949_v38 = vsel %vm534_vm3, %v4859_v37, 0.0 }
 0x338   :  { %950 = vadd.xlane.f32.xlu0 %v949_v38  ;;  %v4401_v38 = vld [vmem:[%s5537_s5 + $0x88] sm:$0xff]  }
 0x33e   :  { %v4863_v40 = vpop.eup %4509 }
 0x33f   :  { %v1051_v41 = vsel %vm534_vm3, %v4863_v40, 0.0 }
 0x340   :  { %1052 = vadd.xlane.f32.xlu1 %v1051_v41  ;;  %v4403_v41 = vld [vmem:[%s5537_s5 + $0x60] sm:$0xff]  }
 0x3a5   :  { %v543_v46 = vpop.xlane.xlu0 %542 }
 0x3a6   :  { %4511 = vrcp.f32 %v543_v46  ;;  %v4404_v46 = vld [vmem:[%s5537_s5 + $0x90] sm:$0xff]  }
 0x3ad   :  { %v645_v52 = vpop.xlane.xlu1 %644 }
 0x3ae   :  { %4513 = vrcp.f32 %v645_v52  ;;  %v4407_v52 = vld [vmem:[%s5537_s5 + $0x98] sm:$0xff]  }
 0x3b0   :  { %v4512_v53 = vpop.eup %4511 }
 0x3b1   :  { %v545_v55 = vmul.f32 %v4512_v53, %v4500_v9  ;;  %v4408_v53 = vld [vmem:[%s5537_s5 + $0x28] sm:$0xff]  }
 0x3b3   :  { %v546_v60 = vpack.c.bf16 %v545_v55, %v545_v55  ;;  %v4410_v55 = vld [vmem:[%s5537_s5 + $0xa0] sm:$0xff]  }
 0x3b5   :  { %4034 = vmatmul.mubr.msk.bf16.vlgmr.msra.gmra.mrb[8].mxu0 %vm534_vm3, %v546_v60  ;;  %v747_v63 = vpop.xlane.xlu0 %746  ;;  %v4412_v60 = vld [vmem:[%s5537_s5 + $0x78] sm:$0xff]  }
 0x3b6   :  { %4044 = vmatpush3.bf16.msra.mxu0 %v654_v62  ;;  %4515 = vrcp.f32 %v747_v63  ;;  %4045 = vmatprep.mubr.msk.bf16.mxu0 %vm4565_vm2, %v4564_v26  ;;  %v4414_v62 = vld [vmem:[%s5537_s5 + $0x38] sm:$0xff]   ;;  %v4415_v63 = vld [vmem:[%s5537_s5 + $0xb0] sm:$0xff]  }
 0x3b7   :  { %4055 = vmatprep.subr.bf16.mxu0 %v4564_v26 }
 0x3b8   :  { %v4514_v18 = vpop.eup %4513 }
 0x3b9   :  { %v647_v0 = vmul.f32 %v4514_v18, %v4502_v19  ;;  %v960_v19 = vsel %vm250_vm1, %v955_v11, 0  ;;  %v4416_v18 = vld [vmem:[%s5537_s5 + $0xb8] sm:$0xff]  }
 0x3bb   :  { %v648_v1 = vpack.c.bf16 %v647_v0, %v647_v0 }
 0x3bd   :  { %4046 = vmatmul.mubr.msk.bf16.vlgmr.msra.gmra.mrb[12].mxu0 %vm534_vm3, %v648_v1  ;;  %v849_v22 = vpop.xlane.xlu1 %848 }
 0x3be   :  { %4056 = vmatpush3.bf16.msra.mxu0 %v756_v2  ;;  %4517 = vrcp.f32 %v849_v22  ;;  %4057 = vmatprep.mubr.msk.bf16.mxu0 %vm4565_vm2, %v4564_v26 }
 0x3bf   :  { %4067 = vmatprep.subr.bf16.mxu0 %v4564_v26 }
 0x3c0   :  { %v4516_v3 = vpop.eup %4515 }
 0x3c1   :  { %v749_v5 = vmul.f32 %v4516_v3, %v4504_v17  ;;  %v1062_v17 = vsel %vm250_vm1, %v1057_v21, 0 }
 0x3c3   :  { %v750_v6 = vpack.c.bf16 %v749_v5, %v749_v5 }
 0x3c5   :  { %v951_v9 = vpop.xlane.xlu0 %950  ;;  %4058 = vmatmul.mubr.msk.bf16.vlgmr.msra.gmra.mrb[16].mxu0 %vm534_vm3, %v750_v6 }
 0x3c6   :  { %4519 = vrcp.f32 %v951_v9  ;;  %4068 = vmatpush3.bf16.msra.mxu0 %v858_v7  ;;  %4069 = vmatprep.mubr.msk.bf16.mxu0 %vm4565_vm2, %v4564_v26 }
 0x3c7   :  { %4079 = vmatprep.subr.bf16.mxu0 %v4564_v26 }
 0x3c8   :  { %v4518_v10 = vpop.eup %4517 }
 0x3c9   :  { %v851_v12 = vmul.f32 %v4518_v10, %v4506_v33  ;;  %v4395_v33 = vld [vmem:[%s5537_s5 + $0x48] sm:$0xff]  }
 0x3ca   :  { %3874 = vmatprep.subr.bf16.mxu1 %v4395_v33 }
 0x3cb   :  { %v852_v50 = vpack.c.bf16 %v851_v12, %v851_v12  ;;  %3875 = vmatpush3.bf16.msra.mxu1 %v4396_v29 }
 0x3cc   :  { %3876 = vmatprep.subr.bf16.mxu1 %v4397_v34 }
 0x3cd   :  { %4070 = vmatmul.mubr.msk.bf16.vlgmr.msra.gmra.mrb[20].mxu0 %vm534_vm3, %v852_v50  ;;  %v1053_v51 = vpop.xlane.xlu1 %1052 }
 0x3ce   :  { %4080 = vmatpush3.bf16.msra.mxu0 %v960_v19  ;;  %4521 = vrcp.f32 %v1053_v51  ;;  %4081 = vmatprep.mubr.msk.bf16.mxu0 %vm4565_vm2, %v4564_v26 }
 0x3cf   :  { %4091 = vmatprep.subr.bf16.mxu0 %v4564_v26  ;;  %3877 = vmatpush3.bf16.msra.mxu1 %v4399_v36 }
 0x3d0   :  { %v4520_v16 = vpop.eup %4519 }
 0x3d1   :  { %v953_v24 = vmul.f32 %v4520_v16, %v4859_v37  ;;  %v4400_v37 = vld [vmem:[%s5537_s5 + $0x58] sm:$0xff]  }
 0x3d2   :  { %3878 = vmatprep.subr.bf16.mxu1 %v4400_v37 }
 0x3d3   :  { %v954_v14 = vpack.c.bf16 %v953_v24, %v953_v24 }
 0x3d5   :  { %4082 = vmatmul.mubr.msk.bf16.vlgmr.msra.gmra.mrb[24].mxu0 %vm534_vm3, %v954_v14 }
 0x3d6   :  { %4092 = vmatpush3.bf16.msra.mxu0 %v1062_v17  ;;  %4093 = vmatprep.mubr.msk.bf16.mxu0 %vm4565_vm2, %v4564_v26 }
 0x3d7   :  { %4097 = vmatprep.subr.bf16.mxu0 %v4564_v26 }
 0x3d8   :  { %v4522_v30 = vpop.eup %4521 }
 0x3d9   :  { %v1055_v25 = vmul.f32 %v4522_v30, %v4863_v40  ;;  %v4402_v40 = vld [vmem:[%s5537_s5 + $0x18] sm:$0xff]  }
 0x3da   :  { %3879 = vmatpush3.bf16.msra.mxu1 %v4402_v40 }
 0x3db   :  { %v1056_v28 = vpack.c.bf16 %v1055_v25, %v1055_v25  ;;  %3880 = vmatprep.subr.bf16.mxu1 %v4403_v41 }
 0x3dd   :  { %4094 = vmatmul.mubr.msk.bf16.vlgmr.msra.gmra.mrb[28].mxu0 %vm534_vm3, %v1056_v28 }
 0x3de   :  { %4113 = vmatprep.mubr.msk.bf16.mxu0 %vm4565_vm2, %v4564_v26  ;;  %4098 = vmatpush3.bf16.msra.mxu0 %v4398_v35  ;;  %v3634_v35 = vld [vmem:[%s5538_s6] ss:$0 sm:$0xff] }
 0x3df   :  { %4099 = vmatprep.subr.bf16.mxu0 %v4564_v26  ;;  %3881 = vmatpush3.bf16.msra.mxu1 %v4405_v47 }
 0x3e0   :  { %3882 = vmatprep.subr.bf16.mxu1 %v4406_v48 }
 0x3e2   :  { %4100 = vmatpush3.bf16.msra.mxu0 %v4401_v38 }
 0x3e3   :  { %4101 = vmatprep.subr.bf16.mxu0 %v4564_v26  ;;  %3883 = vmatpush3.bf16.msra.mxu1 %v4408_v53 }
 0x3e4   :  { %3884 = vmatprep.subr.bf16.mxu1 %v4409_v54 }
 0x3e6   :  { %4102 = vmatpush3.bf16.msra.mxu0 %v4404_v46 }
 0x3e7   :  { %4103 = vmatprep.subr.bf16.mxu0 %v4564_v26  ;;  %3885 = vmatpush3.bf16.msra.mxu1 %v4411_v59 }
 0x3e8   :  { %3886 = vmatprep.subr.bf16.mxu1 %v4412_v60 }
 0x3ea   :  { %4104 = vmatpush3.bf16.msra.mxu0 %v4407_v52 }
 0x3eb   :  { %4105 = vmatprep.subr.bf16.mxu0 %v4564_v26  ;;  %3887 = vmatpush3.bf16.msra.mxu1 %v4414_v62 }
 0x3ec   :  { %4117 = vmatprep.subr.bf16.mxu1 %v4564_v26 }
 0x3ee   :  { %4106 = vmatpush3.bf16.msra.mxu0 %v4410_v55 }
 0x3ef   :  { %4107 = vmatprep.subr.bf16.mxu0 %v4564_v26 }
 0x3f2   :  { %4108 = vmatpush3.bf16.msra.mxu0 %v4413_v61 }
 0x3f3   :  { %4109 = vmatprep.subr.bf16.mxu0 %v4564_v26 }
 0x3f6   :  { %4110 = vmatpush3.bf16.msra.mxu0 %v4415_v63 }
 0x3f7   :  { %4111 = vmatprep.subr.bf16.mxu0 %v4564_v26 }
 0x3fa   :  { %4112 = vmatpush3.bf16.msra.mxu0 %v4416_v18 }
 0x3fb   :  { %4125 = vmatprep.subr.bf16.mxu0 %v4564_v26 }
 0x488   :  { %v588_v44 = vpop.f32.mrb[8].mxu0 }
 0x489   :  { %v4035_v0 = vpop.f32.mrb[9].mxu0 }
 0x48a   :  { %v591_v1 = vpop.f32.mrb[10].mxu0  ;;  %v4420_v0 = vld [vmem:[%s5540_s9 + $0x8] sm:$0xff]  }
 0x48b   :  { %v4036_v2 = vpop.f32.mrb[11].mxu0  ;;  %v4421_v1 = vld [vmem:[%s5540_s9 + $0x10] sm:$0xff]  }
 0x48c   :  { %v4422_v2 = vld [vmem:[%s5540_s9 + $0x18] sm:$0xff]  }
 0x490   :  { %v690_v22 = vpop.f32.mrb[12].mxu0 }
 0x491   :  { %v4047_v3 = vpop.f32.mrb[13].mxu0 }
 0x492   :  { %v693_v4 = vpop.f32.mrb[14].mxu0 }
 0x493   :  { %v4048_v5 = vpop.f32.mrb[15].mxu0 }
 0x498   :  { %v792_v6 = vpop.f32.mrb[16].mxu0 }
 0x499   :  { %v4059_v7 = vpop.f32.mrb[17].mxu0 }
 0x49a   :  { %v795_v8 = vpop.f32.mrb[18].mxu0 }
 0x49b   :  { %v4060_v9 = vpop.f32.mrb[19].mxu0 }
 0x4a0   :  { %v894_v10 = vpop.f32.mrb[20].mxu0 }
 0x4a1   :  { %v1104_v11 = vpack.c.bf16 %v894_v10, %v588_v44  ;;  %v4071_v12 = vpop.f32.mrb[21].mxu0  ;;  %v4419_v44 = vld [vmem:[%s5540_s9] sm:$0xff]  }
 0x4a2   :  { %v897_v50 = vpop.f32.mrb[22].mxu0 }
 0x4a3   :  { %v4072_v13 = vpop.f32.mrb[23].mxu0 }
 0x4a8   :  { %v996_v19 = vpop.f32.mrb[24].mxu0 }
 0x4a9   :  { %v1105_v51 = vpack.c.bf16 %v996_v19, %v690_v22  ;;  %v4083_v16 = vpop.f32.mrb[25].mxu0 }
 0x4aa   :  { %v999_v21 = vpop.f32.mrb[26].mxu0 }
 0x4ab   :  { %v4084_v24 = vpop.f32.mrb[27].mxu0  ;;  %1338 = vmatprep.mubr.bf16.mxu1 %v1105_v51  ;;  %v5031_v51 = vld [vmem:[%s5541_s11] sm:$0xf] }
 0x4ac   :  { %1339 = vmatmul.mubr.bf16.vlgmr.msra.gmra.mrb[36].mxu1 %v1104_v11  ;;  %v1424_v21 = vrot.slane %v5031_v51, %v4719_v43 }
 0x4ad   :  { %4121 = vmatprep.mubr.msk.bf16.mxu1 %vm4565_vm2, %v4564_v26 }
 0x4b0   :  { %v1098_v14 = vpop.f32.mrb[28].mxu0 }
 0x4b1   :  { %v1106_v17 = vpack.c.bf16 %v1098_v14, %v792_v6  ;;  %v4095_v30 = vpop.f32.mrb[29].mxu0 }
 0x4b2   :  { %v1101_v25 = vpop.f32.mrb[30].mxu0 }
 0x4b3   :  { %v4096_v28 = vpop.f32.mrb[31].mxu0  ;;  %4114 = vmatmul.mubr.bf16.vlgmr.msra.gmra.mrb[32].mxu0 %v1106_v17 }
 0x4b4   :  { %4137 = vmatprep.mubr.msk.bf16.mxu0 %vm4565_vm2, %v4564_v26  ;;  %4126 = vmatpush3.bf16.msra.mxu0 %v4419_v44 }
 0x4b5   :  { %4127 = vmatprep.subr.bf16.mxu0 %v4564_v26 }
 0x4b8   :  { %4128 = vmatpush3.bf16.msra.mxu0 %v4420_v0 }
 0x4b9   :  { %4129 = vmatprep.subr.bf16.mxu0 %v4564_v26 }
 0x4bc   :  { %4130 = vmatpush3.bf16.msra.mxu0 %v4421_v1 }
 0x4bd   :  { %4131 = vmatprep.subr.bf16.mxu0 %v4564_v26 }
 0x4c0   :  { %4132 = vmatpush3.bf16.msra.mxu0 %v4422_v2 }
 0x4c1   :  { %4133 = vmatprep.subr.bf16.mxu0 %v4564_v26 }
 0x57f   :  { %v3888_v31 = vpop.f32.mrb[36].mxu1 }
 0x580   :  { %v3889_v32 = vpop.f32.mrb[37].mxu1 }
 0x581   :  { %v3890_v33 = vadd.f32 %v3889_v32, %v3888_v31  ;;  %v3891_v29 = vpop.f32.mrb[38].mxu1  ;;  %v1430_v31 = vrot.slane %v5031_v51, %v4727_v49 }
 0x582   :  { %v3892_v34 = vpop.f32.mrb[39].mxu1 }
 0x583   :  { %v3893_v36 = vadd.f32 %v3892_v34, %v3891_v29  ;;  %v1341_v37 = vadd.f32 %v3890_v33, %v3634_v35 }
 0x585   :  { %v1344_v46 = vadd.f32 %v3893_v36, %v3634_v35  ;;  %v4423_v35 = vld [vmem:[%s5540_s9 + $0x20] sm:$0xff]   ;;  %v4424_v36 = vld [vmem:[%s5540_s9 + $0x28] sm:$0xff]  }
 0x586   :  { %v1381_v38 = vpop.f32.mrb[32].mxu0  ;;  %4134 = vmatpush3.bf16.msra.mxu0 %v4423_v35 }
 0x587   :  { %v1382_v40 = vadd.f32 %v1381_v38, %v1341_v37  ;;  %v4115_v41 = vpop.f32.mrb[33].mxu0  ;;  %4135 = vmatprep.subr.bf16.mxu0 %v4564_v26  ;;  %v3659_v37 = vld [vmem:[%s5542_s8] ss:$0 sm:$0xff] }
 0x588   :  { %v1384_v47 = vpop.f32.mrb[34].mxu0 }
 0x589   :  { %v1389_v48 = vadd.f32 %v1382_v40, %v4734_v57  ;;  %v1385_v52 = vadd.f32 %v1384_v47, %v1344_v46  ;;  %v4116_v53 = vpop.f32.mrb[35].mxu0  ;;  %v4417_v57 = vld [vmem:[%s5539_s7] sm:$0xff]  }
 0x58a   :  { %4118 = vmatpush3.bf16.msra.mxu1 %v4417_v57  ;;  %4136 = vmatpush3.bf16.msra.mxu0 %v4424_v36 }
 0x58b   :  { %v1390_v54 = vadd.f32 %v1385_v52, %v4736_v58  ;;  %v1391_v55 = vsel %vm69_vm0, %v1389_v48, 0.0  ;;  %v1399_v59 = vmul.f32 %v1389_v48, %v1389_v48  ;;  %v4418_v58 = vld [vmem:[%s5539_s7 + $0x8] ss:$0 sps:$4 sm:$0xff]   ;;  %4119 = vmatprep.subr.bf16.mxu1 %v4564_v26 }
 0x58c   :  { %1392 = vadd.xlane.f32.xlu0 %v1391_v55  ;;  %v1457_v18 = vsel %vm250_vm1, %v4418_v58, 0  ;;  %v3663_v55 = vld [vmem:[%s5543_s10] ss:$0 sm:$0xff] }
 0x58d   :  { %v1394_v60 = vsel %vm69_vm0, %v1390_v54, 0.0  ;;  %v1400_v61 = vmul.f32 %v1390_v54, %v1390_v54  ;;  %v1401_v62 = vsel %vm69_vm0, %v1399_v59, 0.0 }
 0x58e   :  { %1395 = vadd.xlane.f32.xlu1 %v1394_v60  ;;  %4120 = vmatpush3.bf16.msra.mxu1 %v1457_v18 }
 0x58f   :  { %v1404_v63 = vsel %vm69_vm0, %v1400_v61, 0.0 }
 0x590   :  { %1402 = vadd.xlane.f32.xlu0 %v1401_v62 }
 0x592   :  { %1405 = vadd.xlane.f32.xlu1 %v1404_v63 }
 0x619   :  { %v1393_v22 = vpop.xlane.xlu0 %1392 }
 0x61a   :  { %v1397_v3 = vmul.f32 0.041666668, %v1393_v22 }
 0x61b   :  { %v1396_v4 = vpop.xlane.xlu1 %1395 }
 0x61c   :  { %v1398_v5 = vmul.f32 0.041666668, %v1396_v4  ;;  %v1409_v7 = vmul.f32 %v1397_v3, %v1397_v3  ;;  %v1413_v16 = vsub.f32 %v1389_v48, %v1397_v3  ;;  %v4427_v4 = vld [vmem:[%s5561_s3 + $0x70] ss:$36 sps:$4 sm:$0xff]  }
 0x61d   :  { %v1403_v6 = vpop.xlane.xlu0 %1402  ;;  %1813 = vmatprep.subr.bf16.mxu1 %v4427_v4  ;;  %v5139_v4 = vld [vmem:[%s5536_s4 + $0x9] sm:$0xff] }
 0x61e   :  { %v1407_v8 = vmul.f32 0.041666668, %v1403_v6  ;;  %v1410_v10 = vmul.f32 %v1398_v5, %v1398_v5  ;;  %v1414_v14 = vsub.f32 %v1390_v54, %v1398_v5  ;;  %v4430_v5 = vld [vmem:[%s5561_s3 + $0x88] ss:$36 sps:$4 sm:$0xff]  }
 0x61f   :  { %v1406_v9 = vpop.xlane.xlu1 %1405  ;;  %v4425_v6 = vld [vmem:[%s5561_s3 + $0x6c] ss:$36 sps:$4 sm:$0xff]   ;;  %1942 = vmatprep.subr.bf16.mxu0 %v4430_v5  ;;  %v1696_v5 = vrot.slane %v5139_v4, %v159_v27  ;;  %v1684_v27 = vrot.slane %v5139_v4, %v4782_v15 }
 0x620   :  { %v1411_v11 = vsub.f32 %v1407_v8, %v1409_v7  ;;  %v1408_v12 = vmul.f32 0.041666668, %v1406_v9  ;;  %v4428_v7 = vld [vmem:[%s5561_s3 + $0x84] ss:$36 sps:$4 sm:$0xff]   ;;  %v3681_v8 = vld [vmem:[%s5561_s3 + $0xb4] sm:$0xff] }
 0x621   :  { %v3699_v9 = vcombine.high %v3681_v8, %v3681_v8 }
 0x622   :  { %v1415_v50 = vadd.f32 1e-12, %v1411_v11  ;;  %v1412_v13 = vsub.f32 %v1408_v12, %v1410_v10  ;;  %v3684_v10 = vld [vmem:[%s5561_s3 + $0xcc] sm:$0xff]  ;;  %v3698_v11 = vcombine.low %v3681_v8, %v3681_v8 }
 0x623   :  { %v3705_v12 = vcombine.high %v3684_v10, %v3684_v10 }
 0x624   :  { %4523 = vrsqrt.f32 %v1415_v50  ;;  %v1416_v19 = vadd.f32 1e-12, %v1412_v13  ;;  %v3704_v50 = vcombine.low %v3684_v10, %v3684_v10  ;;  %v1787_v13 = vsel %vm250_vm1, %v3698_v11, 0 }
 0x626   :  { %4525 = vrsqrt.f32 %v1416_v19  ;;  %v1805_v19 = vsel %vm250_vm1, %v3704_v50, 0 }
 0x62e   :  { %v4524_v24 = vpop.eup %4523 }
 0x62f   :  { %v1419_v17 = vmul.f32 %v4524_v24, %v1413_v16  ;;  %v4437_v16 = vld [vmem:[%s5561_s3 + $0x78] ss:$36 sps:$4 sm:$0xff]  }
 0x630   :  { %v4526_v30 = vpop.eup %4525 }
 0x631   :  { %v1420_v25 = vmul.f32 %v4526_v30, %v1414_v14  ;;  %v1425_v28 = vmul.f32 %v1424_v21, %v1419_v17 }
 0x633   :  { %v1426_v32 = vmul.f32 %v1424_v21, %v1420_v25  ;;  %v1431_v33 = vadd.f32 %v1430_v31, %v1425_v28 }
 0x635   :  { %v1432_v29 = vadd.f32 %v1430_v31, %v1426_v32 }
 0x637   :  { %v1433_v34 = vpack.c.bf16 %v1432_v29, %v1431_v33 }
 0x639   :  { %4122 = vmatmul.mubr.msk.bf16.vlgmr.msra.gmra.mrb[40].mxu1 %vm69_vm0, %v1433_v34 }
 0x63a   :  { %1845 = vmatprep.mubr.bf16.mxu1 %v4563_v23  ;;  %1814 = vmatpush1.bf16.msra.mxu1 %v4425_v6 }
 0x63b   :  { %3707 = vmatprep.subr.msk.bf16.mxu1 %vm250_vm1, %v3699_v9 }
 0x63e   :  { %1816 = vmatpush1.bf16.msra.mxu1 %v1787_v13 }
 0x63f   :  { %1856 = vmatprep.subr.bf16.mxu1 %v4437_v16 }
 0x70c   :  { %v1493_v38 = vpop.f32.mrb[40].mxu1 }
 0x70d   :  { %v1494_v40 = vadd.f32 %v3659_v37, %v1493_v38  ;;  %v4123_v41 = vpop.f32.mrb[41].mxu1  ;;  %v1638_v38 = vrot.slane %v5031_v51, %v4826_v56 }
 0x70e   :  { %v1496_v46 = vpop.f32.mrb[42].mxu1 }
 0x70f   :  { %v1497_v47 = vadd.f32 %v3659_v37, %v1496_v46  ;;  %v4124_v48 = vpop.f32.mrb[43].mxu1  ;;  %v1500_v52 = vmax.f32 %v1494_v40, 0.0 }
 0x711   :  { %v1501_v53 = vmax.f32 %v1497_v47, 0.0 }
 0x713   :  { %v1502_v54 = vpack.c.bf16 %v1501_v53, %v1500_v52  ;;  %v1644_v53 = vrot.slane %v5031_v51, %v4782_v15 }
 0x715   :  { %4138 = vmatmul.mubr.msk.bf16.vlgmr.msra.gmra.mrb[36].mxu0 %vm1558_vm4, %v1502_v54 }
 0x716   :  { %1974 = vmatprep.mubr.bf16.mxu0 %v4563_v23  ;;  %1943 = vmatpush1.bf16.msra.mxu0 %v4428_v7 }
 0x717   :  { %3713 = vmatprep.subr.msk.bf16.mxu0 %vm250_vm1, %v3705_v12 }
 0x71a   :  { %1945 = vmatpush1.bf16.msra.mxu0 %v1805_v19 }
 0x71b   :  { %4149 = vmatprep.subr.bf16.mxu0 %v4564_v26 }
 0x7e8   :  { %v1596_v59 = vpop.f32.mrb[36].mxu0 }
 0x7e9   :  { %v1597_v60 = vadd.f32 %v3663_v55, %v1596_v59  ;;  %v4139_v61 = vpop.f32.mrb[37].mxu0 }
 0x7ea   :  { %v1599_v62 = vpop.f32.mrb[38].mxu0  ;;  %v4435_v61 = vld [vmem:[%s5561_s3 + $0x74] ss:$36 sps:$4 sm:$0xff]  }
 0x7eb   :  { %v1603_v63 = vadd.f32 %v1597_v60, %v1431_v33  ;;  %v1600_v57 = vadd.f32 %v3663_v55, %v1599_v62  ;;  %v4140_v58 = vpop.f32.mrb[39].mxu0  ;;  %v3682_v55 = vld [vmem:[%s5561_s3 + $0xbc] sm:$0xff] }
 0x7ec   :  { %v4442_v58 = vld [vmem:[%s5561_s3 + $0x80] ss:$36 sps:$4 sm:$0xff]  }
 0x7ed   :  { %v1604_v18 = vadd.f32 %v1600_v57, %v1432_v29  ;;  %v1605_v44 = vsel %vm69_vm0, %v1603_v63, 0.0  ;;  %v1613_v0 = vmul.f32 %v1603_v63, %v1603_v63  ;;  %v3700_v57 = vcombine.low %v3682_v55, %v3682_v55 }
 0x7ee   :  { %1606 = vadd.xlane.f32.xlu0 %v1605_v44  ;;  %v4440_v44 = vld [vmem:[%s5561_s3 + $0x7c] ss:$36 sps:$4 sm:$0xff]  }
 0x7ef   :  { %v1608_v1 = vsel %vm69_vm0, %v1604_v18, 0.0  ;;  %v1614_v2 = vmul.f32 %v1604_v18, %v1604_v18  ;;  %v1615_v22 = vsel %vm69_vm0, %v1613_v0, 0.0  ;;  %v1793_v51 = vsel %vm250_vm1, %v3700_v57, 0 }
 0x7f0   :  { %1609 = vadd.xlane.f32.xlu1 %v1608_v1 }
 0x7f1   :  { %v1618_v3 = vsel %vm69_vm0, %v1614_v2, 0.0 }
 0x7f2   :  { %1616 = vadd.xlane.f32.xlu0 %v1615_v22  ;;  %v4445_v22 = vld [vmem:[%s5561_s3 + $0x8c] ss:$36 sps:$4 sm:$0xff]  }
 0x7f4   :  { %1619 = vadd.xlane.f32.xlu1 %v1618_v3  ;;  %v4446_v3 = vld [vmem:[%s5561_s3 + $0xd4] ss:$0 sps:$4 sm:$0xff]  }
 0x87b   :  { %v1607_v21 = vpop.xlane.xlu0 %1606 }
 0x87c   :  { %v1611_v24 = vmul.f32 0.041666668, %v1607_v21 }
 0x87d   :  { %v1610_v14 = vpop.xlane.xlu1 %1609 }
 0x87e   :  { %v1612_v17 = vmul.f32 0.041666668, %v1610_v14  ;;  %v1623_v25 = vmul.f32 %v1611_v24, %v1611_v24  ;;  %v1627_v37 = vsub.f32 %v1603_v63, %v1611_v24  ;;  %v3701_v63 = vcombine.high %v3682_v55, %v3682_v55 }
 0x87f   :  { %v1617_v30 = vpop.xlane.xlu0 %1616  ;;  %v1680_v55 = vrot.slane %v5139_v4, %v4826_v56 }
 0x880   :  { %v1621_v28 = vmul.f32 0.041666668, %v1617_v30  ;;  %v1624_v32 = vmul.f32 %v1612_v17, %v1612_v17  ;;  %v1628_v41 = vsub.f32 %v1604_v18, %v1612_v17  ;;  %v3683_v18 = vld [vmem:[%s5561_s3 + $0xc4] sm:$0xff] }
 0x881   :  { %v1620_v31 = vpop.xlane.xlu1 %1619  ;;  %v3703_v0 = vcombine.high %v3683_v18, %v3683_v18  ;;  %v3702_v1 = vcombine.low %v3683_v18, %v3683_v18 }
 0x882   :  { %v1625_v33 = vsub.f32 %v1621_v28, %v1623_v25  ;;  %v1622_v29 = vmul.f32 0.041666668, %v1620_v31  ;;  %v1672_v25 = vrot.slane %v5139_v4, %v4719_v43 }
 0x883   :  { %v1799_v2 = vsel %vm250_vm1, %v3702_v1, 0 }
 0x884   :  { %v1629_v34 = vadd.f32 1e-12, %v1625_v33  ;;  %v1626_v35 = vsub.f32 %v1622_v29, %v1624_v32  ;;  %v1688_v32 = vrot.slane %v5139_v4, %v151_v20 }
 0x886   :  { %4527 = vrsqrt.f32 %v1629_v34  ;;  %v1630_v36 = vadd.f32 1e-12, %v1626_v35 }
 0x888   :  { %4529 = vrsqrt.f32 %v1630_v36 }
 0x890   :  { %v4528_v40 = vpop.eup %4527 }
 0x891   :  { %v1633_v46 = vmul.f32 %v4528_v40, %v1627_v37 }
 0x892   :  { %v4530_v47 = vpop.eup %4529 }
 0x893   :  { %v1634_v48 = vmul.f32 %v4530_v47, %v1628_v41  ;;  %v1639_v52 = vmul.f32 %v1638_v38, %v1633_v46  ;;  %v1692_v46 = vrot.slane %v5139_v4, %v155_v39 }
 0x895   :  { %v1640_v54 = vmul.f32 %v1638_v38, %v1634_v48  ;;  %v5091_v59 = vadd.f32 %v1644_v53, %v1639_v52  ;;  %v1676_v38 = vrot.slane %v5139_v4, %v4727_v49 }
 0x897   :  { %v5093_v60 = vadd.f32 %v1644_v53, %v1640_v54 }
 0x899   :  { %v1647_v62 = vpack.c.bf16 %v5093_v60, %v5091_v59 }
 0x89b   :  { %3708 = vmatmul.mubr.msk.bf16.vlgmr.msra.gmra.mrb[44].mxu1 %vm69_vm0, %v1647_v62  ;;  %3714 = vmatmul.mubr.msk.bf16.vlgmr.msra.gmra.mrb[40].mxu0 %vm69_vm0, %v1647_v62 }
 0x89c   :  { %1857 = vmatpush1.bf16.msra.mxu1 %v4435_v61  ;;  %1888 = vmatprep.mubr.bf16.mxu1 %v4563_v23 }
 0x89d   :  { %3709 = vmatprep.subr.msk.bf16.mxu1 %vm250_vm1, %v3701_v63  ;;  %4151 = vmatprep.mubr.msk.bf16.mxu0 %vm4565_vm2, %v4564_v26 }
 0x8a0   :  { %1859 = vmatpush1.bf16.msra.mxu1 %v1793_v51 }
 0x8a1   :  { %1899 = vmatprep.subr.bf16.mxu1 %v4442_v58 }
 0x8a3   :  { %3710 = vmatmul.mubr.msk.bf16.vlgmr.msra.gmra.mrb[48].mxu1 %vm69_vm0, %v1647_v62 }
 0x8a4   :  { %1900 = vmatpush1.bf16.msra.mxu1 %v4440_v44  ;;  %1931 = vmatprep.mubr.bf16.mxu1 %v4563_v23  ;;  %v1811_v23 = vsel %vm250_vm1, %v4446_v3, 0 }
 0x8a5   :  { %3711 = vmatprep.subr.msk.bf16.mxu1 %vm250_vm1, %v3703_v0 }
 0x8a8   :  { %1902 = vmatpush1.bf16.msra.mxu1 %v1799_v2 }
 0x8a9   :  { %4141 = vmatprep.subr.bf16.mxu1 %v4564_v26 }
 0x8ab   :  { %3712 = vmatmul.mubr.msk.bf16.vlgmr.msra.gmra.mrb[52].mxu1 %vm69_vm0, %v1647_v62 }
 0x8ac   :  { %4142 = vmatpush3.bf16.msra.mxu1 %v4445_v22  ;;  %4145 = vmatprep.mubr.msk.bf16.mxu1 %vm4565_vm2, %v4564_v26 }
 0x8ad   :  { %4143 = vmatprep.subr.bf16.mxu1 %v4564_v26 }
 0x8b0   :  { %4144 = vmatpush3.bf16.msra.mxu1 %v1811_v23 }
 0x8b1   :  { %4155 = vmatprep.subr.bf16.mxu1 %v4564_v26 }
 0x8b3   :  { %4146 = vmatmul.mubr.msk.bf16.vlgmr.msra.gmra.mrb[56].mxu1 %vm69_vm0, %v1647_v62 }
 0x8b4   :  { %4157 = vmatprep.mubr.msk.bf16.mxu1 %vm4565_vm2, %v4564_v26 }
 0x96e   :  { %v1847_v6 = vpop.f32.mrb[44].mxu1  ;;  %v1976_v7 = vpop.f32.mrb[40].mxu0 }
 0x96f   :  { %v1977_v8 = vadd.f32 %v1976_v7, %v1696_v5  ;;  %v1849_v9 = vpop.f32.mrb[45].mxu1  ;;  %v5144_v10 = vpop.f32.mrb[41].mxu0  ;;  %v1848_v33 = vadd.f32 %v1847_v6, %v1672_v25 }
 0x970   :  { %v1851_v11 = vpop.f32.mrb[46].mxu1  ;;  %v1980_v12 = vpop.f32.mrb[42].mxu0  ;;  %v1850_v20 = vadd.f32 %v1849_v9, %v1676_v38 }
 0x971   :  { %v2081_v50 = vpack.c.bf16 %v1977_v8, %v1977_v8  ;;  %v5146_v13 = vadd.f32 %v1980_v12, %v1696_v5  ;;  %v1853_v19 = vpop.f32.mrb[47].mxu1  ;;  %v5148_v16 = vpop.f32.mrb[43].mxu0  ;;  %v2026_v37 = vpack.c.bf16 %v1848_v33, %v1848_v33  ;;  %v1852_v58 = vadd.f32 %v1851_v11, %v1672_v25 }
 0x972   :  { %v2128_v54 = vpack.c.bf16 %v1850_v20, %v1850_v20  ;;  %v1854_v1 = vadd.f32 %v1853_v19, %v1676_v38 }
 0x973   :  { %v2086_v21 = vsel %vm250_vm1, %v2081_v50, 0  ;;  %v2332_v44 = vpack.c.bf16 %v1852_v58, %v1852_v58 }
 0x974   :  { %4156 = vmatpush3.bf16.msra.mxu1 %v2086_v21  ;;  %v2434_v22 = vpack.c.bf16 %v1854_v1, %v1854_v1 }
 0x975   :  { %4167 = vmatprep.subr.bf16.mxu1 %v4564_v26 }
 0x976   :  { %v1890_v24 = vpop.f32.mrb[48].mxu1 }
 0x977   :  { %v1892_v14 = vpop.f32.mrb[49].mxu1  ;;  %v1891_v62 = vadd.f32 %v1890_v24, %v1680_v55 }
 0x978   :  { %v1893_v17 = vadd.f32 %v1892_v14, %v1684_v27  ;;  %v1894_v30 = vpop.f32.mrb[50].mxu1 }
 0x979   :  { %v1896_v28 = vpop.f32.mrb[51].mxu1  ;;  %v2230_v57 = vpack.c.bf16 %v1891_v62, %v1891_v62  ;;  %v1895_v23 = vadd.f32 %v1894_v30, %v1680_v55 }
 0x97a   :  { %v2027_v31 = vpack.c.bf16 %v1893_v17, %v1893_v17  ;;  %v1897_v63 = vadd.f32 %v1896_v28, %v1684_v27 }
 0x97b   :  { %v2536_v5 = vpack.c.bf16 %v1895_v23, %v1895_v23 }
 0x97c   :  { %4150 = vmatpush3.bf16.xpose.msra.mxu0 %v2027_v31  ;;  %v2333_v51 = vpack.c.bf16 %v1897_v63, %v1897_v63 }
 0x97d   :  { %4161 = vmatprep.subr.bf16.mxu0 %v4564_v26 }
 0x97e   :  { %v1933_v29 = vpop.f32.mrb[52].mxu1 }
 0x97f   :  { %v1934_v34 = vadd.f32 %v1933_v29, %v1688_v32  ;;  %v1935_v35 = vpop.f32.mrb[53].mxu1 }
 0x980   :  { %v1937_v36 = vpop.f32.mrb[54].mxu1  ;;  %v1936_v47 = vadd.f32 %v1935_v35, %v1692_v46 }
 0x981   :  { %v2129_v40 = vpack.c.bf16 %v1934_v34, %v1934_v34  ;;  %v1939_v41 = vpop.f32.mrb[55].mxu1  ;;  %v1938_v18 = vadd.f32 %v1937_v36, %v1688_v32 }
 0x982   :  { %v2231_v39 = vpack.c.bf16 %v1936_v47, %v1936_v47  ;;  %v1940_v2 = vadd.f32 %v1939_v41, %v1692_v46 }
 0x983   :  { %4152 = vmatmul.mubr.bf16.vlgmr.msra.gmra.mrb[44].mxu0 %v2026_v37  ;;  %v2435_v0 = vpack.c.bf16 %v1938_v18, %v1938_v18 }
 0x984   :  { %4162 = vmatpush3.bf16.xpose.msra.mxu0 %v2129_v40  ;;  %4163 = vmatprep.mubr.msk.bf16.mxu0 %vm4565_vm2, %v4564_v26  ;;  %v2537_v3 = vpack.c.bf16 %v1940_v2, %v1940_v2 }
 0x985   :  { %4173 = vmatprep.subr.bf16.mxu0 %v4564_v26 }
 0x986   :  { %v5168_v48 = vpop.f32.mrb[56].mxu1 }
 0x987   :  { %v4147_v52 = vpop.f32.mrb[57].mxu1 }
 0x988   :  { %v5170_v53 = vpop.f32.mrb[58].mxu1 }
 0x989   :  { %v4148_v61 = vpop.f32.mrb[59].mxu1 }
 0x98b   :  { %4164 = vmatmul.mubr.bf16.vlgmr.msra.gmra.mrb[48].mxu0 %v2128_v54 }
 0x98c   :  { %4174 = vmatpush3.bf16.xpose.msra.mxu0 %v2231_v39  ;;  %4175 = vmatprep.mubr.msk.bf16.mxu0 %vm4565_vm2, %v4564_v26 }
 0x98d   :  { %4185 = vmatprep.subr.bf16.mxu0 %v4564_v26 }
 0x993   :  { %4176 = vmatmul.mubr.bf16.vlgmr.msra.gmra.mrb[52].mxu0 %v2230_v57 }
 0x994   :  { %4186 = vmatpush3.bf16.xpose.msra.mxu0 %v2333_v51  ;;  %4187 = vmatprep.mubr.msk.bf16.mxu0 %vm4565_vm2, %v4564_v26 }
 0x995   :  { %4197 = vmatprep.subr.bf16.mxu0 %v4564_v26 }
 0x99b   :  { %4188 = vmatmul.mubr.bf16.vlgmr.msra.gmra.mrb[56].mxu0 %v2332_v44 }
 0x99c   :  { %4198 = vmatpush3.bf16.xpose.msra.mxu0 %v2435_v0  ;;  %4199 = vmatprep.mubr.msk.bf16.mxu0 %vm4565_vm2, %v4564_v26 }
 0x99d   :  { %4209 = vmatprep.subr.bf16.mxu0 %v4564_v26 }
 0x9a3   :  { %4200 = vmatmul.mubr.bf16.vlgmr.msra.gmra.mrb[60].mxu0 %v2434_v22 }
 0x9a4   :  { %4210 = vmatpush3.bf16.xpose.msra.mxu0 %v2537_v3  ;;  %4211 = vmatprep.mubr.msk.bf16.mxu0 %vm4565_vm2, %v4564_v26 }
 0x9ab   :  { %4212 = vmatmul.mubr.bf16.vlgmr.msra.gmra.mrb[64].mxu0 %v2536_v5 }
 0xa56   :  { %v2062_v6 = vpop.f32.mrb[44].mxu0 }
 0xa57   :  { %v2068_v7 = vmul.f32 0.35355338, %v2062_v6  ;;  %v4153_v8 = vpop.f32.mrb[45].mxu0 }
 0xa58   :  { %v2065_v9 = vpop.f32.mrb[46].mxu0 }
 0xa59   :  { %v4154_v11 = vpop.f32.mrb[47].mxu0  ;;  %v2069_v12 = vsel %vm534_vm3, %v2068_v7, -inf }
 0xa5a   :  { %2070 = vmax.xlane.f32.xlu0 %v2069_v12 }
 0xa5e   :  { %v2164_v50 = vpop.f32.mrb[48].mxu0 }
 0xa5f   :  { %v2170_v19 = vmul.f32 0.35355338, %v2164_v50  ;;  %v4165_v21 = vpop.f32.mrb[49].mxu0 }
 0xa60   :  { %v2167_v27 = vpop.f32.mrb[50].mxu0 }
 0xa61   :  { %v4166_v24 = vpop.f32.mrb[51].mxu0  ;;  %v2171_v14 = vsel %vm534_vm3, %v2170_v19, -inf }
 0xa62   :  { %2172 = vmax.xlane.f32.xlu1 %v2171_v14 }
 0xa66   :  { %v2266_v17 = vpop.f32.mrb[52].mxu0 }
 0xa67   :  { %v2272_v30 = vmul.f32 0.35355338, %v2266_v17  ;;  %v4177_v25 = vpop.f32.mrb[53].mxu0 }
 0xa68   :  { %v2269_v28 = vpop.f32.mrb[54].mxu0 }
 0xa69   :  { %v4178_v31 = vpop.f32.mrb[55].mxu0  ;;  %v2273_v32 = vsel %vm534_vm3, %v2272_v30, -inf }
 0xa6a   :  { %2274 = vmax.xlane.f32.xlu0 %v2273_v32 }
 0xa6e   :  { %v2368_v33 = vpop.f32.mrb[56].mxu0 }
 0xa6f   :  { %v2374_v29 = vmul.f32 0.35355338, %v2368_v33  ;;  %v4189_v34 = vpop.f32.mrb[57].mxu0  ;;  %v1700_v33 = vrot.slane %v5139_v4, %v163_v45 }
 0xa70   :  { %v2371_v35 = vpop.f32.mrb[58].mxu0 }
 0xa71   :  { %v4190_v36 = vpop.f32.mrb[59].mxu0  ;;  %v2375_v37 = vsel %vm534_vm3, %v2374_v29, -inf }
 0xa72   :  { %2376 = vmax.xlane.f32.xlu1 %v2375_v37 }
 0xa76   :  { %v2470_v38 = vpop.f32.mrb[60].mxu0 }
 0xa77   :  { %v2476_v40 = vmul.f32 0.35355338, %v2470_v38  ;;  %v4201_v41 = vpop.f32.mrb[61].mxu0  ;;  %v3688_v38 = vld [vmem:[%s5536_s4 + $0x11] ss:$0 sm:$0xff] }
 0xa78   :  { %v2473_v46 = vpop.f32.mrb[62].mxu0 }
 0xa79   :  { %v4202_v20 = vpop.f32.mrb[63].mxu0  ;;  %v2477_v47 = vsel %vm534_vm3, %v2476_v40, -inf  ;;  %v2020_v46 = vadd.f32 %v3688_v38, %v5168_v48 }
 0xa7a   :  { %2478 = vmax.xlane.f32.xlu0 %v2477_v47 }
 0xa7b   :  { %v2285_v4 = vpack.c.bf16 %v2020_v46, %v2020_v46 }
 0xa7d   :  { %v2290_v47 = vsel %vm250_vm1, %v2285_v4, 0 }
 0xa7e   :  { %v2572_v52 = vpop.f32.mrb[64].mxu0 }
 0xa7f   :  { %v2578_v54 = vmul.f32 0.35355338, %v2572_v52  ;;  %v4213_v55 = vpop.f32.mrb[65].mxu0 }
 0xa80   :  { %v2575_v61 = vpop.f32.mrb[66].mxu0 }
 0xa81   :  { %v4214_v39 = vpop.f32.mrb[67].mxu0  ;;  %v2579_v62 = vsel %vm534_vm3, %v2578_v54, -inf }
 0xa82   :  { %2580 = vmax.xlane.f32.xlu1 %v2579_v62  ;;  %v1983_v62 = vadd.f32 %v5148_v16, %v1700_v33 }
 0xae7   :  { %v2071_v63 = vpop.xlane.xlu0 %2070 }
 0xae8   :  { %v2072_v57 = vsub.f32 %v2068_v7, %v2071_v63 }
 0xaea   :  { %v2073_v51 = vmul.f32 1.442695, %v2072_v57 }
 0xaec   :  { %4531 = vpow2.f32 %v2073_v51  ;;  %v2489_v51 = vpack.c.bf16 %v1983_v62, %v1983_v62 }
 0xaef   :  { %v2173_v58 = vpop.xlane.xlu1 %2172 }
 0xaf0   :  { %v2174_v18 = vsub.f32 %v2170_v19, %v2173_v58 }
 0xaf2   :  { %v2175_v44 = vmul.f32 1.442695, %v2174_v18  ;;  %v2494_v18 = vsel %vm250_vm1, %v2489_v51, 0 }
 0xaf4   :  { %4533 = vpow2.f32 %v2175_v44  ;;  %v2023_v44 = vadd.f32 %v3688_v38, %v5170_v53 }
 0xaf6   :  { %v4532_v0 = vpop.eup %4531 }
 0xaf7   :  { %v2275_v1 = vpop.xlane.xlu0 %2274  ;;  %v2075_v2 = vsel %vm534_vm3, %v4532_v0, 0.0 }
 0xaf8   :  { %v2276_v22 = vsub.f32 %v2272_v30, %v2275_v1  ;;  %2076 = vadd.xlane.f32.xlu0 %v2075_v2  ;;  %v2591_v1 = vpack.c.bf16 %v2023_v44, %v2023_v44 }
 0xafa   :  { %v2277_v3 = vmul.f32 1.442695, %v2276_v22 }
 0xafc   :  { %4535 = vpow2.f32 %v2277_v3  ;;  %v2596_v3 = vsel %vm250_vm1, %v2591_v1, 0 }
 0xafe   :  { %v4534_v23 = vpop.eup %4533 }
 0xaff   :  { %v2377_v5 = vpop.xlane.xlu1 %2376  ;;  %v2177_v6 = vsel %vm534_vm3, %v4534_v23, 0.0 }
 0xb00   :  { %v2378_v8 = vsub.f32 %v2374_v29, %v2377_v5  ;;  %2178 = vadd.xlane.f32.xlu1 %v2177_v6  ;;  %v1979_v29 = vadd.f32 %v5144_v10, %v1700_v33  ;;  %v4447_v6 = vld [vmem:[%s5537_s5 + $0x100] sm:$0xff]   ;;  %v4465_v33 = vld [vmem:[%s5537_s5 + $0xf0] sm:$0xff]  }
 0xb01   :  { %3940 = vmatprep.subr.bf16.mxu0 %v4447_v6 }
 0xb02   :  { %v2379_v7 = vmul.f32 1.442695, %v2378_v8  ;;  %v2183_v36 = vpack.c.bf16 %v1979_v29, %v1979_v29  ;;  %v4448_v8 = vld [vmem:[%s5537_s5 + $0xc0] sm:$0xff]   ;;  %v4466_v29 = vld [vmem:[%s5537_s5 + $0x138] sm:$0xff]  }
 0xb03   :  { %3941 = vmatpush3.bf16.msra.mxu0 %v4448_v8 }
 0xb04   :  { %4537 = vpow2.f32 %v2379_v7  ;;  %v2188_v41 = vsel %vm250_vm1, %v2183_v36, 0  ;;  %v4449_v7 = vld [vmem:[%s5537_s5 + $0x108] sm:$0xff]   ;;  %v4469_v36 = vld [vmem:[%s5537_s5 + $0x170] sm:$0xff]  }
 0xb05   :  { %3942 = vmatprep.subr.bf16.mxu0 %v4449_v7 }
 0xb06   :  { %v4536_v9 = vpop.eup %4535 }
 0xb07   :  { %v2479_v11 = vpop.xlane.xlu0 %2478  ;;  %v2279_v12 = vsel %vm534_vm3, %v4536_v9, 0.0 }
 0xb08   :  { %v2480_v50 = vsub.f32 %v2476_v40, %v2479_v11  ;;  %2280 = vadd.xlane.f32.xlu0 %v2279_v12  ;;  %v4451_v11 = vld [vmem:[%s5537_s5 + $0x110] sm:$0xff]   ;;  %v4452_v12 = vld [vmem:[%s5537_s5 + $0x140] sm:$0xff]  }
 0xb0a   :  { %v2481_v19 = vmul.f32 1.442695, %v2480_v50  ;;  %v4453_v50 = vld [vmem:[%s5537_s5 + $0xd0] sm:$0xff]  }
 0xb0c   :  { %4539 = vpow2.f32 %v2481_v19  ;;  %v4454_v19 = vld [vmem:[%s5537_s5 + $0x118] sm:$0xff]  }
 0xb0e   :  { %v4538_v21 = vpop.eup %4537 }
 0xb0f   :  { %v2581_v27 = vpop.xlane.xlu1 %2580  ;;  %v2381_v24 = vsel %vm534_vm3, %v4538_v21, 0.0 }
 0xb10   :  { %v2582_v14 = vsub.f32 %v2578_v54, %v2581_v27  ;;  %2382 = vadd.xlane.f32.xlu1 %v2381_v24  ;;  %v2387_v54 = vpack.c.bf16 %v5146_v13, %v5146_v13  ;;  %v4456_v27 = vld [vmem:[%s5537_s5 + $0xd8] sm:$0xff]   ;;  %v4457_v24 = vld [vmem:[%s5537_s5 + $0x120] sm:$0xff]  }
 0xb12   :  { %v2583_v17 = vmul.f32 1.442695, %v2582_v14  ;;  %v2392_v39 = vsel %vm250_vm1, %v2387_v54, 0  ;;  %v4458_v14 = vld [vmem:[%s5537_s5 + $0x150] sm:$0xff]  }
 0xb14   :  { %4541 = vpow2.f32 %v2583_v17  ;;  %v4459_v17 = vld [vmem:[%s5537_s5 + $0xe0] sm:$0xff]  }
 0xb16   :  { %v4540_v30 = vpop.eup %4539 }
 0xb17   :  { %v2483_v25 = vsel %vm534_vm3, %v4540_v30, 0.0 }
 0xb18   :  { %2484 = vadd.xlane.f32.xlu0 %v2483_v25  ;;  %v4461_v25 = vld [vmem:[%s5537_s5 + $0x158] sm:$0xff]  }
 0xb1e   :  { %v5196_v28 = vpop.eup %4541 }
 0xb1f   :  { %v2585_v31 = vsel %vm534_vm3, %v5196_v28, 0.0 }
 0xb20   :  { %2586 = vadd.xlane.f32.xlu1 %v2585_v31  ;;  %v4463_v31 = vld [vmem:[%s5537_s5 + $0x130] sm:$0xff]  }
 0xb85   :  { %v2077_v32 = vpop.xlane.xlu0 %2076 }
 0xb86   :  { %4543 = vrcp.f32 %v2077_v32  ;;  %v4464_v32 = vld [vmem:[%s5537_s5 + $0x160] sm:$0xff]  }
 0xb8d   :  { %v2179_v34 = vpop.xlane.xlu1 %2178 }
 0xb8e   :  { %4545 = vrcp.f32 %v2179_v34  ;;  %v4467_v34 = vld [vmem:[%s5537_s5 + $0x168] sm:$0xff]  }
 0xb90   :  { %v4544_v35 = vpop.eup %4543 }
 0xb91   :  { %v2079_v37 = vmul.f32 %v4544_v35, %v4532_v0  ;;  %v4468_v35 = vld [vmem:[%s5537_s5 + $0xf8] sm:$0xff]  }
 0xb93   :  { %v2080_v40 = vpack.c.bf16 %v2079_v37, %v2079_v37  ;;  %v4470_v37 = vld [vmem:[%s5537_s5 + $0x178] sm:$0xff]  }
 0xb95   :  { %4158 = vmatmul.mubr.msk.bf16.vlgmr.msra.gmra.mrb[60].mxu1 %vm534_vm3, %v2080_v40  ;;  %v2281_v42 = vpop.xlane.xlu0 %2280 }
 0xb96   :  { %4168 = vmatpush3.bf16.msra.mxu1 %v2188_v41  ;;  %4547 = vrcp.f32 %v2281_v42  ;;  %4169 = vmatprep.mubr.msk.bf16.mxu1 %vm4565_vm2, %v4564_v26 }
 0xb97   :  { %4179 = vmatprep.subr.bf16.mxu1 %v4564_v26 }
 0xb98   :  { %v4546_v45 = vpop.eup %4545 }
 0xb99   :  { %v2181_v10 = vmul.f32 %v4546_v45, %v4534_v23 }
 0xb9b   :  { %v2182_v20 = vpack.c.bf16 %v2181_v10, %v2181_v10 }
 0xb9d   :  { %4170 = vmatmul.mubr.msk.bf16.vlgmr.msra.gmra.mrb[64].mxu1 %vm534_vm3, %v2182_v20  ;;  %v2383_v52 = vpop.xlane.xlu1 %2382 }
 0xb9e   :  { %4180 = vmatpush3.bf16.msra.mxu1 %v2290_v47  ;;  %4549 = vrcp.f32 %v2383_v52  ;;  %4181 = vmatprep.mubr.msk.bf16.mxu1 %vm4565_vm2, %v4564_v26 }
 0xb9f   :  { %4191 = vmatprep.subr.bf16.mxu1 %v4564_v26 }
 0xba0   :  { %v4548_v48 = vpop.eup %4547 }
 0xba1   :  { %v2283_v55 = vmul.f32 %v4548_v48, %v4536_v9  ;;  %v4450_v9 = vld [vmem:[%s5537_s5 + $0xc8] sm:$0xff]  }
 0xba2   :  { %3943 = vmatpush3.bf16.msra.mxu0 %v4450_v9 }
 0xba3   :  { %v2284_v61 = vpack.c.bf16 %v2283_v55, %v2283_v55  ;;  %3944 = vmatprep.subr.bf16.mxu0 %v4451_v11 }
 0xba5   :  { %v2485_v63 = vpop.xlane.xlu0 %2484  ;;  %4182 = vmatmul.mubr.msk.bf16.vlgmr.msra.gmra.mrb[68].mxu1 %vm534_vm3, %v2284_v61 }
 0xba6   :  { %4551 = vrcp.f32 %v2485_v63  ;;  %4192 = vmatpush3.bf16.msra.mxu1 %v2392_v39  ;;  %4193 = vmatprep.mubr.msk.bf16.mxu1 %vm4565_vm2, %v4564_v26 }
 0xba7   :  { %4203 = vmatprep.subr.bf16.mxu1 %v4564_v26  ;;  %3945 = vmatpush3.bf16.msra.mxu0 %v4453_v50 }
 0xba8   :  { %v4550_v57 = vpop.eup %4549  ;;  %3946 = vmatprep.subr.bf16.mxu0 %v4454_v19 }
 0xba9   :  { %v2385_v58 = vmul.f32 %v4550_v57, %v4538_v21  ;;  %v4455_v21 = vld [vmem:[%s5537_s5 + $0x148] sm:$0xff]  }
 0xbab   :  { %v2386_v13 = vpack.c.bf16 %v2385_v58, %v2385_v58  ;;  %3947 = vmatpush3.bf16.msra.mxu0 %v4456_v27 }
 0xbac   :  { %3948 = vmatprep.subr.bf16.mxu0 %v4457_v24 }
 0xbad   :  { %4194 = vmatmul.mubr.msk.bf16.vlgmr.msra.gmra.mrb[72].mxu1 %vm534_vm3, %v2386_v13  ;;  %v2587_v16 = vpop.xlane.xlu1 %2586 }
 0xbae   :  { %4204 = vmatpush3.bf16.msra.mxu1 %v2494_v18  ;;  %4553 = vrcp.f32 %v2587_v16  ;;  %4205 = vmatprep.mubr.msk.bf16.mxu1 %vm4565_vm2, %v4564_v26 }
 0xbaf   :  { %4215 = vmatprep.subr.bf16.mxu1 %v4564_v26  ;;  %3949 = vmatpush3.bf16.msra.mxu0 %v4459_v17 }
 0xbb0   :  { %v4552_v0 = vpop.eup %4551 }
 0xbb1   :  { %v2487_v2 = vmul.f32 %v4552_v0, %v4540_v30  ;;  %v4460_v30 = vld [vmem:[%s5537_s5 + $0x128] sm:$0xff]  }
 0xbb2   :  { %3950 = vmatprep.subr.bf16.mxu0 %v4460_v30 }
 0xbb3   :  { %v2488_v22 = vpack.c.bf16 %v2487_v2, %v2487_v2 }
 0xbb5   :  { %4206 = vmatmul.mubr.msk.bf16.vlgmr.msra.gmra.mrb[76].mxu1 %vm534_vm3, %v2488_v22 }
 0xbb6   :  { %4216 = vmatpush3.bf16.msra.mxu1 %v2596_v3  ;;  %4217 = vmatprep.mubr.msk.bf16.mxu1 %vm4565_vm2, %v4564_v26 }
 0xbb7   :  { %4221 = vmatprep.subr.bf16.mxu1 %v4564_v26 }
 0xbb8   :  { %v4554_v53 = vpop.eup %4553 }
 0xbb9   :  { %v2589_v23 = vmul.f32 %v4554_v53, %v5196_v28  ;;  %v4462_v28 = vld [vmem:[%s5537_s5 + $0xe8] sm:$0xff]  }
 0xbba   :  { %3951 = vmatpush3.bf16.msra.mxu0 %v4462_v28 }
 0xbbb   :  { %v2590_v5 = vpack.c.bf16 %v2589_v23, %v2589_v23  ;;  %3952 = vmatprep.subr.bf16.mxu0 %v4463_v31 }
 0xbbd   :  { %4218 = vmatmul.mubr.msk.bf16.vlgmr.msra.gmra.mrb[80].mxu1 %vm534_vm3, %v2590_v5  ;;  %v3771_v5 = vld [vmem:[%s5538_s6 + $0x1] ss:$0 sm:$0xff] }
 0xbbe   :  { %4237 = vmatprep.mubr.msk.bf16.mxu1 %vm4565_vm2, %v4564_v26  ;;  %4222 = vmatpush3.bf16.msra.mxu1 %v4452_v12 }
 0xbbf   :  { %4223 = vmatprep.subr.bf16.mxu1 %v4564_v26  ;;  %3953 = vmatpush3.bf16.msra.mxu0 %v4465_v33  ;;  %v4473_v33 = vld [vmem:[%s5540_s9 + $0x30] sm:$0xff]  }
 0xbc0   :  { %3954 = vmatprep.subr.bf16.mxu0 %v4466_v29  ;;  %v4474_v29 = vld [vmem:[%s5540_s9 + $0x38] sm:$0xff]  }
 0xbc2   :  { %4224 = vmatpush3.bf16.msra.mxu1 %v4455_v21 }
 0xbc3   :  { %4225 = vmatprep.subr.bf16.mxu1 %v4564_v26  ;;  %3955 = vmatpush3.bf16.msra.mxu0 %v4468_v35  ;;  %v4476_v35 = vld [vmem:[%s5540_s9 + $0x48] sm:$0xff]  }
 0xbc4   :  { %4241 = vmatprep.subr.bf16.mxu0 %v4564_v26 }
 0xbc6   :  { %4226 = vmatpush3.bf16.msra.mxu1 %v4458_v14 }
 0xbc7   :  { %4227 = vmatprep.subr.bf16.mxu1 %v4564_v26 }
 0xbca   :  { %4228 = vmatpush3.bf16.msra.mxu1 %v4461_v25 }
 0xbcb   :  { %4229 = vmatprep.subr.bf16.mxu1 %v4564_v26 }
 0xbce   :  { %4230 = vmatpush3.bf16.msra.mxu1 %v4464_v32 }
 0xbcf   :  { %4231 = vmatprep.subr.bf16.mxu1 %v4564_v26 }
 0xbd2   :  { %4232 = vmatpush3.bf16.msra.mxu1 %v4467_v34  ;;  %v4475_v34 = vld [vmem:[%s5540_s9 + $0x40] sm:$0xff]  }
 0xbd3   :  { %4233 = vmatprep.subr.bf16.mxu1 %v4564_v26 }
 0xbd6   :  { %4234 = vmatpush3.bf16.msra.mxu1 %v4469_v36 }
 0xbd7   :  { %4235 = vmatprep.subr.bf16.mxu1 %v4564_v26 }
 0xbda   :  { %4236 = vmatpush3.bf16.msra.mxu1 %v4470_v37 }
 0xbdb   :  { %4249 = vmatprep.subr.bf16.mxu1 %v4564_v26 }
 0xc68   :  { %v2122_v38 = vpop.f32.mrb[60].mxu1 }
 0xc69   :  { %v4159_v40 = vpop.f32.mrb[61].mxu1 }
 0xc6a   :  { %v2125_v41 = vpop.f32.mrb[62].mxu1 }
 0xc6b   :  { %v4160_v46 = vpop.f32.mrb[63].mxu1 }
 0xc70   :  { %v2224_v42 = vpop.f32.mrb[64].mxu1 }
 0xc71   :  { %v4171_v45 = vpop.f32.mrb[65].mxu1 }
 0xc72   :  { %v2227_v4 = vpop.f32.mrb[66].mxu1 }
 0xc73   :  { %v4172_v10 = vpop.f32.mrb[67].mxu1 }
 0xc78   :  { %v2326_v20 = vpop.f32.mrb[68].mxu1 }
 0xc79   :  { %v4183_v47 = vpop.f32.mrb[69].mxu1 }
 0xc7a   :  { %v2329_v52 = vpop.f32.mrb[70].mxu1 }
 0xc7b   :  { %v4184_v48 = vpop.f32.mrb[71].mxu1 }
 0xc80   :  { %v2428_v54 = vpop.f32.mrb[72].mxu1 }
 0xc81   :  { %v2638_v55 = vpack.c.bf16 %v2428_v54, %v2122_v38  ;;  %v4195_v61 = vpop.f32.mrb[73].mxu1  ;;  %v5363_v54 = vld [vmem:[%s5541_s11 + $0x4] sm:$0xf] }
 0xc82   :  { %v2431_v39 = vpop.f32.mrb[74].mxu1  ;;  %v2961_v61 = vrot.slane %v5363_v54, %v4719_v43  ;;  %v4477_v43 = vld [vmem:[%s5540_s9 + $0x50] sm:$0xff]  }
 0xc83   :  { %v4196_v62 = vpop.f32.mrb[75].mxu1 }
 0xc88   :  { %v2530_v63 = vpop.f32.mrb[76].mxu1 }
 0xc89   :  { %v2639_v57 = vpack.c.bf16 %v2530_v63, %v2224_v42  ;;  %v4207_v51 = vpop.f32.mrb[77].mxu1 }
 0xc8a   :  { %v2533_v58 = vpop.f32.mrb[78].mxu1 }
 0xc8b   :  { %v4208_v13 = vpop.f32.mrb[79].mxu1  ;;  %2874 = vmatprep.mubr.bf16.mxu0 %v2639_v57 }
 0xc8c   :  { %2875 = vmatmul.mubr.bf16.vlgmr.msra.gmra.mrb[68].mxu0 %v2638_v55  ;;  %v2967_v13 = vrot.slane %v5363_v54, %v4727_v49  ;;  %v4478_v49 = vld [vmem:[%s5540_s9 + $0x58] sm:$0xff]  }
 0xc8d   :  { %4245 = vmatprep.mubr.msk.bf16.mxu0 %vm4565_vm2, %v4564_v26 }
 0xc90   :  { %v2632_v18 = vpop.f32.mrb[80].mxu1 }
 0xc91   :  { %v2640_v44 = vpack.c.bf16 %v2632_v18, %v2326_v20  ;;  %v4219_v16 = vpop.f32.mrb[81].mxu1 }
 0xc92   :  { %v2635_v0 = vpop.f32.mrb[82].mxu1 }
 0xc93   :  { %v4220_v1 = vpop.f32.mrb[83].mxu1  ;;  %4238 = vmatmul.mubr.bf16.vlgmr.msra.gmra.mrb[84].mxu1 %v2640_v44 }
 0xc94   :  { %4261 = vmatprep.mubr.msk.bf16.mxu1 %vm4565_vm2, %v4564_v26  ;;  %4250 = vmatpush3.bf16.msra.mxu1 %v4473_v33  ;;  %v3801_v1 = vld [vmem:[%s5542_s8 + $0x1] ss:$0 sm:$0xff]  ;;  %v4481_v33 = vld [vmem:[%s5544_s14 + $0x10] sm:$0xff]  }
 0xc95   :  { %4251 = vmatprep.subr.bf16.mxu1 %v4564_v26 }
 0xc98   :  { %4252 = vmatpush3.bf16.msra.mxu1 %v4474_v29 }
 0xc99   :  { %4253 = vmatprep.subr.bf16.mxu1 %v4564_v26 }
 0xc9c   :  { %4254 = vmatpush3.bf16.msra.mxu1 %v4475_v34 }
 0xc9d   :  { %4255 = vmatprep.subr.bf16.mxu1 %v4564_v26 }
 0xca0   :  { %4256 = vmatpush3.bf16.msra.mxu1 %v4476_v35 }
 0xca1   :  { %4257 = vmatprep.subr.bf16.mxu1 %v4564_v26 }
 0xca4   :  { %4258 = vmatpush3.bf16.msra.mxu1 %v4477_v43  ;;  %v4566_v43 = vmov 0.0|0.0  }
 0xca5   :  { %4259 = vmatprep.subr.bf16.mxu1 %v4564_v26 }
 0xca8   :  { %4260 = vmatpush3.bf16.msra.mxu1 %v4478_v49  ;;  %v3308_v49 = vld [vmem:[%s5562_s16] sm:$0xff] }
 0xca9   :  { %4343 = vmatprep.subr.bf16.mxu1 %v4566_v43 }
 0xd5f   :  { %v3956_v2 = vpop.f32.mrb[68].mxu0 }
 0xd60   :  { %v3957_v22 = vpop.f32.mrb[69].mxu0 }
 0xd61   :  { %v3958_v3 = vadd.f32 %v3957_v22, %v3956_v2  ;;  %v3959_v53 = vpop.f32.mrb[70].mxu0 }
 0xd62   :  { %v3960_v23 = vpop.f32.mrb[71].mxu0 }
 0xd63   :  { %v3961_v6 = vadd.f32 %v3960_v23, %v3959_v53  ;;  %v2877_v8 = vadd.f32 %v3958_v3, %v3771_v5 }
 0xd65   :  { %v2880_v12 = vadd.f32 %v3961_v6, %v3771_v5 }
 0xd66   :  { %v2917_v7 = vpop.f32.mrb[84].mxu1 }
 0xd67   :  { %v2918_v9 = vadd.f32 %v2917_v7, %v2877_v8  ;;  %v4239_v11 = vpop.f32.mrb[85].mxu1 }
 0xd68   :  { %v2920_v50 = vpop.f32.mrb[86].mxu1 }
 0xd69   :  { %v2926_v19 = vadd.f32 %v2918_v9, %v5091_v59  ;;  %v2921_v21 = vadd.f32 %v2920_v50, %v2880_v12  ;;  %v4240_v27 = vpop.f32.mrb[87].mxu1  ;;  %v4471_v59 = vld [vmem:[%s5539_s7 + $0xc] sm:$0xff]   ;;  %v3818_v9 = vld [vmem:[%s5543_s10 + $0x1] ss:$0 sm:$0xff] }
 0xd6a   :  { %4242 = vmatpush3.bf16.msra.mxu0 %v4471_v59 }
 0xd6b   :  { %v2927_v24 = vadd.f32 %v2921_v21, %v5093_v60  ;;  %v2928_v14 = vsel %vm69_vm0, %v2926_v19, 0.0  ;;  %v2936_v17 = vmul.f32 %v2926_v19, %v2926_v19  ;;  %v4472_v60 = vld [vmem:[%s5539_s7 + $0x14] ss:$0 sps:$4 sm:$0xff]   ;;  %4243 = vmatprep.subr.bf16.mxu0 %v4564_v26 }
 0xd6c   :  { %2929 = vadd.xlane.f32.xlu0 %v2928_v14  ;;  %v2996_v32 = vsel %vm250_vm1, %v4472_v60, 0  ;;  %v4479_v60 = vld [vmem:[%s5544_s14] sm:$0xff]  }
 0xd6d   :  { %v2931_v30 = vsel %vm69_vm0, %v2927_v24, 0.0  ;;  %v2937_v25 = vmul.f32 %v2927_v24, %v2927_v24  ;;  %v2938_v28 = vsel %vm69_vm0, %v2936_v17, 0.0 }
 0xd6e   :  { %2932 = vadd.xlane.f32.xlu1 %v2931_v30  ;;  %4244 = vmatpush3.bf16.msra.mxu0 %v2996_v32  ;;  %v4480_v32 = vld [vmem:[%s5544_s14 + $0x8] sm:$0xff]  }
 0xd6f   :  { %v2941_v31 = vsel %vm69_vm0, %v2937_v25, 0.0  ;;  %4265 = vmatprep.subr.bf16.mxu0 %v4564_v26 }
 0xd70   :  { %2939 = vadd.xlane.f32.xlu0 %v2938_v28 }
 0xd72   :  { %2942 = vadd.xlane.f32.xlu1 %v2941_v31 }
 0xdf9   :  { %v2930_v36 = vpop.xlane.xlu0 %2929 }
 0xdfa   :  { %v2934_v37 = vmul.f32 0.041666668, %v2930_v36 }
 0xdfb   :  { %v2933_v38 = vpop.xlane.xlu1 %2932 }
 0xdfc   :  { %v2935_v40 = vmul.f32 0.041666668, %v2933_v38  ;;  %v2946_v46 = vmul.f32 %v2934_v37, %v2934_v37  ;;  %v2950_v55 = vsub.f32 %v2926_v19, %v2934_v37 }
 0xdfd   :  { %v2940_v41 = vpop.xlane.xlu0 %2939 }
 0xdfe   :  { %v2944_v42 = vmul.f32 0.041666668, %v2940_v41  ;;  %v2947_v4 = vmul.f32 %v2935_v40, %v2935_v40  ;;  %v2951_v62 = vsub.f32 %v2927_v24, %v2935_v40 }
 0xdff   :  { %v2943_v45 = vpop.xlane.xlu1 %2942 }
 0xe00   :  { %v2948_v10 = vsub.f32 %v2944_v42, %v2946_v46  ;;  %v2945_v20 = vmul.f32 0.041666668, %v2943_v45 }
 0xe02   :  { %v2952_v47 = vadd.f32 1e-12, %v2948_v10  ;;  %v2949_v52 = vsub.f32 %v2945_v20, %v2947_v4 }
 0xe04   :  { %4555 = vrsqrt.f32 %v2952_v47  ;;  %v2953_v48 = vadd.f32 1e-12, %v2949_v52  ;;  %v3178_v52 = vrot.slane %v5363_v54, %v4826_v56  ;;  %v4482_v56 = vld [vmem:[%s5544_s14 + $0x18] sm:$0xff]  }
 0xe06   :  { %4557 = vrsqrt.f32 %v2953_v48 }
 0xe0e   :  { %v4556_v39 = vpop.eup %4555 }
 0xe0f   :  { %v2956_v63 = vmul.f32 %v4556_v39, %v2950_v55 }
 0xe10   :  { %v4558_v57 = vpop.eup %4557 }
 0xe11   :  { %v2957_v51 = vmul.f32 %v4558_v57, %v2951_v62  ;;  %v2962_v58 = vmul.f32 %v2961_v61, %v2956_v63 }
 0xe13   :  { %v2963_v18 = vmul.f32 %v2961_v61, %v2957_v51  ;;  %v2968_v44 = vadd.f32 %v2967_v13, %v2962_v58  ;;  %v3184_v61 = vrot.slane %v5363_v54, %v4782_v15  ;;  %v4483_v15 = vld [vmem:[%s5544_s14 + $0x20] sm:$0xff]   ;;  %v4484_v54 = vld [vmem:[%s5544_s14 + $0x28] sm:$0xff]  }
 0xe15   :  { %v2969_v16 = vadd.f32 %v2967_v13, %v2963_v18 }
 0xe17   :  { %v2970_v0 = vpack.c.bf16 %v2969_v16, %v2968_v44 }
 0xe19   :  { %4246 = vmatmul.mubr.msk.bf16.vlgmr.msra.gmra.mrb[72].mxu0 %vm69_vm0, %v2970_v0  ;;  %v4486_v0 = vld [vmem:[%s5544_s14 + $0x38] sm:$0xff]  }
 0xe1a   :  { %4281 = vmatprep.mubr.msk.bf16.mxu0 %vm4565_vm2, %v4564_v26  ;;  %4266 = vmatpush3.bf16.msra.mxu0 %v4479_v60  ;;  %v4488_v60 = vld [vmem:[%s5544_s14 + $0x8] sm:$0xff]  }
 0xe1b   :  { %4267 = vmatprep.subr.bf16.mxu0 %v4564_v26 }
 0xe1e   :  { %4268 = vmatpush3.bf16.msra.mxu0 %v4480_v32 }
 0xe1f   :  { %4269 = vmatprep.subr.bf16.mxu0 %v4564_v26 }
 0xe22   :  { %4270 = vmatpush3.bf16.msra.mxu0 %v4481_v33  ;;  %v4489_v33 = vld [vmem:[%s5544_s14 + $0x10] sm:$0xff]  }
 0xe23   :  { %4271 = vmatprep.subr.bf16.mxu0 %v4564_v26 }
 0xe26   :  { %4272 = vmatpush3.bf16.msra.mxu0 %v4482_v56 }
 0xe27   :  { %4273 = vmatprep.subr.bf16.mxu0 %v4564_v26 }
 0xe2a   :  { %4274 = vmatpush3.bf16.msra.mxu0 %v4483_v15 }
 0xe2b   :  { %4275 = vmatprep.subr.bf16.mxu0 %v4564_v26 }
 0xe2e   :  { %4276 = vmatpush3.bf16.msra.mxu0 %v4484_v54 }
 0xe2f   :  { %4277 = vmatprep.subr.bf16.mxu0 %v4564_v26 }
 0xeec   :  { %v3032_v2 = vpop.f32.mrb[72].mxu0 }
 0xeed   :  { %v3033_v22 = vadd.f32 %v3801_v1, %v3032_v2  ;;  %v4247_v3 = vpop.f32.mrb[73].mxu0  ;;  %v3310_v2 = vld [vmem:[%s5562_s16 + $0x10] sm:$0xff] }
 0xeee   :  { %v3035_v53 = vpop.f32.mrb[74].mxu0  ;;  %v3311_v3 = vld [vmem:[%s5562_s16 + $0x18] sm:$0xff] }
 0xeef   :  { %v3036_v23 = vadd.f32 %v3801_v1, %v3035_v53  ;;  %v4248_v5 = vpop.f32.mrb[75].mxu0  ;;  %v3039_v6 = vmax.f32 %v3033_v22, 0.0  ;;  %v3309_v1 = vld [vmem:[%s5562_s16 + $0x8] sm:$0xff]  ;;  %v5446_v53 = vpack.c.bf16 %v3311_v3, %v3310_v2 }
 0xef0   :  { %v5440_v22 = vpack.c.bf16 %v3309_v1, %v3308_v49  ;;  %v3313_v5 = vld [vmem:[%s5562_s16 + $0x28] sm:$0xff] }
 0xef1   :  { %v3040_v8 = vmax.f32 %v3036_v23, 0.0  ;;  %v3312_v23 = vld [vmem:[%s5562_s16 + $0x20] sm:$0xff] }
 0xef3   :  { %v3041_v7 = vpack.c.bf16 %v3040_v8, %v3039_v6  ;;  %v5456_v6 = vpack.c.bf16 %v3313_v5, %v3312_v23  ;;  %v3187_v8 = vld [vmem:[%s5546_s12] sm:$0xff] }
 0xef5   :  { %4262 = vmatmul.mubr.msk.bf16.vlgmr.msra.gmra.mrb[88].mxu1 %vm1558_vm4, %v3041_v7 }
 0xef6   :  { %4301 = vmatprep.mubr.msk.f32.mxu1 %vm4565_vm2, %v4564_v26  ;;  %4345 = vmatpush3.bf16.msra.mxu1 %v5440_v22 }
 0xef7   :  { %4346 = vmatprep.subr.bf16.mxu1 %v4566_v43 }
 0xefa   :  { %4348 = vmatpush3.bf16.msra.mxu1 %v5446_v53 }
 0xefb   :  { %4349 = vmatprep.subr.bf16.mxu1 %v4566_v43 }
 0xefe   :  { %4351 = vmatpush3.bf16.msra.mxu1 %v5456_v6 }
 0xeff   :  { %4352 = vmatprep.subr.bf16.mxu1 %v4566_v43 }
 0xfc8   :  { %v3136_v11 = vpop.f32.mrb[88].mxu1 }
 0xfc9   :  { %v3137_v12 = vadd.f32 %v3818_v9, %v3136_v11  ;;  %v4263_v50 = vpop.f32.mrb[89].mxu1 }
 0xfca   :  { %v3139_v19 = vpop.f32.mrb[90].mxu1 }
 0xfcb   :  { %v3143_v21 = vadd.f32 %v3137_v12, %v2968_v44  ;;  %v3140_v27 = vadd.f32 %v3818_v9, %v3139_v19  ;;  %v4264_v24 = vpop.f32.mrb[91].mxu1 }
 0xfcc   :  { %v3188_v24 = vld [vmem:[%s5547_s13] sm:$0x1] }
 0xfcd   :  { %v3144_v14 = vadd.f32 %v3140_v27, %v2969_v16  ;;  %v3145_v17 = vsel %vm69_vm0, %v3143_v21, 0.0  ;;  %v3153_v30 = vmul.f32 %v3143_v21, %v3143_v21  ;;  %v4485_v16 = vld [vmem:[%s5544_s14 + $0x30] sm:$0xff]  }
 0xfce   :  { %3146 = vadd.xlane.f32.xlu0 %v3145_v17  ;;  %4278 = vmatpush3.bf16.msra.mxu0 %v4485_v16 }
 0xfcf   :  { %v3155_v25 = vsel %vm69_vm0, %v3153_v30, 0.0  ;;  %v3154_v28 = vmul.f32 %v3144_v14, %v3144_v14  ;;  %v3148_v31 = vsel %vm69_vm0, %v3144_v14, 0.0  ;;  %4279 = vmatprep.subr.bf16.mxu0 %v4564_v26 }
 0xfd0   :  { %3156 = vadd.xlane.f32.xlu1 %v3155_v25 }
 0xfd1   :  { %v3158_v59 = vsel %vm69_vm0, %v3154_v28, 0.0  ;;  %v4487_v28 = vld [vmem:[%s5544_s14] sm:$0xff]  }
 0xfd2   :  { %3149 = vadd.xlane.f32.xlu0 %v3148_v31  ;;  %4280 = vmatpush3.bf16.msra.mxu0 %v4486_v0 }
 0xfd3   :  { %4304 = vmatprep.subr.bf16.mxu0 %v4564_v26 }
 0xfd4   :  { %3159 = vadd.xlane.f32.xlu1 %v3158_v59 }
0x105b   :  { %v3147_v29 = vpop.xlane.xlu0 %3146 }
0x105c   :  { %v3151_v34 = vmul.f32 0.041666668, %v3147_v29 }
0x105d   :  { %v3157_v35 = vpop.xlane.xlu1 %3156 }
0x105e   :  { %v3163_v36 = vmul.f32 %v3151_v34, %v3151_v34  ;;  %v3161_v37 = vmul.f32 0.041666668, %v3157_v35  ;;  %v3167_v47 = vsub.f32 %v3143_v21, %v3151_v34  ;;  %v4490_v34 = vld [vmem:[%s5544_s14 + $0x18] sm:$0xff]  }
0x105f   :  { %v3150_v38 = vpop.xlane.xlu0 %3149 }
0x1060   :  { %v3165_v40 = vsub.f32 %v3161_v37, %v3163_v36  ;;  %v3152_v41 = vmul.f32 0.041666668, %v3150_v38  ;;  %v4491_v36 = vld [vmem:[%s5544_s14 + $0x20] sm:$0xff]   ;;  %v4492_v38 = vld [vmem:[%s5544_s14 + $0x28] sm:$0xff]  }
0x1061   :  { %v3160_v46 = vpop.xlane.xlu1 %3159 }
0x1062   :  { %v3169_v42 = vadd.f32 1e-12, %v3165_v40  ;;  %v3164_v45 = vmul.f32 %v3152_v41, %v3152_v41  ;;  %v3162_v4 = vmul.f32 0.041666668, %v3160_v46  ;;  %v3168_v39 = vsub.f32 %v3144_v14, %v3152_v41  ;;  %v4493_v41 = vld [vmem:[%s5544_s14 + $0x30] sm:$0xff]  }
0x1064   :  { %4559 = vrsqrt.f32 %v3169_v42  ;;  %v3166_v10 = vsub.f32 %v3162_v4, %v3164_v45  ;;  %v4494_v42 = vld [vmem:[%s5544_s14 + $0x38] sm:$0xff]  }
0x1066   :  { %v3170_v20 = vadd.f32 1e-12, %v3166_v10  ;;  %v3314_v10 = vld [vmem:[%s5562_s16 + $0x30] sm:$0xff] }
0x1068   :  { %4561 = vrsqrt.f32 %v3170_v20  ;;  %v3315_v20 = vld [vmem:[%s5562_s16 + $0x38] sm:$0xff] }
0x106e   :  { %v4560_v48 = vpop.eup %4559 }
0x106f   :  { %v3173_v55 = vmul.f32 %v4560_v48, %v3167_v47  ;;  %v4353_v47 = vpack.c.bf16 %v3315_v20, %v3314_v10  ;;  %v3218_v48 = vld [vmem:[%s5549_s15] sm:$0x1] }
0x1071   :  { %v3179_v62 = vmul.f32 %v3178_v52, %v3173_v55  ;;  %4354 = vmatpush3.bf16.msra.mxu1 %v4353_v47 }
0x1072   :  { %v4562_v63 = vpop.eup %4561  ;;  %4355 = vmatprep.subr.bf16.mxu1 %v4566_v43 }
0x1073   :  { %v3185_v57 = vadd.f32 %v3184_v61, %v3179_v62  ;;  %v3174_v51 = vmul.f32 %v4562_v63, %v3168_v39 }
0x1075   :  { %v3189_v58 = vsel %vm69_vm0, %v3185_v57, -inf  ;;  %v3180_v13 = vmul.f32 %v3178_v52, %v3174_v51  ;;  %v23_v52 = vstv %s5548_s17  ;;  %v3422_v51 = vld [vmem:[%s5549_s15] sm:$0x1] }
0x1076   :  { %3190 = vmax.xlane.f32.xlu0 %v3189_v58  ;;  %24 = vst [vmem:[#allocation2] sm:$0x1] %v23_v52 }
0x1077   :  { %v3186_v18 = vadd.f32 %v3184_v61, %v3180_v13 }
0x1079   :  { %v3393_v44 = vsel %vm69_vm0, %v3186_v18, -inf }
0x107a   :  { %3394 = vmax.xlane.f32.xlu1 %v3393_v44 }
0x107d   :  { %v3316_v15 = vld [vmem:[#allocation2] sm:$0x1] }
0x1103   :  { %v3191_v7 = vpop.xlane.xlu0 %3190 }
0x1104   :  { %v3192_v9 = vmul.f32 %v3191_v7, %v3187_v8 }
0x1106   :  { %v3193_v11 = vrot.slane %v3192_v9, 4 }
0x1107   :  { %v3395_v27 = vpop.xlane.xlu1 %3394 }
0x1108   :  { %v3194_v12 = vadd.f32 %v3193_v11, %v3192_v9  ;;  %v3396_v17 = vmul.f32 %v3395_v27, %v3187_v8 }
0x110a   :  { %v3195_v50 = vrot.slane %v3194_v12, 2  ;;  %v3397_v31 = vrot.slane %v3396_v17, 4 }
0x110c   :  { %v3196_v19 = vadd.f32 %v3195_v50, %v3194_v12  ;;  %v3398_v32 = vadd.f32 %v3397_v31, %v3396_v17 }
0x110e   :  { %v3197_v21 = vrot.slane %v3196_v19, 1  ;;  %v3399_v29 = vrot.slane %v3398_v32, 2 }
0x1110   :  { %v3198_v14 = vadd.f32 %v3197_v21, %v3196_v19  ;;  %v3400_v35 = vadd.f32 %v3399_v29, %v3398_v32 }
0x1112   :  { %v3199_v30 = vadd.f32 %v3198_v14, %v3188_v24  ;;  %v3401_v37 = vrot.slane %v3400_v35, 1 }
0x1114   :  { %v3200_v25 = vmax.f32 %v3199_v30, 0.0  ;;  %v3402_v40 = vadd.f32 %v3401_v37, %v3400_v35 }
0x1116   :  { %v3201_v59 = vpack.c.bf16 %v3200_v25, %v3200_v25  ;;  %v3403_v46 = vadd.f32 %v3402_v40, %v3188_v24 }
0x1118   :  { %4282 = vmatmul.mubr.bf16.vlgmr.msra.gmra.mrb[76].mxu0 %v3201_v59  ;;  %v3404_v45 = vmax.f32 %v3403_v46, 0.0 }
0x1119   :  { %4305 = vmatpush3.bf16.msra.mxu0 %v4487_v28  ;;  %4320 = vmatprep.mubr.msk.bf16.mxu0 %vm4565_vm2, %v4564_v26 }
0x111a   :  { %4306 = vmatprep.subr.bf16.mxu0 %v4564_v26  ;;  %v3405_v4 = vpack.c.bf16 %v3404_v45, %v3404_v45 }
0x111d   :  { %4307 = vmatpush3.bf16.msra.mxu0 %v4488_v60 }
0x111e   :  { %4308 = vmatprep.subr.bf16.mxu0 %v4564_v26 }
0x1121   :  { %4309 = vmatpush3.bf16.msra.mxu0 %v4489_v33 }
0x1122   :  { %4310 = vmatprep.subr.bf16.mxu0 %v4564_v26 }
0x1125   :  { %4311 = vmatpush3.bf16.msra.mxu0 %v4490_v34 }
0x1126   :  { %4312 = vmatprep.subr.bf16.mxu0 %v4564_v26 }
0x1129   :  { %4313 = vmatpush3.bf16.msra.mxu0 %v4491_v36 }
0x112a   :  { %4314 = vmatprep.subr.bf16.mxu0 %v4564_v26 }
0x112d   :  { %4315 = vmatpush3.bf16.msra.mxu0 %v4492_v38 }
0x112e   :  { %4316 = vmatprep.subr.bf16.mxu0 %v4564_v26 }
0x1131   :  { %4317 = vmatpush3.bf16.msra.mxu0 %v4493_v41 }
0x1132   :  { %4318 = vmatprep.subr.bf16.mxu0 %v4564_v26 }
0x1135   :  { %4319 = vmatpush3.bf16.msra.mxu0 %v4494_v42 }
0x1138   :  { %4321 = vmatmul.mubr.bf16.vlgmr.msra.gmra.mrb[80].mxu0 %v3405_v4 }
0x11eb   :  { %v3301_v55 = vpop.f32.mrb[76].mxu0 }
0x11ec   :  { %v3302_v61 = vadd.f32 %v3301_v55, %v3218_v48  ;;  %v4283_v39 = vpop.f32.mrb[77].mxu0 }
0x11ed   :  { %v3304_v62 = vpop.f32.mrb[78].mxu0 }
0x11ee   :  { %v3307_v63 = vmax.f32 %v3302_v61, 0.0  ;;  %v4284_v57 = vpop.f32.mrb[79].mxu0 }
0x11f0   :  { %4302 = vmatmul.mubr.msk.f32.vlgmr.msra.gmra.mrb[92].mxu1 %vm3317_vm5, %v3307_v63 }
0x11f1   :  { %4357 = vmatpush3.bf16.msra.mxu1 %v5440_v22  ;;  %4340 = vmatprep.mubr.msk.f32.mxu1 %vm4565_vm2, %v4564_v26 }
0x11f2   :  { %4358 = vmatprep.subr.bf16.mxu1 %v4566_v43 }
0x11f5   :  { %4360 = vmatpush3.bf16.msra.mxu1 %v5446_v53 }
0x11f6   :  { %4361 = vmatprep.subr.bf16.mxu1 %v4566_v43 }
0x11f9   :  { %4363 = vmatpush3.bf16.msra.mxu1 %v5456_v6 }
0x11fa   :  { %4364 = vmatprep.subr.bf16.mxu1 %v4566_v43  ;;  %v3520_v43 = vld [vmem:[#allocation2] sm:$0x1] }
0x11fd   :  { %4366 = vmatpush3.bf16.msra.mxu1 %v4353_v47 }
0x120b   :  { %v3505_v58 = vpop.f32.mrb[80].mxu0 }
0x120c   :  { %v3506_v13 = vadd.f32 %v3505_v58, %v3422_v51  ;;  %v4322_v18 = vpop.f32.mrb[81].mxu0 }
0x120d   :  { %v3508_v44 = vpop.f32.mrb[82].mxu0 }
0x120e   :  { %v3511_v26 = vmax.f32 %v3506_v13, 0.0  ;;  %v4323_v56 = vpop.f32.mrb[83].mxu0 }
0x1210   :  { %4341 = vmatmul.mubr.msk.f32.vlgmr.msra.gmra.mrb[94].mxu1 %vm3317_vm5, %v3511_v26 }
0x12c3   :  { %v3387_v54 = vpop.f32.mrb[92].mxu1 }
0x12c4   :  { %v3388_v16 = vadd.f32 %v3387_v54, %v3316_v15  ;;  %v4303_v0 = vpop.f32.mrb[93].mxu1 }
0x12c6   :  { %3392 = vst.msk [vmem:[%s5550_s18] sm:$0x1] %vm3391_vm6, %v3388_v16 }
0x12e3   :  { %v3590_v49 = vpop.f32.mrb[94].mxu1 }
0x12e4   :  { %v3591_v1 = vadd.f32 %v3590_v49, %v3520_v43  ;;  %v4342_v2 = vpop.f32.mrb[95].mxu1 }
0x12e6   :  { %3844 = vst.msk [vmem:[%s5550_s18 + $0x1] sm:$0x1] %vm3391_vm6, %v3591_v1 }

</bundles_post_ra>
